<compile_context>
chip_gen: v7x
topology: tpu7x:2x2x1
jax: 0.10.0
libtpu: 0.0.40
codegen_flags: <defaults>
</compile_context>

<pallas_src>
import functools
import math

import jax
import jax.numpy as jnp
from jax.experimental import pallas as pl
from jax.experimental.pallas import tpu as pltpu


# ----------------------- fused residual-block kernel -------------------------
def _resblock_kernel(stride, has_proj, H, W, Ho, Wo, *refs):
    """One batch element per grid step.  All feature maps stay in VMEM.

    refs (inputs): x_ref, w1_ref, s1_ref, b1_ref, w2_ref, s2_ref, b2_ref,
                   [ws_ref, ss_ref, bs_ref]   (projection shortcut only)
    refs (output): o_ref (1, Ho, Wo, Cout) bf16
    scratch:       hpad_ref (Ho+2, Wo+2, Cout) bf16   conv1 output, zero-padded
                   [xpad_ref (H+2, W+2, Cin) bf16]    stride-1 in-kernel input pad
    """
    if has_proj:
        (x_ref, w1_ref, s1_ref, b1_ref, w2_ref, s2_ref, b2_ref,
         ws_ref, ss_ref, bs_ref, o_ref, *scratch) = refs
    else:
        (x_ref, w1_ref, s1_ref, b1_ref, w2_ref, s2_ref, b2_ref,
         o_ref, *scratch) = refs
        ws_ref = ss_ref = bs_ref = None

    if stride == 1:
        hpad_ref, xpad_ref = scratch
    else:
        (hpad_ref,) = scratch
        xpad_ref = None

    Cin = x_ref.shape[-1]
    Cout = o_ref.shape[-1]

    # --- conv1 input access (stride handled without strided ref reads) ---
    if stride == 1:
        # In-kernel spatial padding: zero scratch, copy interior.
        xpad_ref[...] = jnp.zeros(xpad_ref.shape, xpad_ref.dtype)
        xpad_ref[pl.ds(1, H), pl.ds(1, W), :] = x_ref[0]

        def conv1_tap(di, dj):                      # (Ho, Wo, Cin)
            return xpad_ref[pl.ds(di, Ho), pl.ds(dj, Wo), :]

        def shortcut_in():                          # (Ho, Wo, Cin)
            return x_ref[0]
    else:
        # x_ref is the phase-decomposed padded input: (1, 4, Hh, Wh, Cin) with
        # phase 2*p+q holding xp[2i+p, 2j+q].  Tap (di,dj) at stride 2 is a plain
        # stride-1 window of phase (di%2, dj%2).
        def conv1_tap(di, dj):
            ph = 2 * (di % 2) + (dj % 2)
            return x_ref[0, ph, pl.ds(di // 2, Ho), pl.ds(dj // 2, Wo), :]

        def shortcut_in():                          # x[2r, 2c] == phase (1,1)
            return x_ref[0, 3, pl.ds(0, Ho), pl.ds(0, Wo), :]

    # ---------------- conv1 (3x3, stride s) + BN + ReLU ----------------
    acc = None
    for di in range(3):
        for dj in range(3):
            lhs = conv1_tap(di, dj).reshape(Ho * Wo, Cin)        # bf16 (M, Cin)
            c = jnp.dot(lhs, w1_ref[di, dj],                     # (Cin, Cout)
                        preferred_element_type=jnp.float32)
            acc = c if acc is None else acc + c                  # live f32 accum
    h = jnp.maximum(acc * s1_ref[...] + b1_ref[...], 0.0).astype(jnp.bfloat16)

    # conv1 output -> zero-padded VMEM scratch (conv2 input); never leaves VMEM.
    hpad_ref[...] = jnp.zeros(hpad_ref.shape, hpad_ref.dtype)
    hpad_ref[pl.ds(1, Ho), pl.ds(1, Wo), :] = h.reshape(Ho, Wo, Cout)

    # ---------------- shortcut: identity or 1x1(stride) + BN ----------------
    if has_proj:
        xs = shortcut_in().reshape(Ho * Wo, Cin)
        sc = (jnp.dot(xs, ws_ref[...], preferred_element_type=jnp.float32)
              * ss_ref[...] + bs_ref[...])
    else:
        sc = shortcut_in().reshape(Ho * Wo, Cout).astype(jnp.float32)

    # -------- conv2 (3x3, stride 1) + BN + residual add + ReLU --------
    acc2 = None
    for di in range(3):
        for dj in range(3):
            lhs = hpad_ref[pl.ds(di, Ho), pl.ds(dj, Wo), :].reshape(Ho * Wo, Cout)
            c = jnp.dot(lhs, w2_ref[di, dj], preferred_element_type=jnp.float32)
            acc2 = c if acc2 is None else acc2 + c
    y = jnp.maximum(acc2 * s2_ref[...] + b2_ref[...] + sc, 0.0)
    o_ref[0] = y.reshape(Ho, Wo, Cout).astype(o_ref.dtype)


# ----------------------------- block wrapper ---------------------------------
def residual_block_nhwc(params, x, *, stride):
    """Fused ResidualBlock forward.  x: [B,H,W,Cin] NHWC; returns bf16 NHWC."""
    assert stride in (1, 2)
    x = x.astype(jnp.bfloat16)
    B, H, W, Cin = x.shape
    w1 = params["w1"].astype(jnp.bfloat16)
    w2 = params["w2"].astype(jnp.bfloat16)
    Cout = w1.shape[-1]
    s1, b1 = [a.reshape(1, Cout).astype(jnp.float32) for a in params["bn1"]]
    s2, b2 = [a.reshape(1, Cout).astype(jnp.float32) for a in params["bn2"]]
    has_proj = "ws" in params

    Ho = (H + 2 - 3) // stride + 1
    Wo = (W + 2 - 3) // stride + 1

    if stride == 1:
        x_in = x
        x_spec = pl.BlockSpec((1, H, W, Cin), lambda b: (b, 0, 0, 0))
        scratch = [pltpu.VMEM((Ho + 2, Wo + 2, Cout), jnp.bfloat16),
                   pltpu.VMEM((H + 2, W + 2, Cin), jnp.bfloat16)]
    else:
        # Phase decomposition of the spatially padded input (tiny wrapper-side op)
        # so stride-2 taps become stride-1 windows inside the kernel.
        Hp, Wp = H + 2, W + 2
        Hh, Wh = (Hp + 1) // 2, (Wp + 1) // 2
        xp = jnp.pad(x, ((0, 0), (1, 2 * Hh - Hp + 1), (1, 2 * Wh - Wp + 1), (0, 0)))
        x_in = (xp.reshape(B, Hh, 2, Wh, 2, Cin)
                  .transpose(0, 2, 4, 1, 3, 5)
                  .reshape(B, 4, Hh, Wh, Cin))
        x_spec = pl.BlockSpec((1, 4, Hh, Wh, Cin), lambda b: (b, 0, 0, 0, 0))
        scratch = [pltpu.VMEM((Ho + 2, Wo + 2, Cout), jnp.bfloat16)]

    in_specs = [
        x_spec,
        pl.BlockSpec((3, 3, Cin, Cout), lambda b: (0, 0, 0, 0)),
        pl.BlockSpec((1, Cout), lambda b: (0, 0)),
        pl.BlockSpec((1, Cout), lambda b: (0, 0)),
        pl.BlockSpec((3, 3, Cout, Cout), lambda b: (0, 0, 0, 0)),
        pl.BlockSpec((1, Cout), lambda b: (0, 0)),
        pl.BlockSpec((1, Cout), lambda b: (0, 0)),
    ]
    args = [x_in, w1, s1, b1, w2, s2, b2]
    if has_proj:
        ws = params["ws"].reshape(Cin, Cout).astype(jnp.bfloat16)
        ss, bs = [a.reshape(1, Cout).astype(jnp.float32) for a in params["bns"]]
        in_specs += [pl.BlockSpec((Cin, Cout), lambda b: (0, 0)),
                     pl.BlockSpec((1, Cout), lambda b: (0, 0)),
                     pl.BlockSpec((1, Cout), lambda b: (0, 0))]
        args += [ws, ss, bs]

    kernel = functools.partial(_resblock_kernel, stride, has_proj, H, W, Ho, Wo)
    return pl.pallas_call(
        kernel,
        out_shape=jax.ShapeDtypeStruct((B, Ho, Wo, Cout), jnp.bfloat16),
        grid_spec=pltpu.PrefetchScalarGridSpec(
            num_scalar_prefetch=0,
            grid=(B,),
            in_specs=in_specs,
            out_specs=pl.BlockSpec((1, Ho, Wo, Cout), lambda b: (b, 0, 0, 0)),
            scratch_shapes=scratch,
        ),
        compiler_params=pltpu.CompilerParams(
            dimension_semantics=("parallel",)),
    )(*args)


# ------------------------------ parameter init --------------------------------
def init_residual_block(key, cin, cout, stride, eps=1e-5):
    ks = jax.random.split(key, 6)

    def conv_w(k, kh, kw, ci, co):
        std = math.sqrt(2.0 / (kh * kw * ci))
        return (std * jax.random.normal(k, (kh, kw, ci, co),
                                        jnp.float32)).astype(jnp.bfloat16)

    def bn(k, c):
        k1, k2, k3, k4 = jax.random.split(k, 4)
        gamma = 1.0 + 0.1 * jax.random.normal(k1, (c,), jnp.float32)
        beta = 0.1 * jax.random.normal(k2, (c,), jnp.float32)
        mean = 0.1 * jax.random.normal(k3, (c,), jnp.float32)
        var = 1.0 + 0.1 * jax.random.uniform(k4, (c,), jnp.float32)
        scale = gamma / jnp.sqrt(var + eps)        # folded eval-mode BN
        return scale, beta - mean * scale

    p = {"w1": conv_w(ks[0], 3, 3, cin, cout), "bn1": bn(ks[1], cout),
         "w2": conv_w(ks[2], 3, 3, cout, cout), "bn2": bn(ks[3], cout)}
    if stride != 1 or cin != cout:
        p["ws"] = conv_w(ks[4], 1, 1, cin, cout)
        p["bns"] = bn(ks[5], cout)
    return p


# ------------------------------ pure-JAX reference ----------------------------
def residual_block_ref(params, x, *, stride):
    """Mirror of the kernel's numerics on NHWC input: bf16 conv inputs, f32 accum,
    bf16 conv1 output and bf16 block output."""
    f32 = jnp.float32
    xf = x.astype(jnp.bfloat16).astype(f32)

    def conv(a, w, s, pad):
        return jax.lax.conv_general_dilated(
            a, w.astype(f32), (s, s), ((pad, pad), (pad, pad)),
            dimension_numbers=("NHWC", "HWIO", "NHWC"),
            precision=jax.lax.Precision.HIGHEST)

    def bn(y, sb):
        s, b = sb
        return y * s.astype(f32) + b.astype(f32)

    h = jax.nn.relu(bn(conv(xf, params["w1"], stride, 1), params["bn1"]))
    h = h.astype(jnp.bfloat16).astype(f32)              # kernel stores conv1 out in bf16
    left = bn(conv(h, params["w2"], 1, 1), params["bn2"])
    if "ws" in params:
        sc = bn(conv(xf, params["ws"], stride, 0), params["bns"])
    else:
        sc = xf
    out = jax.nn.relu(left + sc)
    return out.astype(jnp.bfloat16)                     # kernel outputs bf16


if __name__ == "__main__":
    key = jax.random.PRNGKey(0)
    kx, ka, kb = jax.random.split(key, 3)

    B, Cin, H, W = 2, 64, 16, 16
    x = jax.random.normal(kx, (B, Cin, H, W), jnp.float32)   # NCHW, PyTorch layout

    # Block A: 64 -> 128, stride 2 (projection shortcut); Block B: 128 -> 128 (identity).
    params_a = init_residual_block(ka, 64, 128, stride=2)
    params_b = init_residual_block(kb, 128, 128, stride=1)

    @jax.jit
    def fwd(pa, pb, x_nchw):
        h = jnp.transpose(x_nchw, (0, 2, 3, 1)).astype(jnp.bfloat16)  # NHWC once
        h = residual_block_nhwc(pa, h, stride=2)
        h = residual_block_nhwc(pb, h, stride=1)
        return jnp.transpose(h, (0, 3, 1, 2)).astype(jnp.float32)     # NCHW once

    out = jax.block_until_ready(fwd(params_a, params_b, x))

    xr = jnp.transpose(x, (0, 2, 3, 1))
    r = residual_block_ref(params_a, xr, stride=2)
    r = residual_block_ref(params_b, r, stride=1)
    ref = jnp.transpose(r.astype(jnp.float32), (0, 3, 1, 2))

    assert out.shape == (B, 128, 8, 8)
    assert bool(jnp.all(jnp.isfinite(out)))
    max_err = float(jnp.max(jnp.abs(out - ref)))
    assert bool(jnp.allclose(out, ref, atol=2e-2, rtol=2e-2)), max_err
    print("KERNEL_OK")
</pallas_src>

<mosaic_0001>
module attributes {stable_mosaic.version = 11 : i64} {
  func.func @_resblock_kernel(%arg0: i32, %arg1: memref<1x4x9x9x64xbf16, #tpu.memory_space<vmem>>, %arg2: memref<3x3x64x128xbf16, #tpu.memory_space<vmem>>, %arg3: memref<1x128xf32, #tpu.memory_space<vmem>>, %arg4: memref<1x128xf32, #tpu.memory_space<vmem>>, %arg5: memref<3x3x128x128xbf16, #tpu.memory_space<vmem>>, %arg6: memref<1x128xf32, #tpu.memory_space<vmem>>, %arg7: memref<1x128xf32, #tpu.memory_space<vmem>>, %arg8: memref<64x128xbf16, #tpu.memory_space<vmem>>, %arg9: memref<1x128xf32, #tpu.memory_space<vmem>>, %arg10: memref<1x128xf32, #tpu.memory_space<vmem>>, %arg11: memref<1x8x8x128xbf16, #tpu.memory_space<vmem>>, %arg12: memref<10x10x128xbf16, #tpu.memory_space<vmem>>) attributes {dimension_semantics = [#tpu.dimension_semantics<parallel>], iteration_bounds = array<i64: 2>, scalar_prefetch = 0 : i64, scratch_operands = 1 : i64, tpu.core_type = #tpu.core_type<tc>, window_params = [{transform_indices = @transform_0, window_bounds = array<i64: 1, 4, 9, 9, 64>}, {pipeline_mode = #tpu.pipeline_mode<synchronous>, transform_indices = @transform_1, window_bounds = array<i64: 3, 3, 64, 128>}, {pipeline_mode = #tpu.pipeline_mode<synchronous>, transform_indices = @transform_2, window_bounds = array<i64: 1, 128>}, {pipeline_mode = #tpu.pipeline_mode<synchronous>, transform_indices = @transform_3, window_bounds = array<i64: 1, 128>}, {pipeline_mode = #tpu.pipeline_mode<synchronous>, transform_indices = @transform_4, window_bounds = array<i64: 3, 3, 128, 128>}, {pipeline_mode = #tpu.pipeline_mode<synchronous>, transform_indices = @transform_5, window_bounds = array<i64: 1, 128>}, {pipeline_mode = #tpu.pipeline_mode<synchronous>, transform_indices = @transform_6, window_bounds = array<i64: 1, 128>}, {pipeline_mode = #tpu.pipeline_mode<synchronous>, transform_indices = @transform_7, window_bounds = array<i64: 64, 128>}, {pipeline_mode = #tpu.pipeline_mode<synchronous>, transform_indices = @transform_8, window_bounds = array<i64: 1, 128>}, {pipeline_mode = #tpu.pipeline_mode<synchronous>, transform_indices = @transform_9, window_bounds = array<i64: 1, 128>}, {transform_indices = @transform_10, window_bounds = array<i64: 1, 8, 8, 128>}]} {
    %c0 = arith.constant 0 : index
    %c0_0 = arith.constant 0 : index
    %c0_1 = arith.constant 0 : index
    %c0_2 = arith.constant 0 : index
    %c0_3 = arith.constant 0 : index
    %0 = vector.load %arg1[%c0, %c0_0, %c0_1, %c0_2, %c0_3] : memref<1x4x9x9x64xbf16, #tpu.memory_space<vmem>>, vector<1x1x8x8x64xbf16>
    %1 = vector.shape_cast %0 : vector<1x1x8x8x64xbf16> to vector<8x8x64xbf16>
    %2 = vector.shape_cast %1 : vector<8x8x64xbf16> to vector<64x64xbf16>
    %c0_4 = arith.constant 0 : index
    %c0_5 = arith.constant 0 : index
    %c0_6 = arith.constant 0 : index
    %c0_7 = arith.constant 0 : index
    %3 = vector.load %arg2[%c0_4, %c0_5, %c0_6, %c0_7] : memref<3x3x64x128xbf16, #tpu.memory_space<vmem>>, vector<1x1x64x128xbf16>
    %4 = vector.shape_cast %3 : vector<1x1x64x128xbf16> to vector<64x128xbf16>
    %cst = arith.constant dense<0.000000e+00> : vector<64x128xf32>
    %5 = tpu.matmul %2, %4, %cst {dimension_numbers = #tpu.dot_dimension_numbers<[1], [0], [0], [1], [0, 0, 1, 1], [], []>} : vector<64x64xbf16>, vector<64x128xbf16>, vector<64x128xf32> -> vector<64x128xf32>
    %c0_8 = arith.constant 0 : index
    %c1 = arith.constant 1 : index
    %c0_9 = arith.constant 0 : index
    %c0_10 = arith.constant 0 : index
    %c0_11 = arith.constant 0 : index
    %6 = vector.load %arg1[%c0_8, %c1, %c0_9, %c0_10, %c0_11] : memref<1x4x9x9x64xbf16, #tpu.memory_space<vmem>>, vector<1x1x8x8x64xbf16>
    %7 = vector.shape_cast %6 : vector<1x1x8x8x64xbf16> to vector<8x8x64xbf16>
    %8 = vector.shape_cast %7 : vector<8x8x64xbf16> to vector<64x64xbf16>
    %c0_12 = arith.constant 0 : index
    %c1_13 = arith.constant 1 : index
    %c0_14 = arith.constant 0 : index
    %c0_15 = arith.constant 0 : index
    %9 = vector.load %arg2[%c0_12, %c1_13, %c0_14, %c0_15] : memref<3x3x64x128xbf16, #tpu.memory_space<vmem>>, vector<1x1x64x128xbf16>
    %10 = vector.shape_cast %9 : vector<1x1x64x128xbf16> to vector<64x128xbf16>
    %cst_16 = arith.constant dense<0.000000e+00> : vector<64x128xf32>
    %11 = tpu.matmul %8, %10, %cst_16 {dimension_numbers = #tpu.dot_dimension_numbers<[1], [0], [0], [1], [0, 0, 1, 1], [], []>} : vector<64x64xbf16>, vector<64x128xbf16>, vector<64x128xf32> -> vector<64x128xf32>
    %12 = arith.addf %5, %11 : vector<64x128xf32>
    %c0_17 = arith.constant 0 : index
    %c0_18 = arith.constant 0 : index
    %c0_19 = arith.constant 0 : index
    %c1_20 = arith.constant 1 : index
    %c0_21 = arith.constant 0 : index
    %13 = vector.load %arg1[%c0_17, %c0_18, %c0_19, %c1_20, %c0_21] : memref<1x4x9x9x64xbf16, #tpu.memory_space<vmem>>, vector<1x1x8x8x64xbf16>
    %14 = vector.shape_cast %13 : vector<1x1x8x8x64xbf16> to vector<8x8x64xbf16>
    %15 = vector.shape_cast %14 : vector<8x8x64xbf16> to vector<64x64xbf16>
    %c0_22 = arith.constant 0 : index
    %c2 = arith.constant 2 : index
    %c0_23 = arith.constant 0 : index
    %c0_24 = arith.constant 0 : index
    %16 = vector.load %arg2[%c0_22, %c2, %c0_23, %c0_24] : memref<3x3x64x128xbf16, #tpu.memory_space<vmem>>, vector<1x1x64x128xbf16>
    %17 = vector.shape_cast %16 : vector<1x1x64x128xbf16> to vector<64x128xbf16>
    %cst_25 = arith.constant dense<0.000000e+00> : vector<64x128xf32>
    %18 = tpu.matmul %15, %17, %cst_25 {dimension_numbers = #tpu.dot_dimension_numbers<[1], [0], [0], [1], [0, 0, 1, 1], [], []>} : vector<64x64xbf16>, vector<64x128xbf16>, vector<64x128xf32> -> vector<64x128xf32>
    %19 = arith.addf %12, %18 : vector<64x128xf32>
    %c0_26 = arith.constant 0 : index
    %c2_27 = arith.constant 2 : index
    %c0_28 = arith.constant 0 : index
    %c0_29 = arith.constant 0 : index
    %c0_30 = arith.constant 0 : index
    %20 = vector.load %arg1[%c0_26, %c2_27, %c0_28, %c0_29, %c0_30] : memref<1x4x9x9x64xbf16, #tpu.memory_space<vmem>>, vector<1x1x8x8x64xbf16>
    %21 = vector.shape_cast %20 : vector<1x1x8x8x64xbf16> to vector<8x8x64xbf16>
    %22 = vector.shape_cast %21 : vector<8x8x64xbf16> to vector<64x64xbf16>
    %c1_31 = arith.constant 1 : index
    %c0_32 = arith.constant 0 : index
    %c0_33 = arith.constant 0 : index
    %c0_34 = arith.constant 0 : index
    %23 = vector.load %arg2[%c1_31, %c0_32, %c0_33, %c0_34] : memref<3x3x64x128xbf16, #tpu.memory_space<vmem>>, vector<1x1x64x128xbf16>
    %24 = vector.shape_cast %23 : vector<1x1x64x128xbf16> to vector<64x128xbf16>
    %cst_35 = arith.constant dense<0.000000e+00> : vector<64x128xf32>
    %25 = tpu.matmul %22, %24, %cst_35 {dimension_numbers = #tpu.dot_dimension_numbers<[1], [0], [0], [1], [0, 0, 1, 1], [], []>} : vector<64x64xbf16>, vector<64x128xbf16>, vector<64x128xf32> -> vector<64x128xf32>
    %26 = arith.addf %19, %25 : vector<64x128xf32>
    %c0_36 = arith.constant 0 : index
    %c3 = arith.constant 3 : index
    %c0_37 = arith.constant 0 : index
    %c0_38 = arith.constant 0 : index
    %c0_39 = arith.constant 0 : index
    %27 = vector.load %arg1[%c0_36, %c3, %c0_37, %c0_38, %c0_39] : memref<1x4x9x9x64xbf16, #tpu.memory_space<vmem>>, vector<1x1x8x8x64xbf16>
    %28 = vector.shape_cast %27 : vector<1x1x8x8x64xbf16> to vector<8x8x64xbf16>
    %29 = vector.shape_cast %28 : vector<8x8x64xbf16> to vector<64x64xbf16>
    %c1_40 = arith.constant 1 : index
    %c1_41 = arith.constant 1 : index
    %c0_42 = arith.constant 0 : index
    %c0_43 = arith.constant 0 : index
    %30 = vector.load %arg2[%c1_40, %c1_41, %c0_42, %c0_43] : memref<3x3x64x128xbf16, #tpu.memory_space<vmem>>, vector<1x1x64x128xbf16>
    %31 = vector.shape_cast %30 : vector<1x1x64x128xbf16> to vector<64x128xbf16>
    %cst_44 = arith.constant dense<0.000000e+00> : vector<64x128xf32>
    %32 = tpu.matmul %29, %31, %cst_44 {dimension_numbers = #tpu.dot_dimension_numbers<[1], [0], [0], [1], [0, 0, 1, 1], [], []>} : vector<64x64xbf16>, vector<64x128xbf16>, vector<64x128xf32> -> vector<64x128xf32>
    %33 = arith.addf %26, %32 : vector<64x128xf32>
    %c0_45 = arith.constant 0 : index
    %c2_46 = arith.constant 2 : index
    %c0_47 = arith.constant 0 : index
    %c1_48 = arith.constant 1 : index
    %c0_49 = arith.constant 0 : index
    %34 = vector.load %arg1[%c0_45, %c2_46, %c0_47, %c1_48, %c0_49] : memref<1x4x9x9x64xbf16, #tpu.memory_space<vmem>>, vector<1x1x8x8x64xbf16>
    %35 = vector.shape_cast %34 : vector<1x1x8x8x64xbf16> to vector<8x8x64xbf16>
    %36 = vector.shape_cast %35 : vector<8x8x64xbf16> to vector<64x64xbf16>
    %c1_50 = arith.constant 1 : index
    %c2_51 = arith.constant 2 : index
    %c0_52 = arith.constant 0 : index
    %c0_53 = arith.constant 0 : index
    %37 = vector.load %arg2[%c1_50, %c2_51, %c0_52, %c0_53] : memref<3x3x64x128xbf16, #tpu.memory_space<vmem>>, vector<1x1x64x128xbf16>
    %38 = vector.shape_cast %37 : vector<1x1x64x128xbf16> to vector<64x128xbf16>
    %cst_54 = arith.constant dense<0.000000e+00> : vector<64x128xf32>
    %39 = tpu.matmul %36, %38, %cst_54 {dimension_numbers = #tpu.dot_dimension_numbers<[1], [0], [0], [1], [0, 0, 1, 1], [], []>} : vector<64x64xbf16>, vector<64x128xbf16>, vector<64x128xf32> -> vector<64x128xf32>
    %40 = arith.addf %33, %39 : vector<64x128xf32>
    %c0_55 = arith.constant 0 : index
    %c0_56 = arith.constant 0 : index
    %c1_57 = arith.constant 1 : index
    %c0_58 = arith.constant 0 : index
    %c0_59 = arith.constant 0 : index
    %41 = vector.load %arg1[%c0_55, %c0_56, %c1_57, %c0_58, %c0_59] : memref<1x4x9x9x64xbf16, #tpu.memory_space<vmem>>, vector<1x1x8x8x64xbf16>
    %42 = vector.shape_cast %41 : vector<1x1x8x8x64xbf16> to vector<8x8x64xbf16>
    %43 = vector.shape_cast %42 : vector<8x8x64xbf16> to vector<64x64xbf16>
    %c2_60 = arith.constant 2 : index
    %c0_61 = arith.constant 0 : index
    %c0_62 = arith.constant 0 : index
    %c0_63 = arith.constant 0 : index
    %44 = vector.load %arg2[%c2_60, %c0_61, %c0_62, %c0_63] : memref<3x3x64x128xbf16, #tpu.memory_space<vmem>>, vector<1x1x64x128xbf16>
    %45 = vector.shape_cast %44 : vector<1x1x64x128xbf16> to vector<64x128xbf16>
    %cst_64 = arith.constant dense<0.000000e+00> : vector<64x128xf32>
    %46 = tpu.matmul %43, %45, %cst_64 {dimension_numbers = #tpu.dot_dimension_numbers<[1], [0], [0], [1], [0, 0, 1, 1], [], []>} : vector<64x64xbf16>, vector<64x128xbf16>, vector<64x128xf32> -> vector<64x128xf32>
    %47 = arith.addf %40, %46 : vector<64x128xf32>
    %c0_65 = arith.constant 0 : index
    %c1_66 = arith.constant 1 : index
    %c1_67 = arith.constant 1 : index
    %c0_68 = arith.constant 0 : index
    %c0_69 = arith.constant 0 : index
    %48 = vector.load %arg1[%c0_65, %c1_66, %c1_67, %c0_68, %c0_69] : memref<1x4x9x9x64xbf16, #tpu.memory_space<vmem>>, vector<1x1x8x8x64xbf16>
    %49 = vector.shape_cast %48 : vector<1x1x8x8x64xbf16> to vector<8x8x64xbf16>
    %50 = vector.shape_cast %49 : vector<8x8x64xbf16> to vector<64x64xbf16>
    %c2_70 = arith.constant 2 : index
    %c1_71 = arith.constant 1 : index
    %c0_72 = arith.constant 0 : index
    %c0_73 = arith.constant 0 : index
    %51 = vector.load %arg2[%c2_70, %c1_71, %c0_72, %c0_73] : memref<3x3x64x128xbf16, #tpu.memory_space<vmem>>, vector<1x1x64x128xbf16>
    %52 = vector.shape_cast %51 : vector<1x1x64x128xbf16> to vector<64x128xbf16>
    %cst_74 = arith.constant dense<0.000000e+00> : vector<64x128xf32>
    %53 = tpu.matmul %50, %52, %cst_74 {dimension_numbers = #tpu.dot_dimension_numbers<[1], [0], [0], [1], [0, 0, 1, 1], [], []>} : vector<64x64xbf16>, vector<64x128xbf16>, vector<64x128xf32> -> vector<64x128xf32>
    %54 = arith.addf %47, %53 : vector<64x128xf32>
    %c0_75 = arith.constant 0 : index
    %c0_76 = arith.constant 0 : index
    %c1_77 = arith.constant 1 : index
    %c1_78 = arith.constant 1 : index
    %c0_79 = arith.constant 0 : index
    %55 = vector.load %arg1[%c0_75, %c0_76, %c1_77, %c1_78, %c0_79] : memref<1x4x9x9x64xbf16, #tpu.memory_space<vmem>>, vector<1x1x8x8x64xbf16>
    %56 = vector.shape_cast %55 : vector<1x1x8x8x64xbf16> to vector<8x8x64xbf16>
    %57 = vector.shape_cast %56 : vector<8x8x64xbf16> to vector<64x64xbf16>
    %c2_80 = arith.constant 2 : index
    %c2_81 = arith.constant 2 : index
    %c0_82 = arith.constant 0 : index
    %c0_83 = arith.constant 0 : index
    %58 = vector.load %arg2[%c2_80, %c2_81, %c0_82, %c0_83] : memref<3x3x64x128xbf16, #tpu.memory_space<vmem>>, vector<1x1x64x128xbf16>
    %59 = vector.shape_cast %58 : vector<1x1x64x128xbf16> to vector<64x128xbf16>
    %cst_84 = arith.constant dense<0.000000e+00> : vector<64x128xf32>
    %60 = tpu.matmul %57, %59, %cst_84 {dimension_numbers = #tpu.dot_dimension_numbers<[1], [0], [0], [1], [0, 0, 1, 1], [], []>} : vector<64x64xbf16>, vector<64x128xbf16>, vector<64x128xf32> -> vector<64x128xf32>
    %61 = arith.addf %54, %60 : vector<64x128xf32>
    %c0_85 = arith.constant 0 : index
    %c0_86 = arith.constant 0 : index
    %62 = vector.load %arg3[%c0_85, %c0_86] : memref<1x128xf32, #tpu.memory_space<vmem>>, vector<1x128xf32>
    %63 = vector.broadcast %62 : vector<1x128xf32> to vector<64x128xf32>
    %64 = arith.mulf %61, %63 : vector<64x128xf32>
    %c0_87 = arith.constant 0 : index
    %c0_88 = arith.constant 0 : index
    %65 = vector.load %arg4[%c0_87, %c0_88] : memref<1x128xf32, #tpu.memory_space<vmem>>, vector<1x128xf32>
    %66 = vector.broadcast %65 : vector<1x128xf32> to vector<64x128xf32>
    %67 = arith.addf %64, %66 : vector<64x128xf32>
    %cst_89 = arith.constant 0.000000e+00 : f32
    %68 = vector.broadcast %cst_89 : f32 to vector<64x128xf32>
    %69 = arith.maximumf %67, %68 : vector<64x128xf32>
    %70 = arith.truncf %69 : vector<64x128xf32> to vector<64x128xbf16>
    %cst_90 = arith.constant 0.000000e+00 : bf16
    %71 = vector.broadcast %cst_90 : bf16 to vector<10x10x128xbf16>
    %c0_91 = arith.constant 0 : index
    %c0_92 = arith.constant 0 : index
    %c0_93 = arith.constant 0 : index
    %72 = vector.load %arg12[%c0_91, %c0_92, %c0_93] : memref<10x10x128xbf16, #tpu.memory_space<vmem>>, vector<10x10x128xbf16>
    tpu.vector_store %arg12[%c0_91, %c0_92, %c0_93], %71 {strides = array<i32>} : memref<10x10x128xbf16, #tpu.memory_space<vmem>>, vector<10x10x128xbf16>,
    %73 = vector.shape_cast %70 : vector<64x128xbf16> to vector<8x8x128xbf16>
    %c1_94 = arith.constant 1 : index
    %c1_95 = arith.constant 1 : index
    %c0_96 = arith.constant 0 : index
    %74 = vector.load %arg12[%c1_94, %c1_95, %c0_96] : memref<10x10x128xbf16, #tpu.memory_space<vmem>>, vector<8x8x128xbf16>
    tpu.vector_store %arg12[%c1_94, %c1_95, %c0_96], %73 {strides = array<i32>} : memref<10x10x128xbf16, #tpu.memory_space<vmem>>, vector<8x8x128xbf16>,
    %c0_97 = arith.constant 0 : index
    %c3_98 = arith.constant 3 : index
    %c0_99 = arith.constant 0 : index
    %c0_100 = arith.constant 0 : index
    %c0_101 = arith.constant 0 : index
    %75 = vector.load %arg1[%c0_97, %c3_98, %c0_99, %c0_100, %c0_101] : memref<1x4x9x9x64xbf16, #tpu.memory_space<vmem>>, vector<1x1x8x8x64xbf16>
    %76 = vector.shape_cast %75 : vector<1x1x8x8x64xbf16> to vector<8x8x64xbf16>
    %77 = vector.shape_cast %76 : vector<8x8x64xbf16> to vector<64x64xbf16>
    %c0_102 = arith.constant 0 : index
    %c0_103 = arith.constant 0 : index
    %78 = vector.load %arg8[%c0_102, %c0_103] : memref<64x128xbf16, #tpu.memory_space<vmem>>, vector<64x128xbf16>
    %cst_104 = arith.constant dense<0.000000e+00> : vector<64x128xf32>
    %79 = tpu.matmul %77, %78, %cst_104 {dimension_numbers = #tpu.dot_dimension_numbers<[1], [0], [0], [1], [0, 0, 1, 1], [], []>} : vector<64x64xbf16>, vector<64x128xbf16>, vector<64x128xf32> -> vector<64x128xf32>
    %c0_105 = arith.constant 0 : index
    %c0_106 = arith.constant 0 : index
    %80 = vector.load %arg9[%c0_105, %c0_106] : memref<1x128xf32, #tpu.memory_space<vmem>>, vector<1x128xf32>
    %81 = vector.broadcast %80 : vector<1x128xf32> to vector<64x128xf32>
    %82 = arith.mulf %79, %81 : vector<64x128xf32>
    %c0_107 = arith.constant 0 : index
    %c0_108 = arith.constant 0 : index
    %83 = vector.load %arg10[%c0_107, %c0_108] : memref<1x128xf32, #tpu.memory_space<vmem>>, vector<1x128xf32>
    %84 = vector.broadcast %83 : vector<1x128xf32> to vector<64x128xf32>
    %85 = arith.addf %82, %84 : vector<64x128xf32>
    %c0_109 = arith.constant 0 : index
    %c0_110 = arith.constant 0 : index
    %c0_111 = arith.constant 0 : index
    %86 = vector.load %arg12[%c0_109, %c0_110, %c0_111] : memref<10x10x128xbf16, #tpu.memory_space<vmem>>, vector<8x8x128xbf16>
    %87 = vector.shape_cast %86 : vector<8x8x128xbf16> to vector<64x128xbf16>
    %c0_112 = arith.constant 0 : index
    %c0_113 = arith.constant 0 : index
    %c0_114 = arith.constant 0 : index
    %c0_115 = arith.constant 0 : index
    %88 = vector.load %arg5[%c0_112, %c0_113, %c0_114, %c0_115] : memref<3x3x128x128xbf16, #tpu.memory_space<vmem>>, vector<1x1x128x128xbf16>
    %89 = vector.shape_cast %88 : vector<1x1x128x128xbf16> to vector<128x128xbf16>
    %cst_116 = arith.constant dense<0.000000e+00> : vector<64x128xf32>
    %90 = tpu.matmul %87, %89, %cst_116 {dimension_numbers = #tpu.dot_dimension_numbers<[1], [0], [0], [1], [0, 0, 1, 1], [], []>} : vector<64x128xbf16>, vector<128x128xbf16>, vector<64x128xf32> -> vector<64x128xf32>
    %c0_117 = arith.constant 0 : index
    %c1_118 = arith.constant 1 : index
    %c0_119 = arith.constant 0 : index
    %91 = vector.load %arg12[%c0_117, %c1_118, %c0_119] : memref<10x10x128xbf16, #tpu.memory_space<vmem>>, vector<8x8x128xbf16>
    %92 = vector.shape_cast %91 : vector<8x8x128xbf16> to vector<64x128xbf16>
    %c0_120 = arith.constant 0 : index
    %c1_121 = arith.constant 1 : index
    %c0_122 = arith.constant 0 : index
    %c0_123 = arith.constant 0 : index
    %93 = vector.load %arg5[%c0_120, %c1_121, %c0_122, %c0_123] : memref<3x3x128x128xbf16, #tpu.memory_space<vmem>>, vector<1x1x128x128xbf16>
    %94 = vector.shape_cast %93 : vector<1x1x128x128xbf16> to vector<128x128xbf16>
    %cst_124 = arith.constant dense<0.000000e+00> : vector<64x128xf32>
    %95 = tpu.matmul %92, %94, %cst_124 {dimension_numbers = #tpu.dot_dimension_numbers<[1], [0], [0], [1], [0, 0, 1, 1], [], []>} : vector<64x128xbf16>, vector<128x128xbf16>, vector<64x128xf32> -> vector<64x128xf32>
    %96 = arith.addf %90, %95 : vector<64x128xf32>
    %c0_125 = arith.constant 0 : index
    %c2_126 = arith.constant 2 : index
    %c0_127 = arith.constant 0 : index
    %97 = vector.load %arg12[%c0_125, %c2_126, %c0_127] : memref<10x10x128xbf16, #tpu.memory_space<vmem>>, vector<8x8x128xbf16>
    %98 = vector.shape_cast %97 : vector<8x8x128xbf16> to vector<64x128xbf16>
    %c0_128 = arith.constant 0 : index
    %c2_129 = arith.constant 2 : index
    %c0_130 = arith.constant 0 : index
    %c0_131 = arith.constant 0 : index
    %99 = vector.load %arg5[%c0_128, %c2_129, %c0_130, %c0_131] : memref<3x3x128x128xbf16, #tpu.memory_space<vmem>>, vector<1x1x128x128xbf16>
    %100 = vector.shape_cast %99 : vector<1x1x128x128xbf16> to vector<128x128xbf16>
    %cst_132 = arith.constant dense<0.000000e+00> : vector<64x128xf32>
    %101 = tpu.matmul %98, %100, %cst_132 {dimension_numbers = #tpu.dot_dimension_numbers<[1], [0], [0], [1], [0, 0, 1, 1], [], []>} : vector<64x128xbf16>, vector<128x128xbf16>, vector<64x128xf32> -> vector<64x128xf32>
    %102 = arith.addf %96, %101 : vector<64x128xf32>
    %c1_133 = arith.constant 1 : index
    %c0_134 = arith.constant 0 : index
    %c0_135 = arith.constant 0 : index
    %103 = vector.load %arg12[%c1_133, %c0_134, %c0_135] : memref<10x10x128xbf16, #tpu.memory_space<vmem>>, vector<8x8x128xbf16>
    %104 = vector.shape_cast %103 : vector<8x8x128xbf16> to vector<64x128xbf16>
    %c1_136 = arith.constant 1 : index
    %c0_137 = arith.constant 0 : index
    %c0_138 = arith.constant 0 : index
    %c0_139 = arith.constant 0 : index
    %105 = vector.load %arg5[%c1_136, %c0_137, %c0_138, %c0_139] : memref<3x3x128x128xbf16, #tpu.memory_space<vmem>>, vector<1x1x128x128xbf16>
    %106 = vector.shape_cast %105 : vector<1x1x128x128xbf16> to vector<128x128xbf16>
    %cst_140 = arith.constant dense<0.000000e+00> : vector<64x128xf32>
    %107 = tpu.matmul %104, %106, %cst_140 {dimension_numbers = #tpu.dot_dimension_numbers<[1], [0], [0], [1], [0, 0, 1, 1], [], []>} : vector<64x128xbf16>, vector<128x128xbf16>, vector<64x128xf32> -> vector<64x128xf32>
    %108 = arith.addf %102, %107 : vector<64x128xf32>
    %c1_141 = arith.constant 1 : index
    %c1_142 = arith.constant 1 : index
    %c0_143 = arith.constant 0 : index
    %109 = vector.load %arg12[%c1_141, %c1_142, %c0_143] : memref<10x10x128xbf16, #tpu.memory_space<vmem>>, vector<8x8x128xbf16>
    %110 = vector.shape_cast %109 : vector<8x8x128xbf16> to vector<64x128xbf16>
    %c1_144 = arith.constant 1 : index
    %c1_145 = arith.constant 1 : index
    %c0_146 = arith.constant 0 : index
    %c0_147 = arith.constant 0 : index
    %111 = vector.load %arg5[%c1_144, %c1_145, %c0_146, %c0_147] : memref<3x3x128x128xbf16, #tpu.memory_space<vmem>>, vector<1x1x128x128xbf16>
    %112 = vector.shape_cast %111 : vector<1x1x128x128xbf16> to vector<128x128xbf16>
    %cst_148 = arith.constant dense<0.000000e+00> : vector<64x128xf32>
    %113 = tpu.matmul %110, %112, %cst_148 {dimension_numbers = #tpu.dot_dimension_numbers<[1], [0], [0], [1], [0, 0, 1, 1], [], []>} : vector<64x128xbf16>, vector<128x128xbf16>, vector<64x128xf32> -> vector<64x128xf32>
    %114 = arith.addf %108, %113 : vector<64x128xf32>
    %c1_149 = arith.constant 1 : index
    %c2_150 = arith.constant 2 : index
    %c0_151 = arith.constant 0 : index
    %115 = vector.load %arg12[%c1_149, %c2_150, %c0_151] : memref<10x10x128xbf16, #tpu.memory_space<vmem>>, vector<8x8x128xbf16>
    %116 = vector.shape_cast %115 : vector<8x8x128xbf16> to vector<64x128xbf16>
    %c1_152 = arith.constant 1 : index
    %c2_153 = arith.constant 2 : index
    %c0_154 = arith.constant 0 : index
    %c0_155 = arith.constant 0 : index
    %117 = vector.load %arg5[%c1_152, %c2_153, %c0_154, %c0_155] : memref<3x3x128x128xbf16, #tpu.memory_space<vmem>>, vector<1x1x128x128xbf16>
    %118 = vector.shape_cast %117 : vector<1x1x128x128xbf16> to vector<128x128xbf16>
    %cst_156 = arith.constant dense<0.000000e+00> : vector<64x128xf32>
    %119 = tpu.matmul %116, %118, %cst_156 {dimension_numbers = #tpu.dot_dimension_numbers<[1], [0], [0], [1], [0, 0, 1, 1], [], []>} : vector<64x128xbf16>, vector<128x128xbf16>, vector<64x128xf32> -> vector<64x128xf32>
    %120 = arith.addf %114, %119 : vector<64x128xf32>
    %c2_157 = arith.constant 2 : index
    %c0_158 = arith.constant 0 : index
    %c0_159 = arith.constant 0 : index
    %121 = vector.load %arg12[%c2_157, %c0_158, %c0_159] : memref<10x10x128xbf16, #tpu.memory_space<vmem>>, vector<8x8x128xbf16>
    %122 = vector.shape_cast %121 : vector<8x8x128xbf16> to vector<64x128xbf16>
    %c2_160 = arith.constant 2 : index
    %c0_161 = arith.constant 0 : index
    %c0_162 = arith.constant 0 : index
    %c0_163 = arith.constant 0 : index
    %123 = vector.load %arg5[%c2_160, %c0_161, %c0_162, %c0_163] : memref<3x3x128x128xbf16, #tpu.memory_space<vmem>>, vector<1x1x128x128xbf16>
    %124 = vector.shape_cast %123 : vector<1x1x128x128xbf16> to vector<128x128xbf16>
    %cst_164 = arith.constant dense<0.000000e+00> : vector<64x128xf32>
    %125 = tpu.matmul %122, %124, %cst_164 {dimension_numbers = #tpu.dot_dimension_numbers<[1], [0], [0], [1], [0, 0, 1, 1], [], []>} : vector<64x128xbf16>, vector<128x128xbf16>, vector<64x128xf32> -> vector<64x128xf32>
    %126 = arith.addf %120, %125 : vector<64x128xf32>
    %c2_165 = arith.constant 2 : index
    %c1_166 = arith.constant 1 : index
    %c0_167 = arith.constant 0 : index
    %127 = vector.load %arg12[%c2_165, %c1_166, %c0_167] : memref<10x10x128xbf16, #tpu.memory_space<vmem>>, vector<8x8x128xbf16>
    %128 = vector.shape_cast %127 : vector<8x8x128xbf16> to vector<64x128xbf16>
    %c2_168 = arith.constant 2 : index
    %c1_169 = arith.constant 1 : index
    %c0_170 = arith.constant 0 : index
    %c0_171 = arith.constant 0 : index
    %129 = vector.load %arg5[%c2_168, %c1_169, %c0_170, %c0_171] : memref<3x3x128x128xbf16, #tpu.memory_space<vmem>>, vector<1x1x128x128xbf16>
    %130 = vector.shape_cast %129 : vector<1x1x128x128xbf16> to vector<128x128xbf16>
    %cst_172 = arith.constant dense<0.000000e+00> : vector<64x128xf32>
    %131 = tpu.matmul %128, %130, %cst_172 {dimension_numbers = #tpu.dot_dimension_numbers<[1], [0], [0], [1], [0, 0, 1, 1], [], []>} : vector<64x128xbf16>, vector<128x128xbf16>, vector<64x128xf32> -> vector<64x128xf32>
    %132 = arith.addf %126, %131 : vector<64x128xf32>
    %c2_173 = arith.constant 2 : index
    %c2_174 = arith.constant 2 : index
    %c0_175 = arith.constant 0 : index
    %133 = vector.load %arg12[%c2_173, %c2_174, %c0_175] : memref<10x10x128xbf16, #tpu.memory_space<vmem>>, vector<8x8x128xbf16>
    %134 = vector.shape_cast %133 : vector<8x8x128xbf16> to vector<64x128xbf16>
    %c2_176 = arith.constant 2 : index
    %c2_177 = arith.constant 2 : index
    %c0_178 = arith.constant 0 : index
    %c0_179 = arith.constant 0 : index
    %135 = vector.load %arg5[%c2_176, %c2_177, %c0_178, %c0_179] : memref<3x3x128x128xbf16, #tpu.memory_space<vmem>>, vector<1x1x128x128xbf16>
    %136 = vector.shape_cast %135 : vector<1x1x128x128xbf16> to vector<128x128xbf16>
    %cst_180 = arith.constant dense<0.000000e+00> : vector<64x128xf32>
    %137 = tpu.matmul %134, %136, %cst_180 {dimension_numbers = #tpu.dot_dimension_numbers<[1], [0], [0], [1], [0, 0, 1, 1], [], []>} : vector<64x128xbf16>, vector<128x128xbf16>, vector<64x128xf32> -> vector<64x128xf32>
    %138 = arith.addf %132, %137 : vector<64x128xf32>
    %c0_181 = arith.constant 0 : index
    %c0_182 = arith.constant 0 : index
    %139 = vector.load %arg6[%c0_181, %c0_182] : memref<1x128xf32, #tpu.memory_space<vmem>>, vector<1x128xf32>
    %140 = vector.broadcast %139 : vector<1x128xf32> to vector<64x128xf32>
    %141 = arith.mulf %138, %140 : vector<64x128xf32>
    %c0_183 = arith.constant 0 : index
    %c0_184 = arith.constant 0 : index
    %142 = vector.load %arg7[%c0_183, %c0_184] : memref<1x128xf32, #tpu.memory_space<vmem>>, vector<1x128xf32>
    %143 = vector.broadcast %142 : vector<1x128xf32> to vector<64x128xf32>
    %144 = arith.addf %141, %143 : vector<64x128xf32>
    %145 = arith.addf %144, %85 : vector<64x128xf32>
    %cst_185 = arith.constant 0.000000e+00 : f32
    %146 = vector.broadcast %cst_185 : f32 to vector<64x128xf32>
    %147 = arith.maximumf %145, %146 : vector<64x128xf32>
    %148 = vector.shape_cast %147 : vector<64x128xf32> to vector<8x8x128xf32>
    %149 = arith.truncf %148 : vector<8x8x128xf32> to vector<8x8x128xbf16>
    %c0_186 = arith.constant 0 : index
    %c0_187 = arith.constant 0 : index
    %c0_188 = arith.constant 0 : index
    %c0_189 = arith.constant 0 : index
    %150 = vector.load %arg11[%c0_186, %c0_187, %c0_188, %c0_189] : memref<1x8x8x128xbf16, #tpu.memory_space<vmem>>, vector<1x8x8x128xbf16>
    %151 = vector.shape_cast %150 : vector<1x8x8x128xbf16> to vector<8x8x128xbf16>
    %152 = vector.shape_cast %149 : vector<8x8x128xbf16> to vector<1x8x8x128xbf16>
    tpu.vector_store %arg11[%c0_186, %c0_187, %c0_188, %c0_189], %152 {strides = array<i32>} : memref<1x8x8x128xbf16, #tpu.memory_space<vmem>>, vector<1x8x8x128xbf16>,
    return
  }
  func.func @transform_0(%arg0: i32) -> (i32, i32, i32, i32, i32) {
    %c0_i32 = arith.constant 0 : i32
    %c0_i32_0 = arith.constant 0 : i32
    %c0_i32_1 = arith.constant 0 : i32
    %c0_i32_2 = arith.constant 0 : i32
    %c0_i32_3 = arith.constant 0 : i32
    return %arg0, %c0_i32, %c0_i32_0, %c0_i32_1, %c0_i32_2 : i32, i32, i32, i32, i32
  }
  func.func @transform_1(%arg0: i32) -> (i32, i32, i32, i32) {
    %c0_i32 = arith.constant 0 : i32
    %c0_i32_0 = arith.constant 0 : i32
    %c0_i32_1 = arith.constant 0 : i32
    %c0_i32_2 = arith.constant 0 : i32
    %c0_i32_3 = arith.constant 0 : i32
    return %c0_i32, %c0_i32_0, %c0_i32_1, %c0_i32_2 : i32, i32, i32, i32
  }
  func.func @transform_2(%arg0: i32) -> (i32, i32) {
    %c0_i32 = arith.constant 0 : i32
    %c0_i32_0 = arith.constant 0 : i32
    %c0_i32_1 = arith.constant 0 : i32
    return %c0_i32, %c0_i32_0 : i32, i32
  }
  func.func @transform_3(%arg0: i32) -> (i32, i32) {
    %c0_i32 = arith.constant 0 : i32
    %c0_i32_0 = arith.constant 0 : i32
    %c0_i32_1 = arith.constant 0 : i32
    return %c0_i32, %c0_i32_0 : i32, i32
  }
  func.func @transform_4(%arg0: i32) -> (i32, i32, i32, i32) {
    %c0_i32 = arith.constant 0 : i32
    %c0_i32_0 = arith.constant 0 : i32
    %c0_i32_1 = arith.constant 0 : i32
    %c0_i32_2 = arith.constant 0 : i32
    %c0_i32_3 = arith.constant 0 : i32
    return %c0_i32, %c0_i32_0, %c0_i32_1, %c0_i32_2 : i32, i32, i32, i32
  }
  func.func @transform_5(%arg0: i32) -> (i32, i32) {
    %c0_i32 = arith.constant 0 : i32
    %c0_i32_0 = arith.constant 0 : i32
    %c0_i32_1 = arith.constant 0 : i32
    return %c0_i32, %c0_i32_0 : i32, i32
  }
  func.func @transform_6(%arg0: i32) -> (i32, i32) {
    %c0_i32 = arith.constant 0 : i32
    %c0_i32_0 = arith.constant 0 : i32
    %c0_i32_1 = arith.constant 0 : i32
    return %c0_i32, %c0_i32_0 : i32, i32
  }
  func.func @transform_7(%arg0: i32) -> (i32, i32) {
    %c0_i32 = arith.constant 0 : i32
    %c0_i32_0 = arith.constant 0 : i32
    %c0_i32_1 = arith.constant 0 : i32
    return %c0_i32, %c0_i32_0 : i32, i32
  }
  func.func @transform_8(%arg0: i32) -> (i32, i32) {
    %c0_i32 = arith.constant 0 : i32
    %c0_i32_0 = arith.constant 0 : i32
    %c0_i32_1 = arith.constant 0 : i32
    return %c0_i32, %c0_i32_0 : i32, i32
  }
  func.func @transform_9(%arg0: i32) -> (i32, i32) {
    %c0_i32 = arith.constant 0 : i32
    %c0_i32_0 = arith.constant 0 : i32
    %c0_i32_1 = arith.constant 0 : i32
    return %c0_i32, %c0_i32_0 : i32, i32
  }
  func.func @transform_10(%arg0: i32) -> (i32, i32, i32, i32) {
    %c0_i32 = arith.constant 0 : i32
    %c0_i32_0 = arith.constant 0 : i32
    %c0_i32_1 = arith.constant 0 : i32
    %c0_i32_2 = arith.constant 0 : i32
    return %arg0, %c0_i32, %c0_i32_0, %c0_i32_1 : i32, i32, i32, i32
  }
}

module attributes {stable_mosaic.version = 11 : i64} {
  func.func @_resblock_kernel(%arg0: i32, %arg1: memref<1x8x8x128xbf16, #tpu.memory_space<vmem>>, %arg2: memref<3x3x128x128xbf16, #tpu.memory_space<vmem>>, %arg3: memref<1x128xf32, #tpu.memory_space<vmem>>, %arg4: memref<1x128xf32, #tpu.memory_space<vmem>>, %arg5: memref<3x3x128x128xbf16, #tpu.memory_space<vmem>>, %arg6: memref<1x128xf32, #tpu.memory_space<vmem>>, %arg7: memref<1x128xf32, #tpu.memory_space<vmem>>, %arg8: memref<1x8x8x128xbf16, #tpu.memory_space<vmem>>, %arg9: memref<10x10x128xbf16, #tpu.memory_space<vmem>>, %arg10: memref<10x10x128xbf16, #tpu.memory_space<vmem>>) attributes {dimension_semantics = [#tpu.dimension_semantics<parallel>], iteration_bounds = array<i64: 2>, scalar_prefetch = 0 : i64, scratch_operands = 2 : i64, tpu.core_type = #tpu.core_type<tc>, window_params = [{transform_indices = @transform_0, window_bounds = array<i64: 1, 8, 8, 128>}, {pipeline_mode = #tpu.pipeline_mode<synchronous>, transform_indices = @transform_1, window_bounds = array<i64: 3, 3, 128, 128>}, {pipeline_mode = #tpu.pipeline_mode<synchronous>, transform_indices = @transform_2, window_bounds = array<i64: 1, 128>}, {pipeline_mode = #tpu.pipeline_mode<synchronous>, transform_indices = @transform_3, window_bounds = array<i64: 1, 128>}, {pipeline_mode = #tpu.pipeline_mode<synchronous>, transform_indices = @transform_4, window_bounds = array<i64: 3, 3, 128, 128>}, {pipeline_mode = #tpu.pipeline_mode<synchronous>, transform_indices = @transform_5, window_bounds = array<i64: 1, 128>}, {pipeline_mode = #tpu.pipeline_mode<synchronous>, transform_indices = @transform_6, window_bounds = array<i64: 1, 128>}, {transform_indices = @transform_7, window_bounds = array<i64: 1, 8, 8, 128>}]} {
    %cst = arith.constant 0.000000e+00 : bf16
    %0 = vector.broadcast %cst : bf16 to vector<10x10x128xbf16>
    %c0 = arith.constant 0 : index
    %c0_0 = arith.constant 0 : index
    %c0_1 = arith.constant 0 : index
    %1 = vector.load %arg10[%c0, %c0_0, %c0_1] : memref<10x10x128xbf16, #tpu.memory_space<vmem>>, vector<10x10x128xbf16>
    tpu.vector_store %arg10[%c0, %c0_0, %c0_1], %0 {strides = array<i32>} : memref<10x10x128xbf16, #tpu.memory_space<vmem>>, vector<10x10x128xbf16>,
    %c0_2 = arith.constant 0 : index
    %c0_3 = arith.constant 0 : index
    %c0_4 = arith.constant 0 : index
    %c0_5 = arith.constant 0 : index
    %2 = vector.load %arg1[%c0_2, %c0_3, %c0_4, %c0_5] : memref<1x8x8x128xbf16, #tpu.memory_space<vmem>>, vector<1x8x8x128xbf16>
    %3 = vector.shape_cast %2 : vector<1x8x8x128xbf16> to vector<8x8x128xbf16>
    %c1 = arith.constant 1 : index
    %c1_6 = arith.constant 1 : index
    %c0_7 = arith.constant 0 : index
    %4 = vector.load %arg10[%c1, %c1_6, %c0_7] : memref<10x10x128xbf16, #tpu.memory_space<vmem>>, vector<8x8x128xbf16>
    tpu.vector_store %arg10[%c1, %c1_6, %c0_7], %3 {strides = array<i32>} : memref<10x10x128xbf16, #tpu.memory_space<vmem>>, vector<8x8x128xbf16>,
    %c0_8 = arith.constant 0 : index
    %c0_9 = arith.constant 0 : index
    %c0_10 = arith.constant 0 : index
    %5 = vector.load %arg10[%c0_8, %c0_9, %c0_10] : memref<10x10x128xbf16, #tpu.memory_space<vmem>>, vector<8x8x128xbf16>
    %6 = vector.shape_cast %5 : vector<8x8x128xbf16> to vector<64x128xbf16>
    %c0_11 = arith.constant 0 : index
    %c0_12 = arith.constant 0 : index
    %c0_13 = arith.constant 0 : index
    %c0_14 = arith.constant 0 : index
    %7 = vector.load %arg2[%c0_11, %c0_12, %c0_13, %c0_14] : memref<3x3x128x128xbf16, #tpu.memory_space<vmem>>, vector<1x1x128x128xbf16>
    %8 = vector.shape_cast %7 : vector<1x1x128x128xbf16> to vector<128x128xbf16>
    %cst_15 = arith.constant dense<0.000000e+00> : vector<64x128xf32>
    %9 = tpu.matmul %6, %8, %cst_15 {dimension_numbers = #tpu.dot_dimension_numbers<[1], [0], [0], [1], [0, 0, 1, 1], [], []>} : vector<64x128xbf16>, vector<128x128xbf16>, vector<64x128xf32> -> vector<64x128xf32>
    %c0_16 = arith.constant 0 : index
    %c1_17 = arith.constant 1 : index
    %c0_18 = arith.constant 0 : index
    %10 = vector.load %arg10[%c0_16, %c1_17, %c0_18] : memref<10x10x128xbf16, #tpu.memory_space<vmem>>, vector<8x8x128xbf16>
    %11 = vector.shape_cast %10 : vector<8x8x128xbf16> to vector<64x128xbf16>
    %c0_19 = arith.constant 0 : index
    %c1_20 = arith.constant 1 : index
    %c0_21 = arith.constant 0 : index
    %c0_22 = arith.constant 0 : index
    %12 = vector.load %arg2[%c0_19, %c1_20, %c0_21, %c0_22] : memref<3x3x128x128xbf16, #tpu.memory_space<vmem>>, vector<1x1x128x128xbf16>
    %13 = vector.shape_cast %12 : vector<1x1x128x128xbf16> to vector<128x128xbf16>
    %cst_23 = arith.constant dense<0.000000e+00> : vector<64x128xf32>
    %14 = tpu.matmul %11, %13, %cst_23 {dimension_numbers = #tpu.dot_dimension_numbers<[1], [0], [0], [1], [0, 0, 1, 1], [], []>} : vector<64x128xbf16>, vector<128x128xbf16>, vector<64x128xf32> -> vector<64x128xf32>
    %15 = arith.addf %9, %14 : vector<64x128xf32>
    %c0_24 = arith.constant 0 : index
    %c2 = arith.constant 2 : index
    %c0_25 = arith.constant 0 : index
    %16 = vector.load %arg10[%c0_24, %c2, %c0_25] : memref<10x10x128xbf16, #tpu.memory_space<vmem>>, vector<8x8x128xbf16>
    %17 = vector.shape_cast %16 : vector<8x8x128xbf16> to vector<64x128xbf16>
    %c0_26 = arith.constant 0 : index
    %c2_27 = arith.constant 2 : index
    %c0_28 = arith.constant 0 : index
    %c0_29 = arith.constant 0 : index
    %18 = vector.load %arg2[%c0_26, %c2_27, %c0_28, %c0_29] : memref<3x3x128x128xbf16, #tpu.memory_space<vmem>>, vector<1x1x128x128xbf16>
    %19 = vector.shape_cast %18 : vector<1x1x128x128xbf16> to vector<128x128xbf16>
    %cst_30 = arith.constant dense<0.000000e+00> : vector<64x128xf32>
    %20 = tpu.matmul %17, %19, %cst_30 {dimension_numbers = #tpu.dot_dimension_numbers<[1], [0], [0], [1], [0, 0, 1, 1], [], []>} : vector<64x128xbf16>, vector<128x128xbf16>, vector<64x128xf32> -> vector<64x128xf32>
    %21 = arith.addf %15, %20 : vector<64x128xf32>
    %c1_31 = arith.constant 1 : index
    %c0_32 = arith.constant 0 : index
    %c0_33 = arith.constant 0 : index
    %22 = vector.load %arg10[%c1_31, %c0_32, %c0_33] : memref<10x10x128xbf16, #tpu.memory_space<vmem>>, vector<8x8x128xbf16>
    %23 = vector.shape_cast %22 : vector<8x8x128xbf16> to vector<64x128xbf16>
    %c1_34 = arith.constant 1 : index
    %c0_35 = arith.constant 0 : index
    %c0_36 = arith.constant 0 : index
    %c0_37 = arith.constant 0 : index
    %24 = vector.load %arg2[%c1_34, %c0_35, %c0_36, %c0_37] : memref<3x3x128x128xbf16, #tpu.memory_space<vmem>>, vector<1x1x128x128xbf16>
    %25 = vector.shape_cast %24 : vector<1x1x128x128xbf16> to vector<128x128xbf16>
    %cst_38 = arith.constant dense<0.000000e+00> : vector<64x128xf32>
    %26 = tpu.matmul %23, %25, %cst_38 {dimension_numbers = #tpu.dot_dimension_numbers<[1], [0], [0], [1], [0, 0, 1, 1], [], []>} : vector<64x128xbf16>, vector<128x128xbf16>, vector<64x128xf32> -> vector<64x128xf32>
    %27 = arith.addf %21, %26 : vector<64x128xf32>
    %c1_39 = arith.constant 1 : index
    %c1_40 = arith.constant 1 : index
    %c0_41 = arith.constant 0 : index
    %28 = vector.load %arg10[%c1_39, %c1_40, %c0_41] : memref<10x10x128xbf16, #tpu.memory_space<vmem>>, vector<8x8x128xbf16>
    %29 = vector.shape_cast %28 : vector<8x8x128xbf16> to vector<64x128xbf16>
    %c1_42 = arith.constant 1 : index
    %c1_43 = arith.constant 1 : index
    %c0_44 = arith.constant 0 : index
    %c0_45 = arith.constant 0 : index
    %30 = vector.load %arg2[%c1_42, %c1_43, %c0_44, %c0_45] : memref<3x3x128x128xbf16, #tpu.memory_space<vmem>>, vector<1x1x128x128xbf16>
    %31 = vector.shape_cast %30 : vector<1x1x128x128xbf16> to vector<128x128xbf16>
    %cst_46 = arith.constant dense<0.000000e+00> : vector<64x128xf32>
    %32 = tpu.matmul %29, %31, %cst_46 {dimension_numbers = #tpu.dot_dimension_numbers<[1], [0], [0], [1], [0, 0, 1, 1], [], []>} : vector<64x128xbf16>, vector<128x128xbf16>, vector<64x128xf32> -> vector<64x128xf32>
    %33 = arith.addf %27, %32 : vector<64x128xf32>
    %c1_47 = arith.constant 1 : index
    %c2_48 = arith.constant 2 : index
    %c0_49 = arith.constant 0 : index
    %34 = vector.load %arg10[%c1_47, %c2_48, %c0_49] : memref<10x10x128xbf16, #tpu.memory_space<vmem>>, vector<8x8x128xbf16>
    %35 = vector.shape_cast %34 : vector<8x8x128xbf16> to vector<64x128xbf16>
    %c1_50 = arith.constant 1 : index
    %c2_51 = arith.constant 2 : index
    %c0_52 = arith.constant 0 : index
    %c0_53 = arith.constant 0 : index
    %36 = vector.load %arg2[%c1_50, %c2_51, %c0_52, %c0_53] : memref<3x3x128x128xbf16, #tpu.memory_space<vmem>>, vector<1x1x128x128xbf16>
    %37 = vector.shape_cast %36 : vector<1x1x128x128xbf16> to vector<128x128xbf16>
    %cst_54 = arith.constant dense<0.000000e+00> : vector<64x128xf32>
    %38 = tpu.matmul %35, %37, %cst_54 {dimension_numbers = #tpu.dot_dimension_numbers<[1], [0], [0], [1], [0, 0, 1, 1], [], []>} : vector<64x128xbf16>, vector<128x128xbf16>, vector<64x128xf32> -> vector<64x128xf32>
    %39 = arith.addf %33, %38 : vector<64x128xf32>
    %c2_55 = arith.constant 2 : index
    %c0_56 = arith.constant 0 : index
    %c0_57 = arith.constant 0 : index
    %40 = vector.load %arg10[%c2_55, %c0_56, %c0_57] : memref<10x10x128xbf16, #tpu.memory_space<vmem>>, vector<8x8x128xbf16>
    %41 = vector.shape_cast %40 : vector<8x8x128xbf16> to vector<64x128xbf16>
    %c2_58 = arith.constant 2 : index
    %c0_59 = arith.constant 0 : index
    %c0_60 = arith.constant 0 : index
    %c0_61 = arith.constant 0 : index
    %42 = vector.load %arg2[%c2_58, %c0_59, %c0_60, %c0_61] : memref<3x3x128x128xbf16, #tpu.memory_space<vmem>>, vector<1x1x128x128xbf16>
    %43 = vector.shape_cast %42 : vector<1x1x128x128xbf16> to vector<128x128xbf16>
    %cst_62 = arith.constant dense<0.000000e+00> : vector<64x128xf32>
    %44 = tpu.matmul %41, %43, %cst_62 {dimension_numbers = #tpu.dot_dimension_numbers<[1], [0], [0], [1], [0, 0, 1, 1], [], []>} : vector<64x128xbf16>, vector<128x128xbf16>, vector<64x128xf32> -> vector<64x128xf32>
    %45 = arith.addf %39, %44 : vector<64x128xf32>
    %c2_63 = arith.constant 2 : index
    %c1_64 = arith.constant 1 : index
    %c0_65 = arith.constant 0 : index
    %46 = vector.load %arg10[%c2_63, %c1_64, %c0_65] : memref<10x10x128xbf16, #tpu.memory_space<vmem>>, vector<8x8x128xbf16>
    %47 = vector.shape_cast %46 : vector<8x8x128xbf16> to vector<64x128xbf16>
    %c2_66 = arith.constant 2 : index
    %c1_67 = arith.constant 1 : index
    %c0_68 = arith.constant 0 : index
    %c0_69 = arith.constant 0 : index
    %48 = vector.load %arg2[%c2_66, %c1_67, %c0_68, %c0_69] : memref<3x3x128x128xbf16, #tpu.memory_space<vmem>>, vector<1x1x128x128xbf16>
    %49 = vector.shape_cast %48 : vector<1x1x128x128xbf16> to vector<128x128xbf16>
    %cst_70 = arith.constant dense<0.000000e+00> : vector<64x128xf32>
    %50 = tpu.matmul %47, %49, %cst_70 {dimension_numbers = #tpu.dot_dimension_numbers<[1], [0], [0], [1], [0, 0, 1, 1], [], []>} : vector<64x128xbf16>, vector<128x128xbf16>, vector<64x128xf32> -> vector<64x128xf32>
    %51 = arith.addf %45, %50 : vector<64x128xf32>
    %c2_71 = arith.constant 2 : index
    %c2_72 = arith.constant 2 : index
    %c0_73 = arith.constant 0 : index
    %52 = vector.load %arg10[%c2_71, %c2_72, %c0_73] : memref<10x10x128xbf16, #tpu.memory_space<vmem>>, vector<8x8x128xbf16>
    %53 = vector.shape_cast %52 : vector<8x8x128xbf16> to vector<64x128xbf16>
    %c2_74 = arith.constant 2 : index
    %c2_75 = arith.constant 2 : index
    %c0_76 = arith.constant 0 : index
    %c0_77 = arith.constant 0 : index
    %54 = vector.load %arg2[%c2_74, %c2_75, %c0_76, %c0_77] : memref<3x3x128x128xbf16, #tpu.memory_space<vmem>>, vector<1x1x128x128xbf16>
    %55 = vector.shape_cast %54 : vector<1x1x128x128xbf16> to vector<128x128xbf16>
    %cst_78 = arith.constant dense<0.000000e+00> : vector<64x128xf32>
    %56 = tpu.matmul %53, %55, %cst_78 {dimension_numbers = #tpu.dot_dimension_numbers<[1], [0], [0], [1], [0, 0, 1, 1], [], []>} : vector<64x128xbf16>, vector<128x128xbf16>, vector<64x128xf32> -> vector<64x128xf32>
    %57 = arith.addf %51, %56 : vector<64x128xf32>
    %c0_79 = arith.constant 0 : index
    %c0_80 = arith.constant 0 : index
    %58 = vector.load %arg3[%c0_79, %c0_80] : memref<1x128xf32, #tpu.memory_space<vmem>>, vector<1x128xf32>
    %59 = vector.broadcast %58 : vector<1x128xf32> to vector<64x128xf32>
    %60 = arith.mulf %57, %59 : vector<64x128xf32>
    %c0_81 = arith.constant 0 : index
    %c0_82 = arith.constant 0 : index
    %61 = vector.load %arg4[%c0_81, %c0_82] : memref<1x128xf32, #tpu.memory_space<vmem>>, vector<1x128xf32>
    %62 = vector.broadcast %61 : vector<1x128xf32> to vector<64x128xf32>
    %63 = arith.addf %60, %62 : vector<64x128xf32>
    %cst_83 = arith.constant 0.000000e+00 : f32
    %64 = vector.broadcast %cst_83 : f32 to vector<64x128xf32>
    %65 = arith.maximumf %63, %64 : vector<64x128xf32>
    %66 = arith.truncf %65 : vector<64x128xf32> to vector<64x128xbf16>
    %cst_84 = arith.constant 0.000000e+00 : bf16
    %67 = vector.broadcast %cst_84 : bf16 to vector<10x10x128xbf16>
    %c0_85 = arith.constant 0 : index
    %c0_86 = arith.constant 0 : index
    %c0_87 = arith.constant 0 : index
    %68 = vector.load %arg9[%c0_85, %c0_86, %c0_87] : memref<10x10x128xbf16, #tpu.memory_space<vmem>>, vector<10x10x128xbf16>
    tpu.vector_store %arg9[%c0_85, %c0_86, %c0_87], %67 {strides = array<i32>} : memref<10x10x128xbf16, #tpu.memory_space<vmem>>, vector<10x10x128xbf16>,
    %69 = vector.shape_cast %66 : vector<64x128xbf16> to vector<8x8x128xbf16>
    %c1_88 = arith.constant 1 : index
    %c1_89 = arith.constant 1 : index
    %c0_90 = arith.constant 0 : index
    %70 = vector.load %arg9[%c1_88, %c1_89, %c0_90] : memref<10x10x128xbf16, #tpu.memory_space<vmem>>, vector<8x8x128xbf16>
    tpu.vector_store %arg9[%c1_88, %c1_89, %c0_90], %69 {strides = array<i32>} : memref<10x10x128xbf16, #tpu.memory_space<vmem>>, vector<8x8x128xbf16>,
    %c0_91 = arith.constant 0 : index
    %c0_92 = arith.constant 0 : index
    %c0_93 = arith.constant 0 : index
    %c0_94 = arith.constant 0 : index
    %71 = vector.load %arg1[%c0_91, %c0_92, %c0_93, %c0_94] : memref<1x8x8x128xbf16, #tpu.memory_space<vmem>>, vector<1x8x8x128xbf16>
    %72 = vector.shape_cast %71 : vector<1x8x8x128xbf16> to vector<8x8x128xbf16>
    %73 = vector.shape_cast %72 : vector<8x8x128xbf16> to vector<64x128xbf16>
    %74 = arith.extf %73 : vector<64x128xbf16> to vector<64x128xf32>
    %c0_95 = arith.constant 0 : index
    %c0_96 = arith.constant 0 : index
    %c0_97 = arith.constant 0 : index
    %75 = vector.load %arg9[%c0_95, %c0_96, %c0_97] : memref<10x10x128xbf16, #tpu.memory_space<vmem>>, vector<8x8x128xbf16>
    %76 = vector.shape_cast %75 : vector<8x8x128xbf16> to vector<64x128xbf16>
    %c0_98 = arith.constant 0 : index
    %c0_99 = arith.constant 0 : index
    %c0_100 = arith.constant 0 : index
    %c0_101 = arith.constant 0 : index
    %77 = vector.load %arg5[%c0_98, %c0_99, %c0_100, %c0_101] : memref<3x3x128x128xbf16, #tpu.memory_space<vmem>>, vector<1x1x128x128xbf16>
    %78 = vector.shape_cast %77 : vector<1x1x128x128xbf16> to vector<128x128xbf16>
    %cst_102 = arith.constant dense<0.000000e+00> : vector<64x128xf32>
    %79 = tpu.matmul %76, %78, %cst_102 {dimension_numbers = #tpu.dot_dimension_numbers<[1], [0], [0], [1], [0, 0, 1, 1], [], []>} : vector<64x128xbf16>, vector<128x128xbf16>, vector<64x128xf32> -> vector<64x128xf32>
    %c0_103 = arith.constant 0 : index
    %c1_104 = arith.constant 1 : index
    %c0_105 = arith.constant 0 : index
    %80 = vector.load %arg9[%c0_103, %c1_104, %c0_105] : memref<10x10x128xbf16, #tpu.memory_space<vmem>>, vector<8x8x128xbf16>
    %81 = vector.shape_cast %80 : vector<8x8x128xbf16> to vector<64x128xbf16>
    %c0_106 = arith.constant 0 : index
    %c1_107 = arith.constant 1 : index
    %c0_108 = arith.constant 0 : index
    %c0_109 = arith.constant 0 : index
    %82 = vector.load %arg5[%c0_106, %c1_107, %c0_108, %c0_109] : memref<3x3x128x128xbf16, #tpu.memory_space<vmem>>, vector<1x1x128x128xbf16>
    %83 = vector.shape_cast %82 : vector<1x1x128x128xbf16> to vector<128x128xbf16>
    %cst_110 = arith.constant dense<0.000000e+00> : vector<64x128xf32>
    %84 = tpu.matmul %81, %83, %cst_110 {dimension_numbers = #tpu.dot_dimension_numbers<[1], [0], [0], [1], [0, 0, 1, 1], [], []>} : vector<64x128xbf16>, vector<128x128xbf16>, vector<64x128xf32> -> vector<64x128xf32>
    %85 = arith.addf %79, %84 : vector<64x128xf32>
    %c0_111 = arith.constant 0 : index
    %c2_112 = arith.constant 2 : index
    %c0_113 = arith.constant 0 : index
    %86 = vector.load %arg9[%c0_111, %c2_112, %c0_113] : memref<10x10x128xbf16, #tpu.memory_space<vmem>>, vector<8x8x128xbf16>
    %87 = vector.shape_cast %86 : vector<8x8x128xbf16> to vector<64x128xbf16>
    %c0_114 = arith.constant 0 : index
    %c2_115 = arith.constant 2 : index
    %c0_116 = arith.constant 0 : index
    %c0_117 = arith.constant 0 : index
    %88 = vector.load %arg5[%c0_114, %c2_115, %c0_116, %c0_117] : memref<3x3x128x128xbf16, #tpu.memory_space<vmem>>, vector<1x1x128x128xbf16>
    %89 = vector.shape_cast %88 : vector<1x1x128x128xbf16> to vector<128x128xbf16>
    %cst_118 = arith.constant dense<0.000000e+00> : vector<64x128xf32>
    %90 = tpu.matmul %87, %89, %cst_118 {dimension_numbers = #tpu.dot_dimension_numbers<[1], [0], [0], [1], [0, 0, 1, 1], [], []>} : vector<64x128xbf16>, vector<128x128xbf16>, vector<64x128xf32> -> vector<64x128xf32>
    %91 = arith.addf %85, %90 : vector<64x128xf32>
    %c1_119 = arith.constant 1 : index
    %c0_120 = arith.constant 0 : index
    %c0_121 = arith.constant 0 : index
    %92 = vector.load %arg9[%c1_119, %c0_120, %c0_121] : memref<10x10x128xbf16, #tpu.memory_space<vmem>>, vector<8x8x128xbf16>
    %93 = vector.shape_cast %92 : vector<8x8x128xbf16> to vector<64x128xbf16>
    %c1_122 = arith.constant 1 : index
    %c0_123 = arith.constant 0 : index
    %c0_124 = arith.constant 0 : index
    %c0_125 = arith.constant 0 : index
    %94 = vector.load %arg5[%c1_122, %c0_123, %c0_124, %c0_125] : memref<3x3x128x128xbf16, #tpu.memory_space<vmem>>, vector<1x1x128x128xbf16>
    %95 = vector.shape_cast %94 : vector<1x1x128x128xbf16> to vector<128x128xbf16>
    %cst_126 = arith.constant dense<0.000000e+00> : vector<64x128xf32>
    %96 = tpu.matmul %93, %95, %cst_126 {dimension_numbers = #tpu.dot_dimension_numbers<[1], [0], [0], [1], [0, 0, 1, 1], [], []>} : vector<64x128xbf16>, vector<128x128xbf16>, vector<64x128xf32> -> vector<64x128xf32>
    %97 = arith.addf %91, %96 : vector<64x128xf32>
    %c1_127 = arith.constant 1 : index
    %c1_128 = arith.constant 1 : index
    %c0_129 = arith.constant 0 : index
    %98 = vector.load %arg9[%c1_127, %c1_128, %c0_129] : memref<10x10x128xbf16, #tpu.memory_space<vmem>>, vector<8x8x128xbf16>
    %99 = vector.shape_cast %98 : vector<8x8x128xbf16> to vector<64x128xbf16>
    %c1_130 = arith.constant 1 : index
    %c1_131 = arith.constant 1 : index
    %c0_132 = arith.constant 0 : index
    %c0_133 = arith.constant 0 : index
    %100 = vector.load %arg5[%c1_130, %c1_131, %c0_132, %c0_133] : memref<3x3x128x128xbf16, #tpu.memory_space<vmem>>, vector<1x1x128x128xbf16>
    %101 = vector.shape_cast %100 : vector<1x1x128x128xbf16> to vector<128x128xbf16>
    %cst_134 = arith.constant dense<0.000000e+00> : vector<64x128xf32>
    %102 = tpu.matmul %99, %101, %cst_134 {dimension_numbers = #tpu.dot_dimension_numbers<[1], [0], [0], [1], [0, 0, 1, 1], [], []>} : vector<64x128xbf16>, vector<128x128xbf16>, vector<64x128xf32> -> vector<64x128xf32>
    %103 = arith.addf %97, %102 : vector<64x128xf32>
    %c1_135 = arith.constant 1 : index
    %c2_136 = arith.constant 2 : index
    %c0_137 = arith.constant 0 : index
    %104 = vector.load %arg9[%c1_135, %c2_136, %c0_137] : memref<10x10x128xbf16, #tpu.memory_space<vmem>>, vector<8x8x128xbf16>
    %105 = vector.shape_cast %104 : vector<8x8x128xbf16> to vector<64x128xbf16>
    %c1_138 = arith.constant 1 : index
    %c2_139 = arith.constant 2 : index
    %c0_140 = arith.constant 0 : index
    %c0_141 = arith.constant 0 : index
    %106 = vector.load %arg5[%c1_138, %c2_139, %c0_140, %c0_141] : memref<3x3x128x128xbf16, #tpu.memory_space<vmem>>, vector<1x1x128x128xbf16>
    %107 = vector.shape_cast %106 : vector<1x1x128x128xbf16> to vector<128x128xbf16>
    %cst_142 = arith.constant dense<0.000000e+00> : vector<64x128xf32>
    %108 = tpu.matmul %105, %107, %cst_142 {dimension_numbers = #tpu.dot_dimension_numbers<[1], [0], [0], [1], [0, 0, 1, 1], [], []>} : vector<64x128xbf16>, vector<128x128xbf16>, vector<64x128xf32> -> vector<64x128xf32>
    %109 = arith.addf %103, %108 : vector<64x128xf32>
    %c2_143 = arith.constant 2 : index
    %c0_144 = arith.constant 0 : index
    %c0_145 = arith.constant 0 : index
    %110 = vector.load %arg9[%c2_143, %c0_144, %c0_145] : memref<10x10x128xbf16, #tpu.memory_space<vmem>>, vector<8x8x128xbf16>
    %111 = vector.shape_cast %110 : vector<8x8x128xbf16> to vector<64x128xbf16>
    %c2_146 = arith.constant 2 : index
    %c0_147 = arith.constant 0 : index
    %c0_148 = arith.constant 0 : index
    %c0_149 = arith.constant 0 : index
    %112 = vector.load %arg5[%c2_146, %c0_147, %c0_148, %c0_149] : memref<3x3x128x128xbf16, #tpu.memory_space<vmem>>, vector<1x1x128x128xbf16>
    %113 = vector.shape_cast %112 : vector<1x1x128x128xbf16> to vector<128x128xbf16>
    %cst_150 = arith.constant dense<0.000000e+00> : vector<64x128xf32>
    %114 = tpu.matmul %111, %113, %cst_150 {dimension_numbers = #tpu.dot_dimension_numbers<[1], [0], [0], [1], [0, 0, 1, 1], [], []>} : vector<64x128xbf16>, vector<128x128xbf16>, vector<64x128xf32> -> vector<64x128xf32>
    %115 = arith.addf %109, %114 : vector<64x128xf32>
    %c2_151 = arith.constant 2 : index
    %c1_152 = arith.constant 1 : index
    %c0_153 = arith.constant 0 : index
    %116 = vector.load %arg9[%c2_151, %c1_152, %c0_153] : memref<10x10x128xbf16, #tpu.memory_space<vmem>>, vector<8x8x128xbf16>
    %117 = vector.shape_cast %116 : vector<8x8x128xbf16> to vector<64x128xbf16>
    %c2_154 = arith.constant 2 : index
    %c1_155 = arith.constant 1 : index
    %c0_156 = arith.constant 0 : index
    %c0_157 = arith.constant 0 : index
    %118 = vector.load %arg5[%c2_154, %c1_155, %c0_156, %c0_157] : memref<3x3x128x128xbf16, #tpu.memory_space<vmem>>, vector<1x1x128x128xbf16>
    %119 = vector.shape_cast %118 : vector<1x1x128x128xbf16> to vector<128x128xbf16>
    %cst_158 = arith.constant dense<0.000000e+00> : vector<64x128xf32>
    %120 = tpu.matmul %117, %119, %cst_158 {dimension_numbers = #tpu.dot_dimension_numbers<[1], [0], [0], [1], [0, 0, 1, 1], [], []>} : vector<64x128xbf16>, vector<128x128xbf16>, vector<64x128xf32> -> vector<64x128xf32>
    %121 = arith.addf %115, %120 : vector<64x128xf32>
    %c2_159 = arith.constant 2 : index
    %c2_160 = arith.constant 2 : index
    %c0_161 = arith.constant 0 : index
    %122 = vector.load %arg9[%c2_159, %c2_160, %c0_161] : memref<10x10x128xbf16, #tpu.memory_space<vmem>>, vector<8x8x128xbf16>
    %123 = vector.shape_cast %122 : vector<8x8x128xbf16> to vector<64x128xbf16>
    %c2_162 = arith.constant 2 : index
    %c2_163 = arith.constant 2 : index
    %c0_164 = arith.constant 0 : index
    %c0_165 = arith.constant 0 : index
    %124 = vector.load %arg5[%c2_162, %c2_163, %c0_164, %c0_165] : memref<3x3x128x128xbf16, #tpu.memory_space<vmem>>, vector<1x1x128x128xbf16>
    %125 = vector.shape_cast %124 : vector<1x1x128x128xbf16> to vector<128x128xbf16>
    %cst_166 = arith.constant dense<0.000000e+00> : vector<64x128xf32>
    %126 = tpu.matmul %123, %125, %cst_166 {dimension_numbers = #tpu.dot_dimension_numbers<[1], [0], [0], [1], [0, 0, 1, 1], [], []>} : vector<64x128xbf16>, vector<128x128xbf16>, vector<64x128xf32> -> vector<64x128xf32>
    %127 = arith.addf %121, %126 : vector<64x128xf32>
    %c0_167 = arith.constant 0 : index
    %c0_168 = arith.constant 0 : index
    %128 = vector.load %arg6[%c0_167, %c0_168] : memref<1x128xf32, #tpu.memory_space<vmem>>, vector<1x128xf32>
    %129 = vector.broadcast %128 : vector<1x128xf32> to vector<64x128xf32>
    %130 = arith.mulf %127, %129 : vector<64x128xf32>
    %c0_169 = arith.constant 0 : index
    %c0_170 = arith.constant 0 : index
    %131 = vector.load %arg7[%c0_169, %c0_170] : memref<1x128xf32, #tpu.memory_space<vmem>>, vector<1x128xf32>
    %132 = vector.broadcast %131 : vector<1x128xf32> to vector<64x128xf32>
    %133 = arith.addf %130, %132 : vector<64x128xf32>
    %134 = arith.addf %133, %74 : vector<64x128xf32>
    %cst_171 = arith.constant 0.000000e+00 : f32
    %135 = vector.broadcast %cst_171 : f32 to vector<64x128xf32>
    %136 = arith.maximumf %134, %135 : vector<64x128xf32>
    %137 = vector.shape_cast %136 : vector<64x128xf32> to vector<8x8x128xf32>
    %138 = arith.truncf %137 : vector<8x8x128xf32> to vector<8x8x128xbf16>
    %c0_172 = arith.constant 0 : index
    %c0_173 = arith.constant 0 : index
    %c0_174 = arith.constant 0 : index
    %c0_175 = arith.constant 0 : index
    %139 = vector.load %arg8[%c0_172, %c0_173, %c0_174, %c0_175] : memref<1x8x8x128xbf16, #tpu.memory_space<vmem>>, vector<1x8x8x128xbf16>
    %140 = vector.shape_cast %139 : vector<1x8x8x128xbf16> to vector<8x8x128xbf16>
    %141 = vector.shape_cast %138 : vector<8x8x128xbf16> to vector<1x8x8x128xbf16>
    tpu.vector_store %arg8[%c0_172, %c0_173, %c0_174, %c0_175], %141 {strides = array<i32>} : memref<1x8x8x128xbf16, #tpu.memory_space<vmem>>, vector<1x8x8x128xbf16>,
    return
  }
  func.func @transform_0(%arg0: i32) -> (i32, i32, i32, i32) {
    %c0_i32 = arith.constant 0 : i32
    %c0_i32_0 = arith.constant 0 : i32
    %c0_i32_1 = arith.constant 0 : i32
    %c0_i32_2 = arith.constant 0 : i32
    return %arg0, %c0_i32, %c0_i32_0, %c0_i32_1 : i32, i32, i32, i32
  }
  func.func @transform_1(%arg0: i32) -> (i32, i32, i32, i32) {
    %c0_i32 = arith.constant 0 : i32
    %c0_i32_0 = arith.constant 0 : i32
    %c0_i32_1 = arith.constant 0 : i32
    %c0_i32_2 = arith.constant 0 : i32
    %c0_i32_3 = arith.constant 0 : i32
    return %c0_i32, %c0_i32_0, %c0_i32_1, %c0_i32_2 : i32, i32, i32, i32
  }
  func.func @transform_2(%arg0: i32) -> (i32, i32) {
    %c0_i32 = arith.constant 0 : i32
    %c0_i32_0 = arith.constant 0 : i32
    %c0_i32_1 = arith.constant 0 : i32
    return %c0_i32, %c0_i32_0 : i32, i32
  }
  func.func @transform_3(%arg0: i32) -> (i32, i32) {
    %c0_i32 = arith.constant 0 : i32
    %c0_i32_0 = arith.constant 0 : i32
    %c0_i32_1 = arith.constant 0 : i32
    return %c0_i32, %c0_i32_0 : i32, i32
  }
  func.func @transform_4(%arg0: i32) -> (i32, i32, i32, i32) {
    %c0_i32 = arith.constant 0 : i32
    %c0_i32_0 = arith.constant 0 : i32
    %c0_i32_1 = arith.constant 0 : i32
    %c0_i32_2 = arith.constant 0 : i32
    %c0_i32_3 = arith.constant 0 : i32
    return %c0_i32, %c0_i32_0, %c0_i32_1, %c0_i32_2 : i32, i32, i32, i32
  }
  func.func @transform_5(%arg0: i32) -> (i32, i32) {
    %c0_i32 = arith.constant 0 : i32
    %c0_i32_0 = arith.constant 0 : i32
    %c0_i32_1 = arith.constant 0 : i32
    return %c0_i32, %c0_i32_0 : i32, i32
  }
  func.func @transform_6(%arg0: i32) -> (i32, i32) {
    %c0_i32 = arith.constant 0 : i32
    %c0_i32_0 = arith.constant 0 : i32
    %c0_i32_1 = arith.constant 0 : i32
    return %c0_i32, %c0_i32_0 : i32, i32
  }
  func.func @transform_7(%arg0: i32) -> (i32, i32, i32, i32) {
    %c0_i32 = arith.constant 0 : i32
    %c0_i32_0 = arith.constant 0 : i32
    %c0_i32_1 = arith.constant 0 : i32
    %c0_i32_2 = arith.constant 0 : i32
    return %arg0, %c0_i32, %c0_i32_0, %c0_i32_1 : i32, i32, i32, i32
  }
}

</mosaic_0001>

<bundles_post_ra>
// kernel: fwd.2
= control target key start
LH: loop header
LB: loop body
LE: loop exit
PB: predicated region body
PF: predicated region fallthrough
CT: control target
= control target key end

     0   :  { %s5967_s13 = smov 0   ;;  %s6934_s0 = inlined_call_operand.vmem [shape: bf16[2,4,9,9,64], index: 0, kind: input, shape index: {}]   ;;  %s6935_s1 = inlined_call_operand.vmem [shape: bf16[3,3,64,128], index: 1, kind: input, shape index: {}]   ;;  %s6936_s2 = inlined_call_operand.vmem [shape: f32[1,128], index: 2, kind: input, shape index: {}]   ;;  %s6937_s3 = inlined_call_operand.vmem [shape: f32[1,128], index: 3, kind: input, shape index: {}]   ;;  %s6938_s4 = inlined_call_operand.vmem [shape: bf16[3,3,128,128], index: 4, kind: input, shape index: {}]   ;;  %s6939_s5 = inlined_call_operand.vmem [shape: f32[1,128], index: 5, kind: input, shape index: {}]   ;;  %s6940_s6 = inlined_call_operand.vmem [shape: f32[1,128], index: 6, kind: input, shape index: {}]   ;;  %s6941_s7 = inlined_call_operand.vmem [shape: bf16[64,128], index: 7, kind: input, shape index: {}]   ;;  %s6942_s8 = inlined_call_operand.vmem [shape: f32[1,128], index: 8, kind: input, shape index: {}]   ;;  %s6943_s9 = inlined_call_operand.vmem [shape: f32[1,128], index: 9, kind: input, shape index: {}]   ;;  %s6944_s10 = inlined_call_operand.vmem [shape: bf16[2,8,8,128], index: 10, kind: output, shape index: {}]  }
   0x1 LB: > { %s4469_s14 = sadd.s32 4294967295, %s5909_s13   ;;  %p4473_p0 = scmp.ge.s32.totalorder %s5909_s13, 1  ;;  %s5909_s13 = sphi %s5967_s13, %s20_s13  }
   0x2   : > { %p312_p1 = scmp.lt.s32.totalorder %s5909_s13, 3 }
   0x4   : > { %p313_p2 = pnand %p4473_p0, %p312_p1 }
   0x5   : > { %v5751_v0 = vld [vmem:[%s6935_s1 + $0x20] sm:$0xff] (!%p313_p2)   ;;  %p350_p3 = scmp.lt.s32.totalorder (!%p313_p2), %s4469_s14, 1  ;;  %v5752_v1 = vld [vmem:[%s6935_s1 + $0x28] sm:$0xff] (!%p313_p2)   ;;  %v5753_v2 = vld [vmem:[%s6935_s1 + $0x30] sm:$0xff] (!%p313_p2)   ;;  %vm439_vm0 = vcmask (!%p313_p2), 523264   ;;  %vm2166_vm4 = vcmask (!%p313_p2), 1043456  }
   0x6   : > { %316 = sbr.rel (%p313_p2) target bundleno = 827 (0x33b), region = 60  ;;  %5237 = vmatprep.subr.bf16.mxu0 (!%p313_p2), %v5751_v0  ;;  %v5754_v4 = vld [vmem:[%s6935_s1 + $0x38] sm:$0xff] (!%p313_p2)   ;;  %v5757_v5 = vld [vmem:[%s6935_s1] sm:$0xff] (!%p313_p2)   ;;  %v5758_v8 = vld [vmem:[%s6935_s1 + $0x8] sm:$0xff] (!%p313_p2)   ;;  %vm654_vm1 = vsmask.f32 (!%p313_p2), 3328 }
   0x7   : > { %5238 = vmatpush3.bf16.msra.mxu0 (!%p313_p2), %v5751_v0  ;;  %v5761_v9 = vld [vmem:[%s6935_s1 + $0x10] sm:$0xff] (!%p313_p2)   ;;  %v5762_v22 = vld [vmem:[%s6935_s1 + $0x18] sm:$0xff] (!%p313_p2)   ;;  %vm655_vm2 = vsmask.f32 (!%p313_p2), 7440  ;;  %v5765_v38 = vld [vmem:[%s6935_s1 + $0x40] sm:$0xff] (!%p313_p2)   ;;  %vm2172_vm6 = vcmask (!%p313_p2), 1040384  }
   0x8   : > { %5239 = vmatprep.subr.bf16.mxu0 (!%p313_p2), %v5752_v1  ;;  %vm6034_vm3 = vmor (!%p313_p2), %vm654_vm1, %vm655_vm2  ;;  %v5766_v57 = vld [vmem:[%s6935_s1 + $0x48] sm:$0xff] (!%p313_p2)   ;;  %vm2167_vm5 = vsmask.f32 (!%p313_p2), 7938  ;;  %vm2173_vm7 = vsmask.f32 (!%p313_p2), 256  ;;  %vm2838_vm8 = vcmask (!%p313_p2), 1042432  }
   0x9   : > { %vm2839_vm9 = vcmask (!%p313_p2), 1046532   ;;  %vm6432_vm10 = vmand (!%p313_p2), %vm2166_vm4, %vm2167_vm5  ;;  %v5899_v52 = vld [vmem:[%s6938_s4 + $0x220] sm:$0xff] (!%p313_p2)  }
   0xa   : > { %vm6439_vm11 = vmand (!%p313_p2), %vm2172_vm6, %vm2173_vm7 }
   0xb   : > { %5240 = vmatpush3.bf16.msra.mxu0 (!%p313_p2), %v5752_v1  ;;  %vm6464_vm12 = vmor (!%p313_p2), %vm2838_vm8, %vm2839_vm9 }
   0xc   : > { %5241 = vmatprep.subr.bf16.mxu0 (!%p313_p2), %v5753_v2 }
   0xd   : > { %s6954_s14 = smov (!%p350_p3, %s4469_s14), 1 }
   0xe   : > { %s5741_s21 = smul.u32 288, %s6954_s14  ;;  %s5017_s27 = sshll.u32 %s6954_s14, 5 }
   0xf   : > { %5242 = vmatpush3.bf16.msra.mxu0 %v5753_v2  ;;  %s359_s14 = scalar_lea.vmem %s6944_s10, %s5017_s27 }
  0x10   : > { %s5990_s24 = scalar_lea.vmem %s6934_s0, %s5741_s21  ;;  %5243 = vmatprep.subr.bf16.mxu0 %v5754_v4 }
  0x11   : > { %v5755_v3 = vld [vmem:[%s5990_s24 + $0x48] ss:$8 sps:$4 sm:$0xff]   ;;  %v5756_v6 = vld [vmem:[%s5990_s24 + $0x58] ss:$8 sps:$4 sm:$0xff]   ;;  %v639_v14 = vld [vmem:[%s5990_s24 + $0x4] sm:$0x1] }
  0x12   : > { %5245 = vmatprep.mubr.msk.bf16.mxu0 %vm439_vm0, %v5755_v3  ;;  %v5759_v7 = vld [vmem:[%s5990_s24 + $0x68] ss:$8 sps:$4 sm:$0xff]   ;;  %v638_v10 = vld [vmem:[%s5990_s24] sm:$0xf]  ;;  %v641_v15 = vld [vmem:[%s5990_s24 + $0xc] sm:$0x1] }
  0x13   : > { %5244 = vmatpush3.bf16.msra.mxu0 %v5754_v4  ;;  %v640_v11 = vld [vmem:[%s5990_s24 + $0x8] sm:$0xf]  ;;  %v5760_v12 = vld [vmem:[%s5990_s24 + $0x78] ss:$8 sps:$4 sm:$0xff]   ;;  %v658_v16 = vshrl.u32 %v638_v10, 16  ;;  %v661_v17 = vshll.u32 %v638_v10, 16 }
  0x14   : > { %5253 = vmatprep.subr.bf16.mxu0 %v5757_v5  ;;  %v5763_v13 = vld [vmem:[%s5990_s24] ss:$8 sps:$4 sm:$0xff]   ;;  %v672_v18 = vshrl.u32 %v640_v11, 16  ;;  %v642_v19 = vld [vmem:[%s5990_s24 + $0x10] sm:$0xf]  ;;  %v675_v20 = vshll.u32 %v640_v11, 16 }
  0x15   : > { %v644_v21 = vld [vmem:[%s5990_s24 + $0x18] sm:$0xf]  ;;  %v660_v23 = vrot.slane %v658_v16, 4  ;;  %v663_v24 = vrot.slane %v661_v17, 5  ;;  %v643_v26 = vld [vmem:[%s5990_s24 + $0x14] sm:$0x1] }
  0x16   : > { %5246 = vmatmul.mubr.msk.bf16.vlgmr.msra.gmra.mrb[0].mxu0 %vm439_vm0, %v5756_v6  ;;  %v674_v25 = vrot.slane %v672_v18, 4  ;;  %v667_v27 = vshll.u32 %v639_v14, 16  ;;  %v677_v28 = vrot.slane %v675_v20, 5  ;;  %v686_v29 = vshrl.u32 %v642_v19, 16  ;;  %v645_v36 = vld [vmem:[%s5990_s24 + $0x1c] sm:$0x1] }
  0x17   : > { %5254 = vmatpush3.bf16.msra.mxu0 %v5757_v5  ;;  %5249 = vmatprep.mubr.msk.bf16.mxu0 %vm439_vm0, %v5759_v7  ;;  %v689_v30 = vshll.u32 %v642_v19, 16  ;;  %v664_v31 = vor.u32 %v663_v24, %v660_v23  ;;  %v700_v32 = vshrl.u32 %v644_v21, 16  ;;  %v703_v33 = vshll.u32 %v644_v21, 16  ;;  %v5764_v37 = vld [vmem:[%s5990_s24 + $0x10] ss:$8 sps:$4 sm:$0xff]  }
  0x18   : > { %5255 = vmatprep.subr.bf16.mxu0 %v5758_v8  ;;  %v678_v34 = vor.u32 %v677_v28, %v674_v25  ;;  %v681_v35 = vshll.u32 %v641_v15, 16  ;;  %v688_v39 = vrot.slane %v686_v29, 4  ;;  %v695_v41 = vshll.u32 %v643_v26, 16  ;;  %v5767_v42 = vld [vmem:[%s5990_s24 + $0x20] ss:$8 sps:$4 sm:$0xff]  }
  0x19   : > { %v691_v40 = vrot.slane %v689_v30, 5  ;;  %v669_v43 = vrot.slane %v667_v27, 5  ;;  %v702_v44 = vrot.slane %v700_v32, 4  ;;  %v705_v45 = vrot.slane %v703_v33, 5  ;;  %v646_v46 = vld [vmem:[%s5990_s24 + $0x20] sm:$0xf] }
  0x1a   : > { %v665_v47 = vrot.slane %v664_v31, 4  ;;  %v709_v48 = vshll.u32 %v645_v36, 16  ;;  %v648_v49 = vld [vmem:[%s5990_s24 + $0x28] sm:$0xf]  ;;  %v714_v50 = vshrl.u32 %v646_v46, 16  ;;  %v717_v51 = vshll.u32 %v646_v46, 16 }
  0x1b   : > { %5256 = vmatpush3.bf16.msra.mxu0 %v5758_v8  ;;  %v679_v53 = vrot.slane %v678_v34, 4  ;;  %v683_v54 = vrot.slane %v681_v35, 5  ;;  %v647_v55 = vld [vmem:[%s5990_s24 + $0x24] sm:$0x1]  ;;  %v728_v56 = vshrl.u32 %v648_v49, 16  ;;  %v692_v58 = vor.u32 %v691_v40, %v688_v39 }
  0x1c   : > { %5257 = vmatprep.subr.bf16.mxu0 %v5761_v9  ;;  %v697_v59 = vrot.slane %v695_v41, 5  ;;  %v716_v60 = vrot.slane %v714_v50, 4  ;;  %v719_v61 = vrot.slane %v717_v51, 5  ;;  %v650_v62 = vld [vmem:[%s5990_s24 + $0x30] sm:$0xf]  ;;  %v706_v63 = vor.u32 %v705_v45, %v702_v44  ;;  %v5771_v36 = vld [vmem:[%s6935_s1 + $0x60] sm:$0xff]  }
  0x1d   : > { %v649_v0 = vld [vmem:[%s5990_s24 + $0x2c] sm:$0x1]  ;;  %v730_v1 = vrot.slane %v728_v56, 4  ;;  %v731_v2 = vshll.u32 %v648_v49, 16  ;;  %v652_v3 = vld [vmem:[%s5990_s24 + $0x38] sm:$0xf]  ;;  %v670_v4 = vsel %vm6034_vm3, %v665_v47, %v669_v43  ;;  %v684_v8 = vsel %vm6034_vm3, %v679_v53, %v683_v54 }
  0x1e   : > { %5250 = vmatmul.mubr.msk.bf16.gmra.mrb[4].mxu0 %vm439_vm0, %v5760_v12  ;;  %v711_v5 = vrot.slane %v709_v48, 5  ;;  %v723_v6 = vshll.u32 %v647_v55, 16  ;;  %v651_v7 = vld [vmem:[%s5990_s24 + $0x34] sm:$0x1]  ;;  %v742_v10 = vshrl.u32 %v650_v62, 16  ;;  %v745_v11 = vshll.u32 %v650_v62, 16 }
  0x1f   : > { %5258 = vmatpush3.bf16.msra.mxu0 %v5761_v9  ;;  %5261 = vmatprep.mubr.msk.bf16.mxu0 %vm439_vm0, %v5763_v13  ;;  %v733_v9 = vrot.slane %v731_v2, 5  ;;  %v5768_v12 = vld [vmem:[%s5990_s24 + $0x30] ss:$8 sps:$4 sm:$0xff]   ;;  %v693_v14 = vrot.slane %v692_v58, 4  ;;  %v720_v15 = vor.u32 %v719_v61, %v716_v60  ;;  %v737_v16 = vshll.u32 %v649_v0, 16  ;;  %v5772_v47 = vld [vmem:[%s6935_s1 + $0x68] sm:$0xff]  }
  0x20   : > { %5259 = vmatprep.subr.bf16.mxu0 %v5762_v22  ;;  %v5769_v13 = vld [vmem:[%s6935_s1 + $0x50] sm:$0xff]   ;;  %v756_v17 = vshrl.u32 %v652_v3, 16  ;;  %v707_v18 = vrot.slane %v706_v63, 4  ;;  %v653_v20 = vld [vmem:[%s5990_s24 + $0x3c] sm:$0x1]  ;;  %v759_v21 = vshll.u32 %v652_v3, 16  ;;  %v4525_v23 = vcombine.low %v670_v4, %v684_v8 }
  0x21   : > { %v734_v19 = vor.u32 %v733_v9, %v730_v1  ;;  %v725_v24 = vrot.slane %v723_v6, 5  ;;  %v751_v25 = vshll.u32 %v651_v7, 16  ;;  %v744_v26 = vrot.slane %v742_v10, 4  ;;  %v5773_v50 = vld [vmem:[%s6935_s1 + $0x70] sm:$0xff]   ;;  %v4595_v55 = vld [vmem:[%s5990_s24 + $0x98] sm:$0xf] }
  0x22   : > { %v747_v27 = vrot.slane %v745_v11, 5  ;;  %v758_v28 = vrot.slane %v756_v17, 4  ;;  %v761_v29 = vrot.slane %v759_v21, 5  ;;  %v721_v30 = vrot.slane %v720_v15, 4  ;;  %v4593_v53 = vld [vmem:[%s5990_s24 + $0x90] sm:$0xf] }
  0x23   : > { %5260 = vmatpush3.bf16.msra.mxu0 %v5762_v22  ;;  %v5770_v22 = vld [vmem:[%s6935_s1 + $0x58] sm:$0xff]   ;;  %v735_v31 = vrot.slane %v734_v19, 4  ;;  %v739_v32 = vrot.slane %v737_v16, 5  ;;  %v765_v33 = vshll.u32 %v653_v20, 16  ;;  %v698_v34 = vsel %vm6034_vm3, %v693_v14, %v697_v59  ;;  %v4599_v62 = vld [vmem:[%s5990_s24 + $0xa8] sm:$0xf] }
  0x24   : > { %5269 = vmatprep.subr.bf16.mxu0 %v5765_v38  ;;  %v712_v35 = vsel %vm6034_vm3, %v707_v18, %v711_v5  ;;  %v726_v39 = vsel %vm6034_vm3, %v721_v30, %v725_v24  ;;  %v753_v41 = vrot.slane %v751_v25, 5  ;;  %v5775_v54 = vld [vmem:[%s5990_s24 + $0x90] ss:$8 sps:$4 sm:$0xff]   ;;  %v1210_v58 = vshrl.u32 %v4593_v53, 16  ;;  %v5776_v1 = vld [vmem:[%s5990_s24 + $0xa0] ss:$8 sps:$4 sm:$0xff]  }
  0x25   : > { %v740_v40 = vsel %vm6034_vm3, %v735_v31, %v739_v32  ;;  %v4526_v43 = vcombine.low %v698_v34, %v712_v35  ;;  %v5774_v56 = vld [vmem:[%s6935_s1 + $0x78] sm:$0xff]   ;;  %v1213_v59 = vshll.u32 %v4593_v53, 16  ;;  %v1224_v60 = vshrl.u32 %v4595_v55, 16  ;;  %v5777_v2 = vld [vmem:[%s6935_s1 + $0x80] sm:$0xff]   ;;  %v4594_v3 = vld [vmem:[%s5990_s24 + $0x94] sm:$0x1] }
  0x26   : > { %5262 = vmatmul.mubr.msk.bf16.vlgmr.msra.gmra.mrb[0].mxu0 %vm439_vm0, %v5764_v37  ;;  %v748_v37 = vor.u32 %v747_v27, %v744_v26  ;;  %v4527_v44 = vcombine.low %v726_v39, %v740_v40  ;;  %v1227_v61 = vshll.u32 %v4595_v55, 16  ;;  %v1252_v4 = vshrl.u32 %v4599_v62, 16  ;;  %v5779_v6 = vld [vmem:[%s5990_s24 + $0xb0] ss:$8 sps:$4 sm:$0xff]   ;;  %v4596_v11 = vld [vmem:[%s5990_s24 + $0x9c] sm:$0x1] }
  0x27   : > { %5270 = vmatpush3.bf16.msra.mxu0 %v5765_v38  ;;  %5265 = vmatprep.mubr.msk.bf16.mxu0 %vm439_vm0, %v5767_v42  ;;  %v762_v38 = vor.u32 %v761_v29, %v758_v28  ;;  %v767_v42 = vrot.slane %v765_v33, 5  ;;  %v1255_v5 = vshll.u32 %v4599_v62, 16  ;;  %v1212_v7 = vrot.slane %v1210_v58, 4  ;;  %v5778_v15 = vld [vmem:[%s6935_s1 + $0x88] sm:$0xff]   ;;  %v4601_v24 = vld [vmem:[%s5990_s24 + $0xb0] sm:$0xf] }
  0x28   : > { %5271 = vmatprep.subr.bf16.mxu0 %v5766_v57  ;;  %v749_v45 = vrot.slane %v748_v37, 4  ;;  %v1215_v8 = vrot.slane %v1213_v59, 5  ;;  %v1226_v9 = vrot.slane %v1224_v60, 4  ;;  %v1229_v10 = vrot.slane %v1227_v61, 5  ;;  %v4600_v17 = vld [vmem:[%s5990_s24 + $0xac] sm:$0x1] }
  0x29   : > { %v763_v46 = vrot.slane %v762_v38, 4  ;;  %v1219_v16 = vshll.u32 %v4594_v3, 16  ;;  %v1254_v18 = vrot.slane %v1252_v4, 4  ;;  %v1257_v19 = vrot.slane %v1255_v5, 5  ;;  %v4603_v25 = vld [vmem:[%s5990_s24 + $0xb8] sm:$0xf] }
  0x2a   : > { %v754_v48 = vsel %vm6034_vm3, %v749_v45, %v753_v41  ;;  %v1216_v20 = vor.u32 %v1215_v8, %v1212_v7  ;;  %v1230_v21 = vor.u32 %v1229_v10, %v1226_v9  ;;  %v1261_v27 = vshll.u32 %v4600_v17, 16  ;;  %v5780_v28 = vld [vmem:[%s5990_s24 + $0xc0] ss:$8 sps:$4 sm:$0xff]   ;;  %v5781_v29 = vld [vmem:[%s6935_s1 + $0x90] sm:$0xff]   ;;  %v5782_v37 = vld [vmem:[%s6935_s1 + $0x98] sm:$0xff]  }
  0x2b   : > { %5272 = vmatpush3.bf16.msra.mxu0 %v5766_v57  ;;  %v768_v49 = vsel %vm6034_vm3, %v763_v46, %v767_v42  ;;  %v4597_v57 = vld [vmem:[%s5990_s24 + $0xa0] sm:$0xf]  ;;  %v6115_v30 = vrot.slane %v1219_v16, 5  ;;  %v4602_v31 = vld [vmem:[%s5990_s24 + $0xb4] sm:$0x1]  ;;  %v1258_v33 = vor.u32 %v1257_v19, %v1254_v18  ;;  %v1266_v34 = vshrl.u32 %v4601_v24, 16 }
  0x2c   : > { %5273 = vmatprep.subr.bf16.mxu0 %v5769_v13  ;;  %v4528_v51 = vcombine.low %v754_v48, %v768_v49  ;;  %v1238_v63 = vshrl.u32 %v4597_v57, 16  ;;  %v1241_v0 = vshll.u32 %v4597_v57, 16  ;;  %v5783_v32 = vld [vmem:[%s5990_s24 + $0xd8] ss:$8 sps:$4 sm:$0xff]   ;;  %v1269_v35 = vshll.u32 %v4601_v24, 16  ;;  %v5789_v8 = vld [vmem:[%s6935_s1 + $0xb0] sm:$0xff]  }
  0x2d   : > { %v6122_v38 = vrot.slane %v1216_v20, 4  ;;  %v6124_v39 = vrot.slane %v1230_v21, 4  ;;  %v1275_v45 = vshll.u32 %v4602_v31, 16  ;;  %v1283_v46 = vshll.u32 %v4603_v25, 16  ;;  %v5785_v53 = vld [vmem:[%s6935_s1 + $0xa0] sm:$0xff]   ;;  %v5790_v21 = vld [vmem:[%s6935_s1 + $0xb8] sm:$0xff]  }
  0x2e   : > { %5266 = vmatmul.mubr.msk.bf16.gmra.mrb[4].mxu0 %vm439_vm0, %v5768_v12  ;;  %v4598_v12 = vld [vmem:[%s5990_s24 + $0xa4] sm:$0x1]  ;;  %v1243_v14 = vrot.slane %v1241_v0, 5  ;;  %v1259_v48 = vrot.slane %v1258_v33, 4  ;;  %v1268_v49 = vrot.slane %v1266_v34, 4 }
  0x2f   : > { %5274 = vmatpush3.bf16.msra.mxu0 %v5769_v13  ;;  %5277 = vmatprep.mubr.msk.bf16.mxu0 %vm439_vm0, %v4525_v23  ;;  %v1240_v13 = vrot.slane %v1238_v63, 4  ;;  %v1247_v23 = vshll.u32 %v4598_v12, 16  ;;  %v5784_v55 = vld [vmem:[%s5990_s24 + $0xe8] ss:$8 sps:$4 sm:$0xff]   ;;  %v4606_v58 = vld [vmem:[%s5990_s24 + $0xc4] sm:$0x1]  ;;  %v1222_v9 = vsel %vm6034_vm3, %v6122_v38, %v6115_v30 }
  0x30   : > { %5275 = vmatprep.subr.bf16.mxu0 %v5770_v22  ;;  %v4608_v59 = vld [vmem:[%s5990_s24 + $0xcc] sm:$0x1]  ;;  %v5787_v62 = vld [vmem:[%s5990_s24 + $0xf8] ss:$8 sps:$4 sm:$0xff]   ;;  %v1277_v17 = vrot.slane %v1275_v45, 5 }
  0x31   : > { %v1244_v26 = vor.u32 %v1243_v14, %v1240_v13  ;;  %v1249_v41 = vrot.slane %v1247_v23, 5  ;;  %v1317_v7 = vshll.u32 %v4608_v59, 16  ;;  %v5788_v14 = vld [vmem:[%s5990_s24 + $0x108] ss:$8 sps:$4 sm:$0xff]   ;;  %v4688_v30 = vld [vmem:[%s5990_s24 + $0x14] sm:$0x1] }
  0x32   : > { %v4685_v24 = vld [vmem:[%s5990_s24 + $0x8] sm:$0xf]  ;;  %v1785_v45 = vshll.u32 %v4688_v30, 16 }
  0x33   : > { %5276 = vmatpush3.bf16.msra.mxu0 %v5770_v22  ;;  %v1233_v22 = vshll.u32 %v4596_v11, 16  ;;  %v1245_v42 = vrot.slane %v1244_v26, 4  ;;  %v6163_v23 = vrot.slane %v1317_v7, 5  ;;  %v1765_v33 = vshll.u32 %v4685_v24, 16  ;;  %v4696_v7 = vld [vmem:[%s5990_s24 + $0x34] sm:$0x1] }
  0x34   : > { %5285 = vmatprep.subr.bf16.mxu0 %v5771_v36  ;;  %v1841_v30 = vshll.u32 %v4696_v7, 16  ;;  %v5804_v7 = vld [vmem:[%s5990_s24 + $0x60] ss:$8 sps:$4 sm:$0xff]  }
  0x35   : > { %v1235_v40 = vrot.slane %v1233_v22, 5  ;;  %v1250_v11 = vsel %vm6034_vm3, %v1245_v42, %v1249_v41  ;;  %v4691_v41 = vld [vmem:[%s5990_s24 + $0x20] sm:$0xf] }
  0x36   : > { %5278 = vmatmul.mubr.msk.bf16.vlgmr.msra.gmra.mrb[0].mxu0 %vm439_vm0, %v4526_v43  ;;  %v1263_v43 = vrot.slane %v1261_v27, 5 }
  0x37   : > { %5286 = vmatpush3.bf16.msra.mxu0 %v5771_v36  ;;  %5281 = vmatprep.mubr.msk.bf16.mxu0 %vm439_vm0, %v4527_v44  ;;  %v1280_v36 = vshrl.u32 %v4603_v25, 16  ;;  %v4604_v44 = vld [vmem:[%s5990_s24 + $0xbc] sm:$0x1]  ;;  %v1236_v10 = vsel %vm6034_vm3, %v6124_v39, %v1235_v40 }
  0x38   : > { %5287 = vmatprep.subr.bf16.mxu0 %v5772_v47  ;;  %v1289_v57 = vshll.u32 %v4604_v44, 16  ;;  %v4617_v25 = vcombine.low %v1222_v9, %v1236_v10  ;;  %v4690_v40 = vld [vmem:[%s5990_s24 + $0x1c] sm:$0x1] }
  0x3a   : > { %v1291_v20 = vrot.slane %v1289_v57, 5  ;;  %v4693_v57 = vld [vmem:[%s5990_s24 + $0x28] sm:$0xf] }
  0x3b   : > { %5288 = vmatpush3.bf16.msra.mxu0 %v5772_v47  ;;  %v4605_v47 = vld [vmem:[%s5990_s24 + $0xc0] sm:$0xf] }
  0x3c   : > { %5289 = vmatprep.subr.bf16.mxu0 %v5773_v50  ;;  %v1294_v60 = vshrl.u32 %v4605_v47, 16  ;;  %v1297_v61 = vshll.u32 %v4605_v47, 16 }
  0x3e   : > { %5282 = vmatmul.mubr.msk.bf16.gmra.mrb[4].mxu0 %vm439_vm0, %v4528_v51  ;;  %v1282_v51 = vrot.slane %v1280_v36, 4  ;;  %v1296_v3 = vrot.slane %v1294_v60, 4  ;;  %v1299_v4 = vrot.slane %v1297_v61, 5 }
  0x3f   : > { %5290 = vmatpush3.bf16.msra.mxu0 %v5773_v50  ;;  %5293 = vmatprep.mubr.msk.bf16.mxu0 %vm439_vm0, %v5775_v54  ;;  %v1271_v50 = vrot.slane %v1269_v35, 5  ;;  %v4607_v54 = vld [vmem:[%s5990_s24 + $0xc8] sm:$0xf]  ;;  %v4689_v35 = vld [vmem:[%s5990_s24 + $0x18] sm:$0xf] }
  0x40   : > { %5291 = vmatprep.subr.bf16.mxu0 %v5774_v56  ;;  %v1308_v63 = vshrl.u32 %v4607_v54, 16  ;;  %v1311_v0 = vshll.u32 %v4607_v54, 16  ;;  %v1300_v18 = vor.u32 %v1299_v4, %v1296_v3  ;;  %v1799_v54 = vshll.u32 %v4690_v40, 16  ;;  %v4695_v3 = vld [vmem:[%s5990_s24 + $0x30] sm:$0xf] }
  0x42   : > { %v1310_v12 = vrot.slane %v1308_v63, 4  ;;  %v1313_v13 = vrot.slane %v1311_v0, 5  ;;  %v6171_v31 = vrot.slane %v1300_v18, 4  ;;  %v6192_v63 = vrot.slane %v1785_v45, 5 }
  0x43   : > { %5292 = vmatpush3.bf16.msra.mxu0 %v5774_v56  ;;  %v1285_v56 = vrot.slane %v1283_v46, 5  ;;  %v1832_v18 = vshrl.u32 %v4695_v3, 16 }
  0x44   : > { %5301 = vmatprep.subr.bf16.mxu0 %v5777_v2  ;;  %v1314_v27 = vor.u32 %v1313_v13, %v1310_v12  ;;  %v1821_v12 = vshll.u32 %v4693_v57, 16  ;;  %v4697_v13 = vld [vmem:[%s5990_s24 + $0x38] sm:$0xf] }
  0x45   : > { %v1286_v5 = vor.u32 %v1285_v56, %v1282_v51  ;;  %v5791_v51 = vld [vmem:[%s6935_s1 + $0xc0] sm:$0xff]   ;;  %v1807_v56 = vshll.u32 %v4691_v41, 16 }
  0x46   : > { %5294 = vmatmul.mubr.msk.bf16.vlgmr.msra.gmra.mrb[0].mxu0 %vm439_vm0, %v5776_v1  ;;  %v5786_v1 = vld [vmem:[%s6935_s1 + $0xa8] sm:$0xff]   ;;  %v1315_v46 = vrot.slane %v1314_v27, 4 }
  0x47   : > { %5302 = vmatpush3.bf16.msra.mxu0 %v5777_v2  ;;  %5297 = vmatprep.mubr.msk.bf16.mxu0 %vm439_vm0, %v5779_v6  ;;  %v1272_v2 = vor.u32 %v1271_v50, %v1268_v49  ;;  %v1303_v6 = vshll.u32 %v4606_v58, 16  ;;  %v1287_v19 = vrot.slane %v1286_v5, 4  ;;  %v1790_v49 = vshrl.u32 %v4689_v35, 16 }
  0x48   : > { %5303 = vmatprep.subr.bf16.mxu0 %v5778_v15  ;;  %v1793_v50 = vshll.u32 %v4689_v35, 16  ;;  %v1320_v10 = vsel %vm6034_vm3, %v1315_v46, %v6163_v23 }
  0x49   : > { %v1273_v16 = vrot.slane %v1272_v2, 4  ;;  %v6161_v22 = vrot.slane %v1303_v6, 5  ;;  %v1792_v60 = vrot.slane %v1790_v49, 4  ;;  %v4694_v6 = vld [vmem:[%s5990_s24 + $0x2c] sm:$0x1] }
  0x4a   : > { %v1795_v61 = vrot.slane %v1793_v50, 5  ;;  %v1827_v27 = vshll.u32 %v4694_v6, 16  ;;  %v5805_v6 = vld [vmem:[%s6935_s1 + $0x100] sm:$0xff]  }
  0x4b   : > { %5304 = vmatpush3.bf16.msra.mxu0 %v5778_v15  ;;  %v1264_v15 = vsel %vm6034_vm3, %v1259_v48, %v1263_v43  ;;  %v1278_v36 = vsel %vm6034_vm3, %v1273_v16, %v1277_v17  ;;  %v1767_v43 = vrot.slane %v1765_v33, 5  ;;  %v4692_v48 = vld [vmem:[%s5990_s24 + $0x24] sm:$0x1]  ;;  %v1306_v9 = vsel %vm6034_vm3, %v6171_v31, %v6161_v22  ;;  %v5795_v33 = vld [vmem:[%s5990_s24 + $0x8] ss:$8 sps:$4 sm:$0xff]  }
  0x4c   : > { %5305 = vmatprep.subr.bf16.mxu0 %v5781_v29  ;;  %v6166_v26 = vcombine.low %v1250_v11, %v1264_v15  ;;  %v1813_v2 = vshll.u32 %v4692_v48, 16  ;;  %v6206_v11 = vrot.slane %v1799_v54, 5  ;;  %v1796_v16 = vor.u32 %v1795_v61, %v1792_v60  ;;  %v5797_v54 = vld [vmem:[%s6935_s1 + $0xe0] sm:$0xff]   ;;  %v5799_v60 = vld [vmem:[%s5990_s24 + $0x28] ss:$8 sps:$4 sm:$0xff]  }
  0x4d   : > { %v4620_v31 = vcombine.low %v1306_v9, %v1320_v10  ;;  %v5806_v9 = vld [vmem:[%s6935_s1 + $0x108] sm:$0xff]   ;;  %v5809_v10 = vld [vmem:[%s6935_s1 + $0x110] sm:$0xff]  }
  0x4e   : > { %5298 = vmatmul.mubr.msk.bf16.gmra.mrb[4].mxu0 %vm439_vm0, %v5780_v28  ;;  %v4686_v28 = vld [vmem:[%s5990_s24 + $0xc] sm:$0x1]  ;;  %v6221_v23 = vrot.slane %v1813_v2, 5  ;;  %v5800_v2 = vld [vmem:[%s5990_s24 + $0x38] ss:$8 sps:$4 sm:$0xff]  }
  0x4f   : > { %5306 = vmatpush3.bf16.msra.mxu0 %v5781_v29  ;;  %5309 = vmatprep.mubr.msk.bf16.mxu0 %vm439_vm0, %v5783_v32  ;;  %v4687_v29 = vld [vmem:[%s5990_s24 + $0x10] sm:$0xf]  ;;  %v1762_v32 = vshrl.u32 %v4685_v24, 16  ;;  %v1771_v38 = vshll.u32 %v4686_v28, 16  ;;  %v1823_v24 = vrot.slane %v1821_v12, 5  ;;  %v1834_v28 = vrot.slane %v1832_v18, 4 }
  0x50   : > { %5307 = vmatprep.subr.bf16.mxu0 %v5782_v37  ;;  %v1776_v34 = vshrl.u32 %v4687_v29, 16  ;;  %v1779_v39 = vshll.u32 %v4687_v29, 16  ;;  %v1835_v29 = vshll.u32 %v4695_v3, 16  ;;  %v5803_v3 = vld [vmem:[%s5990_s24 + $0x50] ss:$8 sps:$4 sm:$0xff]   ;;  %v5811_v18 = vld [vmem:[%s6941_s7] sm:$0xff]  }
  0x51   : > { %v1764_v42 = vrot.slane %v1762_v32, 4  ;;  %v6187_v58 = vrot.slane %v1771_v38, 5  ;;  %v1849_v32 = vshll.u32 %v4697_v13, 16  ;;  %v5808_v12 = vld [vmem:[%s5990_s24 + $0x80] ss:$8 sps:$4 sm:$0xff]  }
  0x52   : > { %v1778_v44 = vrot.slane %v1776_v34, 4  ;;  %v1781_v47 = vrot.slane %v1779_v39, 5  ;;  %v6226_v34 = vrot.slane %v1796_v16, 4  ;;  %v5810_v16 = vld [vmem:[%s6935_s1 + $0x118] sm:$0xff]  }
  0x53   : > { %5308 = vmatpush3.bf16.msra.mxu0 %v5782_v37  ;;  %v1292_v37 = vsel %vm6034_vm3, %v1287_v19, %v1291_v20  ;;  %v4699_v19 = vld [vmem:[%s5990_s24 + $0x40] sm:$0xf]  ;;  %v1851_v40 = vrot.slane %v1849_v32, 5  ;;  %v5821_v32 = vld [vmem:[%s6938_s4 + $0x48] sm:$0xff]  }
  0x54   : > { %5317 = vmatprep.subr.bf16.mxu0 %v5785_v53  ;;  %v1782_v59 = vor.u32 %v1781_v47, %v1778_v44  ;;  %v4619_v4 = vcombine.low %v1278_v36, %v1292_v37  ;;  %v5814_v20 = vld [vmem:[%s6938_s4 + $0x80] sm:$0xff]   ;;  %v1837_v36 = vrot.slane %v1835_v29, 5  ;;  %v1863_v45 = vshll.u32 %v4699_v19, 16 }
  0x55   : > { %5445 = vmatprep.subr.bf16.mxu1 %v5814_v20  ;;  %v6235_v47 = vrot.slane %v1841_v30, 5  ;;  %v5818_v29 = vld [vmem:[%s6938_s4 + $0x40] sm:$0xff]   ;;  %v5819_v30 = vld [vmem:[%s5990_s24 + $0xe8] ss:$8 sps:$4 sm:$0xff]  }
  0x56   : > { %5310 = vmatmul.mubr.msk.bf16.vlgmr.msra.gmra.mrb[0].mxu0 %vm439_vm0, %v5784_v55  ;;  %v1804_v55 = vshrl.u32 %v4691_v41, 16  ;;  %v6210_v15 = vrot.slane %v1782_v59, 4  ;;  %5446 = vmatpush3.bf16.msra.mxu1 %v5814_v20  ;;  %v1860_v41 = vshrl.u32 %v4699_v19, 16  ;;  %v1838_v44 = vor.u32 %v1837_v36, %v1834_v28  ;;  %v5796_v59 = vld [vmem:[%s5990_s24 + $0x18] ss:$8 sps:$4 sm:$0xff]  }
  0x57   : > { %5318 = vmatpush3.bf16.msra.mxu0 %v5785_v53  ;;  %5313 = vmatprep.mubr.msk.bf16.mxu0 %vm439_vm0, %v5787_v62  ;;  %v1768_v53 = vor.u32 %v1767_v43, %v1764_v42  ;;  %v5792_v62 = vld [vmem:[%s6935_s1 + $0xc8] sm:$0xff]   ;;  %v5794_v42 = vld [vmem:[%s6935_s1 + $0xd8] sm:$0xff]   ;;  %v6233_v43 = vrot.slane %v1827_v27, 5 }
  0x58   : > { %5319 = vmatprep.subr.bf16.mxu0 %v5786_v1  ;;  %v1806_v0 = vrot.slane %v1804_v55, 4  ;;  %v1862_v48 = vrot.slane %v1860_v41, 4  ;;  %v1839_v55 = vrot.slane %v1838_v44, 4  ;;  %v5816_v27 = vld [vmem:[%s6938_s4 + $0x88] sm:$0xff]   ;;  %v5817_v28 = vld [vmem:[%s5990_s24 + $0xd8] ss:$8 sps:$4 sm:$0xff]  }
  0x59   : > { %v6195_v5 = vrot.slane %v1768_v53, 4  ;;  %v1865_v53 = vrot.slane %v1863_v45, 5  ;;  %5447 = vmatprep.subr.bf16.mxu1 %v5816_v27  ;;  %v5825_v36 = vld [vmem:[%s6938_s4 + $0x58] sm:$0xff]   ;;  %v5833_v44 = vld [vmem:[%s5990_s24 + $0x108] ss:$8 sps:$4 sm:$0xff]   ;;  %v6379_v45 = vld [vmem:[%s6938_s4 + $0xc0] sm:$0xff]  }
  0x5a   : > { %5448 = vmatpush3.bf16.msra.mxu1 %v5816_v27  ;;  %v5830_v41 = vld [vmem:[%s6938_s4 + $0xb8] sm:$0xff]  }
  0x5b   : > { %5320 = vmatpush3.bf16.msra.mxu0 %v5786_v1  ;;  %v1809_v1 = vrot.slane %v1807_v56, 5 }
  0x5c   : > { %5321 = vmatprep.subr.bf16.mxu0 %v5789_v8 }
  0x5d   : > { %v1810_v22 = vor.u32 %v1809_v1, %v1806_v0  ;;  %v5798_v0 = vld [vmem:[%s6935_s1 + $0xe8] sm:$0xff]   ;;  %v5801_v1 = vld [vmem:[%s6935_s1 + $0xf0] sm:$0xff]  }
  0x5e   : > { %5314 = vmatmul.mubr.msk.bf16.gmra.mrb[4].mxu0 %vm439_vm0, %v5788_v14  ;;  %v4698_v14 = vld [vmem:[%s5990_s24 + $0x3c] sm:$0x1] }
  0x5f   : > { %5322 = vmatpush3.bf16.msra.mxu0 %v5789_v8  ;;  %5325 = vmatprep.mubr.msk.bf16.mxu0 %vm439_vm0, %v4617_v25  ;;  %v1818_v8 = vshrl.u32 %v4693_v57, 16  ;;  %v4700_v25 = vld [vmem:[%s5990_s24 + $0x44] sm:$0x1]  ;;  %v1855_v37 = vshll.u32 %v4698_v14, 16  ;;  %v6228_v38 = vrot.slane %v1810_v22, 4  ;;  %v1866_v57 = vor.u32 %v1865_v53, %v1862_v48 }
  0x60   : > { %5323 = vmatprep.subr.bf16.mxu0 %v5790_v21  ;;  %v1869_v46 = vshll.u32 %v4700_v25, 16  ;;  %v1788_v14 = vsel %vm6034_vm3, %v6210_v15, %v6192_v63  ;;  %v1844_v15 = vsel %vm6034_vm3, %v1839_v55, %v6235_v47  ;;  %v5815_v25 = vld [vmem:[%s6941_s7 + $0x18] sm:$0xff]   ;;  %v6390_v47 = vld [vmem:[%s6938_s4] sm:$0xff]  }
  0x61   : > { %v1820_v17 = vrot.slane %v1818_v8, 4  ;;  %v5807_v8 = vld [vmem:[%s5990_s24 + $0x70] ss:$8 sps:$4 sm:$0xff]   ;;  %v1816_v63 = vsel %vm6034_vm3, %v6228_v38, %v6221_v23  ;;  %v5827_v38 = vld [vmem:[%s6938_s4 + $0x60] sm:$0xff]  }
  0x62   : > { %v6245_v56 = vrot.slane %v1869_v46, 5  ;;  %v5835_v46 = vld [vmem:[%s6938_s4 + $0x78] sm:$0xff]  }
  0x63   : > { %5324 = vmatpush3.bf16.msra.mxu0 %v5790_v21  ;;  %v5793_v21 = vld [vmem:[%s6935_s1 + $0xd0] sm:$0xff]   ;;  %v1824_v35 = vor.u32 %v1823_v24, %v1820_v17 }
  0x64   : > { %5333 = vmatprep.subr.bf16.mxu0 %v5791_v51 }
  0x65   : > { %v6237_v49 = vrot.slane %v1824_v35, 4  ;;  %v5824_v35 = vld [vmem:[%s6938_s4 + $0xa0] sm:$0xff]  }
  0x66   : > { %5326 = vmatmul.mubr.msk.bf16.vlgmr.msra.gmra.mrb[0].mxu0 %vm439_vm0, %v6166_v26  ;;  %v1846_v26 = vshrl.u32 %v4697_v13, 16  ;;  %v1774_v13 = vsel %vm6034_vm3, %v6195_v5, %v6187_v58  ;;  %v1802_v58 = vsel %vm6034_vm3, %v6226_v34, %v6206_v11  ;;  %v5812_v11 = vld [vmem:[%s6941_s7 + $0x8] sm:$0xff]   ;;  %v5823_v34 = vld [vmem:[%s6938_s4 + $0x50] sm:$0xff]  }
  0x67   : > { %5334 = vmatpush3.bf16.msra.mxu0 %v5791_v51  ;;  %5329 = vmatprep.mubr.msk.bf16.mxu0 %vm439_vm0, %v4619_v4  ;;  %v6239_v51 = vrot.slane %v1855_v37, 5  ;;  %v5802_v4 = vld [vmem:[%s6935_s1 + $0xf8] sm:$0xff]   ;;  %v4709_v17 = vcombine.low %v1774_v13, %v1788_v14  ;;  %v1830_v5 = vsel %vm6034_vm3, %v6237_v49, %v6233_v43  ;;  %v4710_v19 = vcombine.low %v1802_v58, %v1816_v63  ;;  %v5826_v37 = vld [vmem:[%s6938_s4 + $0xa8] sm:$0xff]   ;;  %v5832_v43 = vld [vmem:[%s6938_s4 + $0x70] sm:$0xff]  }
  0x68   : > { %5335 = vmatprep.subr.bf16.mxu0 %v5792_v62  ;;  %v1848_v39 = vrot.slane %v1846_v26, 4  ;;  %v4711_v20 = vcombine.low %v1830_v5, %v1844_v15  ;;  %v5911_v26 = vmov 0   ;;  %v6398_v49 = vld [vmem:[%s6936_s2] ss:$0 sm:$0xff] }
  0x69   : > { %2051 = vst [vmem:[#allocation2 + $0x18] sm:$0xf] %v5911_v26  ;;  %2052 = vst [vmem:[#allocation2 + $0x1c] sm:$0x1] %v5911_v26 }
  0x6a   : > { %v1852_v50 = vor.u32 %v1851_v40, %v1848_v39  ;;  %2045 = vst [vmem:[#allocation2] sm:$0xf] %v5911_v26  ;;  %2046 = vst [vmem:[#allocation2 + $0x4] sm:$0x1] %v5911_v26  ;;  %v5828_v39 = vld [vmem:[%s6938_s4 + $0xb0] sm:$0xff]   ;;  %v5829_v40 = vld [vmem:[%s6938_s4 + $0x68] sm:$0xff]  }
  0x6b   : > { %5336 = vmatpush3.bf16.msra.mxu0 %v5792_v62  ;;  %v1867_v62 = vrot.slane %v1866_v57, 4  ;;  %2047 = vst [vmem:[#allocation2 + $0x8] sm:$0xf] %v5911_v26  ;;  %2048 = vst [vmem:[#allocation2 + $0xc] sm:$0x1] %v5911_v26 }
  0x6c   : > { %5337 = vmatprep.subr.bf16.mxu0 %v5793_v21  ;;  %v1853_v61 = vrot.slane %v1852_v50, 4  ;;  %2049 = vst [vmem:[#allocation2 + $0x10] sm:$0xf] %v5911_v26  ;;  %2050 = vst [vmem:[#allocation2 + $0x14] sm:$0x1] %v5911_v26 }
  0x6d   : > { %v1872_v23 = vsel %vm6034_vm3, %v1867_v62, %v6245_v56  ;;  %2053 = vst [vmem:[#allocation2 + $0x20] sm:$0xf] %v5911_v26  ;;  %2054 = vst [vmem:[#allocation2 + $0x24] sm:$0x1] %v5911_v26 }
  0x6e   : > { %5330 = vmatmul.mubr.msk.bf16.gmra.mrb[4].mxu0 %vm439_vm0, %v4620_v31  ;;  %v1858_v22 = vsel %vm6034_vm3, %v1853_v61, %v6239_v51  ;;  %v5820_v31 = vld [vmem:[%s6938_s4 + $0x90] sm:$0xff]   ;;  %2055 = vst [vmem:[#allocation2 + $0x28] sm:$0xf] %v5911_v26  ;;  %2056 = vst [vmem:[#allocation2 + $0x2c] sm:$0x1] %v5911_v26 }
  0x6f   : > { %5338 = vmatpush3.bf16.msra.mxu0 %v5793_v21  ;;  %5341 = vmatprep.mubr.msk.bf16.mxu0 %vm439_vm0, %v5795_v33  ;;  %v5813_v21 = vld [vmem:[%s6941_s7 + $0x10] sm:$0xff]   ;;  %v4712_v24 = vcombine.low %v1858_v22, %v1872_v23  ;;  %2057 = vst [vmem:[#allocation2 + $0x30] sm:$0xf] %v5911_v26  ;;  %2058 = vst [vmem:[#allocation2 + $0x34] sm:$0x1] %v5911_v26  ;;  %v5822_v33 = vld [vmem:[%s6938_s4 + $0x98] sm:$0xff]  }
  0x70   : > { %5339 = vmatprep.subr.bf16.mxu0 %v5794_v42  ;;  %2059 = vst [vmem:[#allocation2 + $0x38] sm:$0xf] %v5911_v26  ;;  %2060 = vst [vmem:[#allocation2 + $0x3c] sm:$0x1] %v5911_v26  ;;  %5449 = vmatprep.subr.bf16.mxu1 %v5820_v31  ;;  %v6403_v51 = vld [vmem:[%s6937_s3] ss:$0 sm:$0xff] }
  0x71   : > { %2061 = vst [vmem:[#allocation2 + $0x40] sm:$0xf] %v5911_v26  ;;  %2062 = vst [vmem:[#allocation2 + $0x44] sm:$0x1] %v5911_v26  ;;  %5450 = vmatpush3.bf16.msra.mxu1 %v5820_v31  ;;  %v6393_v48 = vld [vmem:[#allocation2] sm:$0xf] }
  0x72   : > { %2063 = vst [vmem:[#allocation2 + $0x48] sm:$0xf] %v5911_v26  ;;  %2064 = vst [vmem:[#allocation2 + $0x4c] sm:$0x1] %v5911_v26  ;;  %5451 = vmatprep.subr.bf16.mxu1 %v5822_v33  ;;  %v2420_v53 = vshrl.u32 %v6393_v48, 16 }
  0x73   : > { %5340 = vmatpush3.bf16.msra.mxu0 %v5794_v42  ;;  %v5831_v42 = vld [vmem:[%s5990_s24 + $0xf8] ss:$8 sps:$4 sm:$0xff]   ;;  %v2187_v23 = vld [vmem:[#allocation2 + $0x1c] sm:$0x1]  ;;  %v2169_v26 = vld [vmem:[#allocation2 + $0x8] sm:$0xf] }
  0x74   : > { %5349 = vmatprep.subr.bf16.mxu0 %v5797_v54  ;;  %v2184_v22 = vld [vmem:[#allocation2 + $0x18] sm:$0xf] }
  0x75   : > { %5452 = vmatpush3.bf16.msra.mxu1 %v5822_v33 }
  0x76   : > { %5342 = vmatmul.mubr.msk.bf16.vlgmr.msra.gmra.mrb[0].mxu0 %vm439_vm0, %v5796_v59  ;;  %5453 = vmatprep.subr.bf16.mxu1 %v5824_v35 }
  0x77   : > { %5350 = vmatpush3.bf16.msra.mxu0 %v5797_v54  ;;  %5345 = vmatprep.mubr.msk.bf16.mxu0 %vm439_vm0, %v5799_v60  ;;  %v2423_v54 = vshll.u32 %v6393_v48, 16 }
  0x78   : > { %5351 = vmatprep.subr.bf16.mxu0 %v5798_v0 }
  0x79   : > { %5454 = vmatpush3.bf16.msra.mxu1 %v5824_v35 }
  0x7a   : > { %5455 = vmatprep.subr.bf16.mxu1 %v5826_v37 }
  0x7b   : > { %5352 = vmatpush3.bf16.msra.mxu0 %v5798_v0 }
  0x7c   : > { %5353 = vmatprep.subr.bf16.mxu0 %v5801_v1 }
  0x7d   : > { %5456 = vmatpush3.bf16.msra.mxu1 %v5826_v37 }
  0x7e   : > { %5346 = vmatmul.mubr.msk.bf16.gmra.mrb[4].mxu0 %vm439_vm0, %v5800_v2  ;;  %5457 = vmatprep.subr.bf16.mxu1 %v5828_v39  ;;  %v6413_v2 = vld [vmem:[#allocation2] sm:$0xe] }
  0x7f   : > { %5354 = vmatpush3.bf16.msra.mxu0 %v5801_v1  ;;  %5357 = vmatprep.mubr.msk.bf16.mxu0 %vm439_vm0, %v5803_v3  ;;  %v6415_v3 = vrot.slane %v2420_v53, 4 }
  0x80   : > { %5355 = vmatprep.subr.bf16.mxu0 %v5802_v4 }
  0x81   : > { %5458 = vmatpush3.bf16.msra.mxu1 %v5828_v39 }
  0x82   : > { %5459 = vmatprep.subr.bf16.mxu1 %v5830_v41 }
  0x83   : > { %5356 = vmatpush3.bf16.msra.mxu0 %v5802_v4  ;;  %v6417_v4 = vrot.slane %v2423_v54, 5 }
  0x84   : > { %5365 = vmatprep.subr.bf16.mxu0 %v5805_v6 }
  0x85   : > { %5460 = vmatpush3.bf16.msra.mxu1 %v5830_v41  ;;  %v2426_v5 = vor.u32 %v6417_v4, %v6415_v3 }
  0x86   : > { %5358 = vmatmul.mubr.msk.bf16.vlgmr.msra.gmra.mrb[0].mxu0 %vm439_vm0, %v5804_v7  ;;  %5469 = vmatprep.subr.bf16.mxu1 %v6379_v45 }
  0x87   : > { %5366 = vmatpush3.bf16.msra.mxu0 %v5805_v6  ;;  %5361 = vmatprep.mubr.msk.bf16.mxu0 %vm439_vm0, %v5807_v8  ;;  %v6420_v8 = vld [vmem:[#allocation2 + $0x4] sm:$0x1] }
  0x88   : > { %5367 = vmatprep.subr.bf16.mxu0 %v5806_v9  ;;  %v2429_v14 = vshll.u32 %v6420_v8, 16  ;;  %v2843_v63 = vrot.slane %v6420_v8, 5 }
  0x8b   : > { %5368 = vmatpush3.bf16.msra.mxu0 %v5806_v9 }
  0x8c   : > { %5369 = vmatprep.subr.bf16.mxu0 %v5809_v10 }
  0x8e   : > { %5362 = vmatmul.mubr.msk.bf16.gmra.mrb[4].mxu0 %vm439_vm0, %v5808_v12 }
  0x8f   : > { %5370 = vmatpush3.bf16.msra.mxu0 %v5809_v10  ;;  %5373 = vmatprep.mubr.msk.bf16.mxu0 %vm439_vm0, %v4709_v17 }
  0x90   : > { %5371 = vmatprep.subr.bf16.mxu0 %v5810_v16 }
  0x93   : > { %5372 = vmatpush3.bf16.msra.mxu0 %v5810_v16  ;;  %v4793_v16 = vrot.slane %v6413_v2, 9 }
  0x94   : > { %5381 = vmatprep.subr.bf16.mxu0 %v5811_v18 }
  0x96   : > { %5374 = vmatmul.mubr.msk.bf16.vlgmr.msra.gmra.mrb[0].mxu0 %vm439_vm0, %v4710_v19 }
  0x97   : > { %5377 = vmatprep.mubr.msk.bf16.mxu0 %vm439_vm0, %v4711_v20  ;;  %5382 = vmatpush3.bf16.msra.mxu0 %v5811_v18 }
  0x98   : > { %5383 = vmatprep.subr.bf16.mxu0 %v5812_v11 }
  0x9b   : > { %5384 = vmatpush3.bf16.msra.mxu0 %v5812_v11 }
  0x9c   : > { %5385 = vmatprep.subr.bf16.mxu0 %v5813_v21 }
  0x9e   : > { %5378 = vmatmul.mubr.msk.bf16.gmra.mrb[4].mxu0 %vm439_vm0, %v4712_v24 }
  0x9f   : > { %5386 = vmatpush3.bf16.msra.mxu0 %v5813_v21  ;;  %5389 = vmatprep.mubr.msk.bf16.mxu0 %vm439_vm0, %v5817_v28 }
  0xa0   : > { %5387 = vmatprep.subr.bf16.mxu0 %v5815_v25 }
  0xa3   : > { %5388 = vmatpush3.bf16.msra.mxu0 %v5815_v25 }
  0xa4   : > { %5397 = vmatprep.subr.bf16.mxu0 %v5818_v29 }
  0xa6   : > { %5390 = vmatmul.mubr.msk.bf16.vlgmr.msra.gmra.mrb[8].mxu0 %vm439_vm0, %v5819_v30 }
  0xa7   : > { %5398 = vmatpush3.bf16.msra.mxu0 %v5818_v29  ;;  %5393 = vmatprep.mubr.msk.bf16.mxu0 %vm439_vm0, %v5831_v42 }
  0xa8   : > { %5399 = vmatprep.subr.bf16.mxu0 %v5821_v32 }
  0xab   : > { %5400 = vmatpush3.bf16.msra.mxu0 %v5821_v32 }
  0xac   : > { %5401 = vmatprep.subr.bf16.mxu0 %v5823_v34 }
  0xae   : > { %5394 = vmatmul.mubr.msk.bf16.gmra.mrb[12].mxu0 %vm439_vm0, %v5833_v44 }
  0xaf   : > { %5402 = vmatpush3.bf16.msra.mxu0 %v5823_v34 }
  0xb0   : > { %5403 = vmatprep.subr.bf16.mxu0 %v5825_v36 }
  0xb3   : > { %5404 = vmatpush3.bf16.msra.mxu0 %v5825_v36 }
  0xb4   : > { %5405 = vmatprep.subr.bf16.mxu0 %v5827_v38 }
  0xb7   : > { %5406 = vmatpush3.bf16.msra.mxu0 %v5827_v38  ;;  %v2175_v38 = vld [vmem:[#allocation2 + $0xc] sm:$0x1] }
  0xb8   : > { %5407 = vmatprep.subr.bf16.mxu0 %v5829_v40 }
  0xbb   : > { %5408 = vmatpush3.bf16.msra.mxu0 %v5829_v40 }
  0xbc   : > { %5409 = vmatprep.subr.bf16.mxu0 %v5832_v43 }
  0xbf   : > { %5410 = vmatpush3.bf16.msra.mxu0 %v5832_v43 }
  0xc0   : > { %5411 = vmatprep.subr.bf16.mxu0 %v5835_v46 }
  0xc3   : > { %5412 = vmatpush3.bf16.msra.mxu0 %v5835_v46  ;;  %v2190_v46 = vld [vmem:[#allocation2 + $0x20] sm:$0xf] }
  0xc4   : > { %5421 = vmatprep.subr.bf16.mxu0 %v6390_v47 }
 0x169   : > { %v5375_v50 = vpop.f32.mrb[0].mxu0 }
 0x16a   : > { %v2012_v55 = vmul.f32 %v5375_v50, %v6398_v49  ;;  %v1964_v56 = vpop.f32.mrb[1].mxu0 }
 0x16b   : > { %v2010_v57 = vmul.f32 %v6398_v49, %v1964_v56  ;;  %v5376_v59 = vpop.f32.mrb[2].mxu0 }
 0x16c   : > { %v2027_v60 = vadd.f32 %v6403_v51, %v2012_v55  ;;  %v2013_v61 = vmul.f32 %v5376_v59, %v6398_v49  ;;  %v1967_v62 = vpop.f32.mrb[3].mxu0  ;;  %v2193_v55 = vld [vmem:[#allocation2 + $0x24] sm:$0x1] }
 0x16d   : > { %v2025_v0 = vadd.f32 %v6403_v51, %v2010_v57  ;;  %v2011_v1 = vmul.f32 %v6398_v49, %v1967_v62 }
 0x16e   : > { %v2035_v6 = vmax.f32 %v2027_v60, 0.0  ;;  %v2028_v7 = vadd.f32 %v6403_v51, %v2013_v61 }
 0x16f   : > { %v2033_v9 = vmax.f32 %v2025_v0, 0.0  ;;  %v2026_v10 = vadd.f32 %v6403_v51, %v2011_v1  ;;  %v2178_v0 = vld [vmem:[#allocation2 + $0x10] sm:$0xf]  ;;  %v2181_v1 = vld [vmem:[#allocation2 + $0x14] sm:$0x1] }
 0x170   : > { %v5020_v12 = vpack.c.bf16 %v2035_v6, %v2035_v6  ;;  %v2036_v13 = vmax.f32 %v2028_v7, 0.0 }
 0x171   : > { %v5018_v17 = vpack.c.bf16 %v2033_v9, %v2033_v9  ;;  %v2034_v18 = vmax.f32 %v2026_v10, 0.0  ;;  %v5379_v58 = vpop.f32.mrb[4].mxu0 }
 0x172   : > { %v2102_v15 = vshrl.u32 %v5020_v12, 16  ;;  %v2105_v19 = vshll.u32 %v5020_v12, 16  ;;  %v5021_v11 = vpack.c.bf16 %v2036_v13, %v2036_v13  ;;  %v2016_v20 = vmul.f32 %v5379_v58, %v6398_v49  ;;  %v1980_v21 = vpop.f32.mrb[5].mxu0 }
 0x173   : > { %v2086_v24 = vshrl.u32 %v5018_v17, 16  ;;  %v2089_v25 = vshll.u32 %v5018_v17, 16  ;;  %v5019_v27 = vpack.c.bf16 %v2034_v18, %v2034_v18  ;;  %v2014_v28 = vmul.f32 %v6398_v49, %v1980_v21  ;;  %v5380_v29 = vpop.f32.mrb[6].mxu0 }
 0x174   : > { %v2104_v30 = vrot.slane %v2102_v15, 7  ;;  %v2110_v32 = vshrl.u32 %v5021_v11, 16  ;;  %v2113_v33 = vshll.u32 %v5021_v11, 16  ;;  %v2031_v34 = vadd.f32 %v6403_v51, %v2016_v20  ;;  %v1983_v35 = vpop.f32.mrb[7].mxu0 }
 0x175   : > { %v2088_v37 = vrot.slane %v2086_v24, 7  ;;  %v2094_v39 = vshrl.u32 %v5019_v27, 16  ;;  %v2097_v40 = vshll.u32 %v5019_v27, 16  ;;  %v2029_v41 = vadd.f32 %v6403_v51, %v2014_v28 }
 0x176   : > { %v2107_v42 = vor.u32 %v2105_v19, %v2104_v30  ;;  %v2108_v43 = vrot.slane %v2104_v30, 4  ;;  %v2112_v44 = vrot.slane %v2110_v32, 7  ;;  %v2039_v50 = vmax.f32 %v2031_v34, 0.0  ;;  %v2211_v30 = vld [vmem:[#allocation2 + $0x3c] sm:$0x1] }
 0x177   : > { %v2091_v53 = vor.u32 %v2089_v25, %v2088_v37  ;;  %v2092_v54 = vrot.slane %v2088_v37, 4  ;;  %v2096_v56 = vrot.slane %v2094_v39, 7  ;;  %v2037_v57 = vmax.f32 %v2029_v41, 0.0  ;;  %v2199_v34 = vld [vmem:[#allocation2 + $0x2c] sm:$0x1] }
 0x178   : > { %v2185_v59 = vsel %vm6432_vm10, %v2107_v42, %v2184_v22  ;;  %v2188_v60 = vsel %vm6439_vm11, %v2108_v43, %v2187_v23  ;;  %v2115_v61 = vor.u32 %v2113_v33, %v2112_v44  ;;  %v2116_v62 = vrot.slane %v2112_v44, 4  ;;  %v2208_v23 = vld [vmem:[#allocation2 + $0x38] sm:$0xf]  ;;  %v2196_v33 = vld [vmem:[#allocation2 + $0x28] sm:$0xf] }
 0x179   : > { %2186 = vst [vmem:[#allocation2 + $0x18] sm:$0xf] %v2185_v59  ;;  %2189 = vst [vmem:[#allocation2 + $0x1c] sm:$0x1] %v2188_v60  ;;  %v2170_v6 = vsel %vm6432_vm10, %v2091_v53, %v2169_v26  ;;  %v2176_v7 = vsel %vm6439_vm11, %v2092_v54, %v2175_v38  ;;  %v2099_v9 = vor.u32 %v2097_v40, %v2096_v56  ;;  %v2100_v10 = vrot.slane %v2096_v56, 4 }
 0x17a   : > { %2171 = vst [vmem:[#allocation2 + $0x8] sm:$0xf] %v2170_v6  ;;  %2177 = vst [vmem:[#allocation2 + $0xc] sm:$0x1] %v2176_v7  ;;  %v2191_v12 = vsel %vm6432_vm10, %v2115_v61, %v2190_v46  ;;  %v2194_v13 = vsel %vm6439_vm11, %v2116_v62, %v2193_v55  ;;  %v5024_v17 = vpack.c.bf16 %v2039_v50, %v2039_v50  ;;  %v6472_v27 = vrot.slane %v2429_v14, 5 }
 0x17b   : > { %v5022_v18 = vpack.c.bf16 %v2037_v57, %v2037_v57  ;;  %2192 = vst [vmem:[#allocation2 + $0x20] sm:$0xf] %v2191_v12  ;;  %2195 = vst [vmem:[#allocation2 + $0x24] sm:$0x1] %v2194_v13  ;;  %v2179_v58 = vsel %vm6432_vm10, %v2099_v9, %v2178_v0  ;;  %v2182_v15 = vsel %vm6439_vm11, %v2100_v10, %v2181_v1  ;;  %v2214_v57 = vld [vmem:[#allocation2 + $0x40] sm:$0xf] }
 0x17c   : > { %v2017_v19 = vmul.f32 %v5380_v29, %v6398_v49  ;;  %v2015_v11 = vmul.f32 %v6398_v49, %v1983_v35  ;;  %2180 = vst [vmem:[#allocation2 + $0x10] sm:$0xf] %v2179_v58  ;;  %2183 = vst [vmem:[#allocation2 + $0x14] sm:$0x1] %v2182_v15  ;;  %v2134_v20 = vshrl.u32 %v5024_v17, 16  ;;  %v6477_v49 = vrot.slane %v2426_v5, 4 }
 0x17d   : > { %v2118_v21 = vshrl.u32 %v5022_v18, 16  ;;  %v2137_v29 = vshll.u32 %v5024_v17, 16  ;;  %v2121_v32 = vshll.u32 %v5022_v18, 16  ;;  %v2217_v59 = vld [vmem:[#allocation2 + $0x44] sm:$0x1] }
 0x17e   : > { %v2032_v24 = vadd.f32 %v6403_v51, %v2017_v19  ;;  %v2030_v25 = vadd.f32 %v6403_v51, %v2015_v11  ;;  %v2136_v28 = vrot.slane %v2134_v20, 7  ;;  %v6485_v51 = vsel %vm6464_vm12, %v4793_v16, %v2843_v63  ;;  %v2202_v61 = vld [vmem:[#allocation2 + $0x30] sm:$0xf]  ;;  %v2205_v62 = vld [vmem:[#allocation2 + $0x34] sm:$0x1] }
 0x17f   : > { %v2120_v26 = vrot.slane %v2118_v21, 7  ;;  %v2432_v2 = vsel %vm6034_vm3, %v6477_v49, %v6472_v27  ;;  %v5839_v49 = vld [vmem:[%s6938_s4 + $0x8] sm:$0xff]   ;;  %v5013_v22 = vld [vmem:[%s6939_s5] ss:$0 sm:$0xff] }
 0x180   : > { %v2040_v35 = vmax.f32 %v2032_v24, 0.0  ;;  %v2038_v37 = vmax.f32 %v2030_v25, 0.0  ;;  %v2139_v3 = vor.u32 %v2137_v29, %v2136_v28  ;;  %v2140_v4 = vrot.slane %v2136_v28, 4  ;;  %v2414_v38 = vld [vmem:[#allocation2 + $0x1c] sm:$0x1] }
 0x181   : > { %v2123_v14 = vor.u32 %v2121_v32, %v2120_v26  ;;  %v2124_v5 = vrot.slane %v2120_v26, 4  ;;  %v2817_v39 = vld [vmem:[#allocation2 + $0x18] sm:$0xe]  ;;  %v2412_v42 = vld [vmem:[#allocation2 + $0xc] sm:$0x1]  ;;  %v2471_v44 = vshll.u32 %v2414_v38, 16 }
 0x182   : > { %v5025_v40 = vpack.c.bf16 %v2040_v35, %v2040_v35  ;;  %v5023_v41 = vpack.c.bf16 %v2038_v37, %v2038_v37  ;;  %v2815_v43 = vld [vmem:[#allocation2 + $0x8] sm:$0xe]  ;;  %v2209_v8 = vsel %vm6432_vm10, %v2139_v3, %v2208_v23  ;;  %v2212_v16 = vsel %vm6439_vm11, %v2140_v4, %v2211_v30  ;;  %v6517_v26 = vld [vmem:[#allocation2 + $0x18] sm:$0xf]  ;;  %v6519_v32 = vld [vmem:[#allocation2 + $0x24] sm:$0x1] }
 0x183   : > { %v2197_v63 = vsel %vm6432_vm10, %v2123_v14, %v2196_v33  ;;  %v2200_v46 = vsel %vm6439_vm11, %v2124_v5, %v2199_v34  ;;  %2210 = vst [vmem:[#allocation2 + $0x38] sm:$0xf] %v2209_v8  ;;  %2213 = vst [vmem:[#allocation2 + $0x3c] sm:$0x1] %v2212_v16  ;;  %v6499_v55 = vld [vmem:[#allocation2 + $0x14] sm:$0x1] }
 0x184   : > { %2198 = vst [vmem:[#allocation2 + $0x28] sm:$0xf] %v2197_v63  ;;  %2201 = vst [vmem:[#allocation2 + $0x2c] sm:$0x1] %v2200_v46  ;;  %v2142_v50 = vshrl.u32 %v5025_v40, 16  ;;  %v2145_v53 = vshll.u32 %v5025_v40, 16 }
 0x185   : > { %v2126_v54 = vshrl.u32 %v5023_v41, 16  ;;  %v4796_v56 = vrot.slane %v2817_v39, 9  ;;  %v2129_v60 = vshll.u32 %v5023_v41, 16  ;;  %v2443_v0 = vshll.u32 %v2412_v42, 16  ;;  %v2816_v7 = vld [vmem:[#allocation2 + $0x10] sm:$0xe] }
 0x186   : > { %v4794_v1 = vrot.slane %v2815_v43, 9  ;;  %v2847_v6 = vrot.slane %v2412_v42, 5  ;;  %v2144_v9 = vrot.slane %v2142_v50, 7  ;;  %v2457_v12 = vshll.u32 %v6499_v55, 16  ;;  %v6502_v17 = vld [vmem:[#allocation2 + $0x8] sm:$0xf] }
 0x187   : > { %v2128_v10 = vrot.slane %v2126_v54, 7  ;;  %v4795_v13 = vrot.slane %v2816_v7, 9  ;;  %v6504_v18 = vrot.slane %v2443_v0, 5  ;;  %v6508_v15 = vrot.slane %v2471_v44, 5  ;;  %v6511_v11 = vld [vmem:[#allocation2 + $0x10] sm:$0xf] }
 0x188   : > { %v2848_v58 = vsel %vm6464_vm12, %v4794_v1, %v2847_v6  ;;  %v2851_v19 = vrot.slane %v6499_v55, 5  ;;  %v2147_v20 = vor.u32 %v2145_v53, %v2144_v9  ;;  %v2148_v21 = vrot.slane %v2144_v9, 4  ;;  %v6535_v31 = vld [vmem:[#allocation2 + $0x20] sm:$0xf]  ;;  %v5836_v39 = vld [vmem:[%s6938_s4 + $0xc8] sm:$0xff]  }
 0x189   : > { %v2131_v23 = vor.u32 %v2129_v60, %v2128_v10  ;;  %v2132_v24 = vrot.slane %v2128_v10, 4  ;;  %v4817_v25 = vcombine.low %v6485_v51, %v2848_v58  ;;  %v2855_v29 = vrot.slane %v2414_v38, 5  ;;  %v2818_v51 = vld [vmem:[#allocation2 + $0x20] sm:$0xe] }
 0x18a   : > { %v2852_v28 = vsel %vm6464_vm12, %v4795_v13, %v2851_v19  ;;  %v2434_v30 = vshrl.u32 %v6502_v17, 16  ;;  %v2215_v33 = vsel %vm6432_vm10, %v2147_v20, %v2214_v57  ;;  %v2218_v34 = vsel %vm6439_vm11, %v2148_v21, %v2217_v59  ;;  %v6544_v46 = vld [vmem:[#allocation2 + $0x3c] sm:$0x1] }
 0x18b   : > { %v2203_v35 = vsel %vm6432_vm10, %v2131_v23, %v2202_v61  ;;  %v2206_v37 = vsel %vm6439_vm11, %v2132_v24, %v2205_v62  ;;  %2216 = vst [vmem:[#allocation2 + $0x40] sm:$0xf] %v2215_v33  ;;  %2219 = vst [vmem:[#allocation2 + $0x44] sm:$0x1] %v2218_v34  ;;  %5461 = vmatprep.mubr.bf16.mxu1 %v4817_v25  ;;  %v2856_v3 = vsel %vm6464_vm12, %v4796_v56, %v2855_v29  ;;  %v6533_v38 = vld [vmem:[#allocation2 + $0x2c] sm:$0x1] }
 0x18c   : > { %2204 = vst [vmem:[#allocation2 + $0x30] sm:$0xf] %v2203_v35  ;;  %2207 = vst [vmem:[#allocation2 + $0x34] sm:$0x1] %v2206_v37  ;;  %v2436_v4 = vrot.slane %v2434_v30, 4  ;;  %v2437_v14 = vshll.u32 %v6502_v17, 16  ;;  %v4818_v36 = vcombine.low %v2852_v28, %v2856_v3 }
 0x18d   : > { %v2448_v5 = vshrl.u32 %v6511_v11, 16  ;;  %v2451_v40 = vshll.u32 %v6511_v11, 16  ;;  %v2462_v41 = vshrl.u32 %v6517_v26, 16  ;;  %v2465_v42 = vshll.u32 %v6517_v26, 16  ;;  %v2819_v43 = vld [vmem:[#allocation2 + $0x28] sm:$0xe] }
 0x18e   : > { %v2439_v44 = vrot.slane %v2437_v14, 5  ;;  %v4797_v16 = vrot.slane %v2818_v51, 9  ;;  %v2859_v63 = vrot.slane %v6519_v32, 5  ;;  %5462 = vmatmul.mubr.bf16.vlgmr.msra.gmra.mrb[0].mxu1 %v4818_v36  ;;  %v4798_v55 = vrot.slane %v2819_v43, 9  ;;  %v2821_v56 = vld [vmem:[#allocation2 + $0x38] sm:$0xe] }
 0x18f   : > { %v2450_v8 = vrot.slane %v2448_v5, 4  ;;  %v2453_v50 = vrot.slane %v2451_v40, 5  ;;  %v2464_v53 = vrot.slane %v2462_v41, 4  ;;  %v2467_v54 = vrot.slane %v2465_v42, 5  ;;  %5470 = vmatpush3.bf16.msra.mxu1 %v6379_v45  ;;  %v5838_v62 = vld [vmem:[%s6938_s4 + $0xd0] sm:$0xff]  }
 0x190   : > { %v2459_v57 = vrot.slane %v2457_v12, 5  ;;  %v2440_v59 = vor.u32 %v2439_v44, %v2436_v4  ;;  %v2860_v60 = vsel %vm6464_vm12, %v4797_v16, %v2859_v63  ;;  %v2863_v61 = vrot.slane %v6533_v38, 5  ;;  %5471 = vmatprep.subr.bf16.mxu1 %v5836_v39  ;;  %v6557_v12 = vld [vmem:[#allocation2 + $0x28] sm:$0xf]  ;;  %v6583_v3 = vld [vmem:[#allocation2 + $0x38] sm:$0xf] }
 0x191   : > { %v2454_v0 = vor.u32 %v2453_v50, %v2450_v8  ;;  %v2468_v1 = vor.u32 %v2467_v54, %v2464_v53  ;;  %v4800_v6 = vrot.slane %v2821_v56, 9  ;;  %v2476_v7 = vshrl.u32 %v6535_v31, 16  ;;  %v5841_v4 = vld [vmem:[%s6938_s4 + $0xd8] sm:$0xff]   ;;  %v5840_v36 = vld [vmem:[#allocation2 + $0x8] ss:$8 sps:$4 sm:$0xff]   ;;  %v5844_v16 = vld [vmem:[%s6938_s4 + $0xe0] sm:$0xff]  }
 0x192   : > { %v2441_v9 = vrot.slane %v2440_v59, 4  ;;  %v2864_v45 = vsel %vm6464_vm12, %v4798_v55, %v2863_v61  ;;  %v2871_v10 = vrot.slane %v6544_v46, 5  ;;  %v2479_v13 = vshll.u32 %v6535_v31, 16  ;;  %v5842_v63 = vld [vmem:[%s6938_s4 + $0x10] sm:$0xff]  }
 0x193   : > { %v2455_v58 = vrot.slane %v2454_v0, 4  ;;  %v2469_v19 = vrot.slane %v2468_v1, 4  ;;  %v4819_v20 = vcombine.low %v2860_v60, %v2864_v45  ;;  %v2417_v21 = vld [vmem:[#allocation2 + $0x34] sm:$0x1]  ;;  %v2820_v23 = vld [vmem:[#allocation2 + $0x30] sm:$0xe]  ;;  %5472 = vmatpush3.bf16.msra.mxu1 %v5836_v39 }
 0x194   : > { %v2446_v24 = vsel %vm6034_vm3, %v2441_v9, %v6504_v18  ;;  %v4799_v25 = vrot.slane %v2820_v23, 9  ;;  %v2867_v28 = vrot.slane %v2417_v21, 5  ;;  %v2478_v29 = vrot.slane %v2476_v7, 4  ;;  %5473 = vmatprep.subr.bf16.mxu1 %v5838_v62  ;;  %v6573_v35 = vld [vmem:[#allocation2 + $0x30] sm:$0xf]  ;;  %v5846_v0 = vld [vmem:[%s6938_s4 + $0xe8] sm:$0xff]  }
 0x195   : > { %v4769_v30 = vcombine.low %v2432_v2, %v2446_v24  ;;  %v2460_v33 = vsel %vm6034_vm3, %v2455_v58, %v2459_v57  ;;  %v2474_v34 = vsel %vm6034_vm3, %v2469_v19, %v6508_v15  ;;  %5465 = vmatprep.mubr.bf16.mxu1 %v4819_v20  ;;  %v2481_v18 = vrot.slane %v2479_v13, 5  ;;  %v5845_v9 = vld [vmem:[%s6938_s4 + $0x18] sm:$0xff]   ;;  %v3199_v20 = vld [vmem:[#allocation2 + $0x10] sm:$0xf]  ;;  %v3197_v24 = vld [vmem:[#allocation2 + $0x8] sm:$0xf] }
 0x196   : > { %v4770_v37 = vcombine.low %v2460_v33, %v2474_v34  ;;  %v2868_v51 = vsel %vm6464_vm12, %v4799_v25, %v2867_v28  ;;  %v2872_v27 = vsel %vm6464_vm12, %v4800_v6, %v2871_v10  ;;  %v2490_v2 = vshrl.u32 %v6557_v12, 16  ;;  %v5847_v28 = vld [vmem:[%s6938_s4 + $0x20] sm:$0xff]   ;;  %v5850_v34 = vld [vmem:[%s6938_s4 + $0xf8] sm:$0xff]  }
 0x197   : > { %5413 = vmatprep.mubr.bf16.mxu0 %v4769_v30  ;;  %v4820_v15 = vcombine.low %v2868_v51, %v2872_v27  ;;  %v2482_v14 = vor.u32 %v2481_v18, %v2478_v29  ;;  %v2493_v5 = vshll.u32 %v6557_v12, 16  ;;  %5474 = vmatpush3.bf16.msra.mxu1 %v5838_v62  ;;  %v2504_v40 = vshrl.u32 %v6573_v35, 16  ;;  %v5849_v51 = vld [vmem:[%s6938_s4 + $0x28] sm:$0xff]  }
 0x198   : > { %5414 = vmatmul.mubr.bf16.vlgmr.msra.gmra.mrb[16].mxu0 %v4770_v37  ;;  %v2492_v39 = vrot.slane %v2490_v2, 4  ;;  %v2507_v41 = vshll.u32 %v6573_v35, 16  ;;  %v2485_v42 = vshll.u32 %v6519_v32, 16  ;;  %v2499_v44 = vshll.u32 %v6533_v38, 16  ;;  %5475 = vmatprep.subr.bf16.mxu1 %v5841_v4 }
 0x199   : > { %5422 = vmatpush3.bf16.msra.mxu0 %v6390_v47  ;;  %5466 = vmatmul.mubr.bf16.gmra.mrb[4].mxu1 %v4820_v15  ;;  %v2495_v43 = vrot.slane %v2493_v5, 5  ;;  %v2518_v8 = vshrl.u32 %v6583_v3, 16  ;;  %v2506_v50 = vrot.slane %v2504_v40, 4  ;;  %v2513_v53 = vshll.u32 %v2417_v21, 16  ;;  %v5848_v21 = vld [vmem:[%s6938_s4 + $0xf0] sm:$0xff]  }
 0x19a   : > { %5423 = vmatprep.subr.bf16.mxu0 %v5839_v49  ;;  %5485 = vmatprep.mubr.bf16.mxu1 %v5840_v36  ;;  %v2509_v47 = vrot.slane %v2507_v41, 5  ;;  %v2521_v32 = vshll.u32 %v6583_v3, 16  ;;  %v2483_v54 = vrot.slane %v2482_v14, 4  ;;  %v2527_v59 = vshll.u32 %v6544_v46, 16  ;;  %v6634_v15 = vld [vmem:[#allocation2 + $0x14] sm:$0x1] }
 0x19b   : > { %v2496_v38 = vor.u32 %v2495_v43, %v2492_v39  ;;  %v2520_v55 = vrot.slane %v2518_v8, 4  ;;  %5476 = vmatpush3.bf16.msra.mxu1 %v5841_v4  ;;  %v2487_v60 = vrot.slane %v2485_v42, 5  ;;  %v2501_v62 = vrot.slane %v2499_v44, 5  ;;  %v5851_v4 = vld [vmem:[%s6938_s4 + $0x30] sm:$0xff]   ;;  %v5852_v5 = vld [vmem:[#allocation2 + $0x18] ss:$8 sps:$4 sm:$0xff]  }
 0x19c   : > { %v2510_v56 = vor.u32 %v2509_v47, %v2506_v50  ;;  %v2523_v57 = vrot.slane %v2521_v32, 5  ;;  %5477 = vmatprep.subr.bf16.mxu1 %v5844_v16  ;;  %v2515_v6 = vrot.slane %v2513_v53, 5  ;;  %v2529_v19 = vrot.slane %v2527_v59, 5  ;;  %v6639_v36 = vld [vmem:[#allocation2 + $0xc] sm:$0x1]  ;;  %v5855_v43 = vld [vmem:[%s6938_s4 + $0x38] sm:$0xff]  }
 0x19d   : > { %5424 = vmatpush3.bf16.msra.mxu0 %v5839_v49  ;;  %v2497_v61 = vrot.slane %v2496_v38, 4  ;;  %v2488_v46 = vsel %vm6034_vm3, %v2483_v54, %v2487_v60  ;;  %v3228_v29 = vshrl.u32 %v3199_v20, 16  ;;  %v3231_v30 = vshll.u32 %v3199_v20, 16  ;;  %v5856_v39 = vld [vmem:[%s6938_s4 + $0x108] sm:$0xff]   ;;  %v5859_v32 = vld [vmem:[#allocation2 + $0x38] ss:$8 sps:$4 sm:$0xff]  }
 0x19e   : > { %5425 = vmatprep.subr.bf16.mxu0 %v5842_v63  ;;  %v2511_v1 = vrot.slane %v2510_v56, 4  ;;  %v2524_v7 = vor.u32 %v2523_v57, %v2520_v55  ;;  %v4781_v33 = vcombine.low %v6393_v48, %v6502_v17  ;;  %v3214_v18 = vshrl.u32 %v3197_v24, 16  ;;  %v5853_v48 = vld [vmem:[%s6938_s4 + $0x100] sm:$0xff]   ;;  %v5854_v42 = vld [vmem:[#allocation2 + $0x28] ss:$8 sps:$4 sm:$0xff]   ;;  %v5861_v38 = vld [vmem:[%s6938_s4 + $0x118] sm:$0xff]  }
 0x19f   : > { %v2502_v45 = vsel %vm6034_vm3, %v2497_v61, %v2501_v62  ;;  %5478 = vmatpush3.bf16.msra.mxu1 %v5844_v16  ;;  %v3217_v37 = vshll.u32 %v3197_v24, 16  ;;  %v3230_v27 = vrot.slane %v3228_v29, 4  ;;  %v3233_v49 = vrot.slane %v3231_v30, 5  ;;  %v5860_v16 = vld [vmem:[%s6938_s4 + $0x110] sm:$0xff]   ;;  %v3203_v57 = vld [vmem:[#allocation2 + $0x20] sm:$0xf] }
 0x1a0   : > { %v4771_v10 = vcombine.low %v2488_v46, %v2502_v45  ;;  %v2516_v13 = vsel %vm6034_vm3, %v2511_v1, %v2515_v6  ;;  %v2525_v58 = vrot.slane %v2524_v7, 4  ;;  %5479 = vmatprep.subr.bf16.mxu1 %v5846_v0  ;;  %v3216_v17 = vrot.slane %v3214_v18, 4  ;;  %v3207_v60 = vld [vmem:[#allocation2 + $0x30] sm:$0xf]  ;;  %v5863_v61 = vld [vmem:[%s6938_s4 + $0x120] sm:$0xff]  }
 0x1a1   : > { %5426 = vmatpush3.bf16.msra.mxu0 %v5842_v63  ;;  %v3219_v2 = vrot.slane %v3217_v37, 5  ;;  %v3234_v14 = vor.u32 %v3233_v49, %v3230_v27  ;;  %v3237_v41 = vshll.u32 %v6634_v15, 16  ;;  %v3223_v44 = vshll.u32 %v6639_v36, 16  ;;  %v3201_v62 = vld [vmem:[#allocation2 + $0x18] sm:$0xf] }
 0x1a2   : > { %5417 = vmatprep.mubr.bf16.mxu0 %v4771_v10  ;;  %v2530_v23 = vsel %vm6034_vm3, %v2525_v58, %v2529_v19  ;;  %5427 = vmatprep.subr.bf16.mxu0 %v5845_v9  ;;  %v4782_v56 = vcombine.low %v6511_v11, %v6517_v26  ;;  %v4783_v59 = vcombine.low %v6535_v31, %v6557_v12  ;;  %v3259_v1 = vshll.u32 %v3203_v57, 16  ;;  %v3205_v6 = vld [vmem:[#allocation2 + $0x28] sm:$0xf]  ;;  %v3211_v20 = vld [vmem:[#allocation2 + $0x40] sm:$0xf] }
 0x1a3   : > { %v4772_v25 = vcombine.low %v2516_v13, %v2530_v23  ;;  %5480 = vmatpush3.bf16.msra.mxu1 %v5846_v0  ;;  %v3220_v40 = vor.u32 %v3219_v2, %v3216_v17  ;;  %v3235_v8 = vrot.slane %v3234_v14, 4  ;;  %v3239_v50 = vrot.slane %v3237_v41, 5  ;;  %v5864_v31 = vld [vmem:[%s6938_s4 + $0x128] sm:$0xff]   ;;  %v3209_v30 = vld [vmem:[#allocation2 + $0x38] sm:$0xf] }
 0x1a4   : > { %5481 = vmatprep.subr.bf16.mxu1 %v5848_v21  ;;  %v3225_v47 = vrot.slane %v3223_v44, 5  ;;  %v3256_v0 = vshrl.u32 %v3203_v57, 16  ;;  %v3284_v11 = vshrl.u32 %v3207_v60, 16  ;;  %v3287_v26 = vshll.u32 %v3207_v60, 16  ;;  %v6678_v18 = vld [vmem:[#allocation2 + $0x1c] sm:$0x1] }
 0x1a5   : > { %5418 = vmatmul.mubr.bf16.gmra.mrb[20].mxu0 %v4772_v25  ;;  %v3221_v63 = vrot.slane %v3220_v40, 4  ;;  %v3240_v53 = vsel %vm6034_vm3, %v3235_v8, %v3239_v50  ;;  %v3242_v7 = vshrl.u32 %v3201_v62, 16  ;;  %v3270_v12 = vshrl.u32 %v3205_v6, 16  ;;  %v6674_v25 = vld [vmem:[#allocation2 + $0x24] sm:$0x1]  ;;  %v5866_v2 = vld [vmem:[%s6938_s4 + $0x138] sm:$0xff]  }
 0x1a6   : > { %5437 = vmatprep.mubr.bf16.mxu0 %v4781_v33  ;;  %5428 = vmatpush3.bf16.msra.mxu0 %v5845_v9  ;;  %v3245_v9 = vshll.u32 %v3201_v62, 16  ;;  %v3273_v46 = vshll.u32 %v3205_v6, 16  ;;  %v3258_v45 = vrot.slane %v3256_v0, 4  ;;  %v3261_v10 = vrot.slane %v3259_v1, 5  ;;  %v6681_v49 = vld [vmem:[#allocation2 + $0x2c] sm:$0x1] }
 0x1a7   : > { %5429 = vmatprep.subr.bf16.mxu0 %v5847_v28  ;;  %5482 = vmatpush3.bf16.msra.mxu1 %v5848_v21  ;;  %v3226_v54 = vsel %vm6034_vm3, %v3221_v63, %v3225_v47  ;;  %v4784_v13 = vcombine.low %v6573_v35, %v6583_v3  ;;  %v3286_v58 = vrot.slane %v3284_v11, 4  ;;  %v3289_v19 = vrot.slane %v3287_v26, 5  ;;  %v5865_v21 = vld [vmem:[%s6938_s4 + $0x130] sm:$0xff]   ;;  %v5867_v50 = vld [vmem:[%s6938_s4 + $0x140] sm:$0xff]   ;;  %v5868_v11 = vld [vmem:[%s6938_s4 + $0x148] sm:$0xff]  }
 0x1a8   : > { %5483 = vmatprep.subr.bf16.mxu1 %v5850_v34  ;;  %v4873_v55 = vcombine.low %v3226_v54, %v3240_v53  ;;  %v3244_v23 = vrot.slane %v3242_v7, 4  ;;  %v3247_v24 = vrot.slane %v3245_v9, 5  ;;  %v3275_v29 = vrot.slane %v3273_v46, 5  ;;  %v3480_v0 = vld [vmem:[#allocation2 + $0x10] sm:$0xe] }
 0x1a9   : > { %v3262_v33 = vor.u32 %v3261_v10, %v3258_v45  ;;  %v3312_v35 = vshrl.u32 %v3211_v20, 16  ;;  %v3315_v3 = vshll.u32 %v3211_v20, 16  ;;  %v3290_v37 = vor.u32 %v3289_v19, %v3286_v58 }
 0x1aa   : > { %5430 = vmatpush3.bf16.msra.mxu0 %v5847_v28  ;;  %v3272_v28 = vrot.slane %v3270_v12, 4  ;;  %v3265_v27 = vshll.u32 %v6674_v25, 16  ;;  %v3301_v17 = vshll.u32 %v3209_v30, 16  ;;  %v4886_v12 = vrot.slane %v3480_v0, 9 }
 0x1ab   : > { %5431 = vmatprep.subr.bf16.mxu0 %v5849_v51  ;;  %5484 = vmatpush3.bf16.msra.mxu1 %v5850_v34  ;;  %v6676_v34 = vld [vmem:[#allocation2 + $0x34] sm:$0x1]  ;;  %v3314_v40 = vrot.slane %v3312_v35, 4  ;;  %v3317_v41 = vrot.slane %v3315_v3, 5  ;;  %v3509_v46 = vrot.slane %v6634_v15, 5  ;;  %v3505_v19 = vrot.slane %v6639_v36, 5 }
 0x1ac   : > { %5493 = vmatprep.subr.bf16.mxu1 %v5853_v48  ;;  %v3293_v14 = vshll.u32 %v6676_v34, 16  ;;  %v3267_v8 = vrot.slane %v3265_v27, 5  ;;  %v3303_v63 = vrot.slane %v3301_v17, 5  ;;  %v5870_v36 = vld [vmem:[%s6938_s4 + $0x158] sm:$0xff]   ;;  %v5871_v35 = vld [vmem:[%s6938_s4 + $0x160] sm:$0xff]   ;;  %v5873_v27 = vld [vmem:[%s6938_s4 + $0x170] sm:$0xff]  }
 0x1ad   : > { %v3482_v17 = vld [vmem:[#allocation2 + $0x20] sm:$0xe] }
 0x1ae   : > { %5432 = vmatpush3.bf16.msra.mxu0 %v5849_v51  ;;  %5486 = vmatmul.mubr.bf16.vlgmr.msra.gmra.mrb[0].mxu1 %v5852_v5  ;;  %v3248_v51 = vor.u32 %v3247_v24, %v3244_v23  ;;  %v3251_v5 = vshll.u32 %v6678_v18, 16  ;;  %v3295_v53 = vrot.slane %v3293_v14, 5  ;;  %v3510_v23 = vsel %vm6464_vm12, %v4886_v12, %v3509_v46  ;;  %v5882_v12 = vld [vmem:[%s6938_s4 + $0x1b0] sm:$0xff]   ;;  %v3862_v46 = vld [vmem:[#allocation2 + $0x18] sm:$0xf] }
 0x1af   : > { %5433 = vmatprep.subr.bf16.mxu0 %v5851_v4  ;;  %5489 = vmatprep.mubr.bf16.mxu1 %v5854_v42  ;;  %v3279_v42 = vshll.u32 %v6681_v49, 16 }
 0x1b0   : > { %5494 = vmatpush3.bf16.msra.mxu1 %v5853_v48  ;;  %v3298_v48 = vshrl.u32 %v3209_v30, 16  ;;  %v3249_v44 = vrot.slane %v3248_v51, 4  ;;  %v3253_v54 = vrot.slane %v3251_v5, 5  ;;  %v6725_v30 = vpop.f32.mrb[8].mxu0  ;;  %v5872_v51 = vld [vmem:[%s6938_s4 + $0x168] sm:$0xff]   ;;  %v5874_v5 = vld [vmem:[%s6938_s4 + $0x178] sm:$0xff]  }
 0x1b1   : > { %5495 = vmatprep.subr.bf16.mxu1 %v5856_v39 }
 0x1b2   : > { %5434 = vmatpush3.bf16.msra.mxu0 %v5851_v4  ;;  %v3276_v4 = vor.u32 %v3275_v29, %v3272_v28  ;;  %v3254_v60 = vsel %vm6034_vm3, %v3249_v44, %v3253_v54 }
 0x1b3   : > { %5435 = vmatprep.subr.bf16.mxu0 %v5855_v43 }
 0x1b4   : > { %5496 = vmatpush3.bf16.msra.mxu1 %v5856_v39  ;;  %v3263_v39 = vrot.slane %v3262_v33, 4  ;;  %v3277_v47 = vrot.slane %v3276_v4, 4  ;;  %v6727_v33 = vpop.f32.mrb[9].mxu0  ;;  %v3484_v4 = vld [vmem:[#allocation2 + $0x30] sm:$0xe] }
 0x1b5   : > { %5497 = vmatprep.subr.bf16.mxu1 %v5860_v16  ;;  %v6732_v3 = vpop.f32.mrb[10].mxu0  ;;  %v4890_v44 = vrot.slane %v3484_v4, 9  ;;  %v5886_v4 = vld [vmem:[#allocation2 + $0x30] ss:$8 sps:$4 sm:$0xff]  }
 0x1b6   : > { %5436 = vmatpush3.bf16.msra.mxu0 %v5855_v43  ;;  %5490 = vmatmul.mubr.bf16.gmra.mrb[4].mxu1 %v5859_v32  ;;  %v3291_v43 = vrot.slane %v3290_v37, 4  ;;  %v6692_v32 = vld [vmem:[#allocation2 + $0x44] sm:$0x1]  ;;  %v6734_v37 = vpop.f32.mrb[11].mxu0 }
 0x1b7   : > { %5509 = vmatprep.mubr.bf16.mxu1 %v4873_v55  ;;  %v3318_v55 = vor.u32 %v3317_v41, %v3314_v40  ;;  %v3321_v62 = vshll.u32 %v6692_v32, 16  ;;  %v4888_v41 = vrot.slane %v3482_v17, 9 }
 0x1b8   : > { %5498 = vmatpush3.bf16.msra.mxu1 %v5860_v16  ;;  %v3300_v16 = vrot.slane %v3298_v48, 4  ;;  %v3296_v57 = vsel %vm6034_vm3, %v3291_v43, %v3295_v53  ;;  %v6742_v48 = vpop.f32.mrb[12].mxu0  ;;  %v3483_v43 = vld [vmem:[#allocation2 + $0x28] sm:$0xe]  ;;  %v3521_v53 = vrot.slane %v6681_v49, 5 }
 0x1b9   : > { %5438 = vmatmul.mubr.bf16.vlgmr.msra.gmra.mrb[16].mxu0 %v4782_v56  ;;  %5499 = vmatprep.subr.bf16.mxu1 %v5861_v38  ;;  %v3281_v56 = vrot.slane %v3279_v42, 5  ;;  %v3319_v9 = vrot.slane %v3318_v55, 4  ;;  %v3323_v10 = vrot.slane %v3321_v62, 5  ;;  %v3517_v42 = vrot.slane %v6674_v25, 5  ;;  %v5876_v49 = vld [vmem:[%s6938_s4 + $0x188] sm:$0xff]  }
 0x1ba   : > { %5441 = vmatprep.mubr.bf16.mxu0 %v4783_v59  ;;  %v6698_v59 = vld [vmem:[#allocation2 + $0x3c] sm:$0x1] }
 0x1bb   : > { %v3282_v6 = vsel %vm6034_vm3, %v3277_v47, %v3281_v56  ;;  %v3307_v7 = vshll.u32 %v6698_v59, 16  ;;  %v4889_v47 = vrot.slane %v3483_v43, 9  ;;  %v3518_v54 = vsel %vm6464_vm12, %v4888_v41, %v3517_v42  ;;  %v3485_v56 = vld [vmem:[#allocation2 + $0x38] sm:$0xe]  ;;  %v5889_v41 = vld [vmem:[%s6938_s4 + $0x1d0] sm:$0xff]  }
 0x1bc   : > { %5500 = vmatpush3.bf16.msra.mxu1 %v5861_v38  ;;  %v3268_v38 = vsel %vm6034_vm3, %v3263_v39, %v3267_v8  ;;  %v4875_v26 = vcombine.low %v3282_v6, %v3296_v57  ;;  %v3481_v39 = vld [vmem:[#allocation2 + $0x18] sm:$0xe]  ;;  %v3525_v8 = vrot.slane %v6676_v34, 5  ;;  %v4891_v62 = vrot.slane %v3485_v56, 9 }
 0x1bd   : > { %5501 = vmatprep.subr.bf16.mxu1 %v5863_v61  ;;  %v4874_v1 = vcombine.low %v3254_v60, %v3268_v38  ;;  %v3309_v20 = vrot.slane %v3307_v7, 5  ;;  %v3486_v38 = vld [vmem:[#allocation2 + $0x40] sm:$0xe]  ;;  %v3522_v55 = vsel %vm6464_vm12, %v4889_v47, %v3521_v53  ;;  %v3529_v0 = vrot.slane %v6698_v59, 5  ;;  %v5878_v7 = vld [vmem:[#allocation2 + $0x10] ss:$8 sps:$4 sm:$0xff]  }
 0x1be   : > { %v3526_v25 = vsel %vm6464_vm12, %v4890_v44, %v3525_v8  ;;  %v4892_v60 = vrot.slane %v3486_v38, 9  ;;  %v5880_v59 = vld [vmem:[%s6938_s4 + $0x1a0] sm:$0xff]   ;;  %v3866_v53 = vld [vmem:[#allocation2 + $0x28] sm:$0xf] }
 0x1bf   : > { %v4911_v57 = vcombine.low %v3522_v55, %v3526_v25  ;;  %v5891_v25 = vld [vmem:[%s6938_s4 + $0x1e0] sm:$0xff]   ;;  %v3870_v55 = vld [vmem:[#allocation2 + $0x38] sm:$0xf] }
 0x1c0   : > { %5502 = vmatpush3.bf16.msra.mxu1 %v5863_v61  ;;  %v3304_v61 = vor.u32 %v3303_v63, %v3300_v16  ;;  %v4887_v16 = vrot.slane %v3481_v39, 9  ;;  %v3513_v63 = vrot.slane %v6678_v18, 5  ;;  %v3864_v38 = vld [vmem:[#allocation2 + $0x20] sm:$0xf] }
 0x1c1   : > { %5442 = vmatmul.mubr.bf16.gmra.mrb[20].mxu0 %v4784_v13  ;;  %5503 = vmatprep.subr.bf16.mxu1 %v5864_v31  ;;  %v5869_v13 = vld [vmem:[%s6938_s4 + $0x150] sm:$0xff]  }
 0x1c2   : > { %v3305_v45 = vrot.slane %v3304_v61, 4  ;;  %v3514_v34 = vsel %vm6464_vm12, %v4887_v16, %v3513_v63  ;;  %v3533_v61 = vrot.slane %v6692_v32, 5  ;;  %v5879_v32 = vld [vmem:[%s6938_s4 + $0x198] sm:$0xff]   ;;  %v5888_v16 = vld [vmem:[#allocation2 + $0x40] ss:$8 sps:$4 sm:$0xff]  }
 0x1c3   : > { %v4910_v18 = vcombine.low %v3514_v34, %v3518_v54  ;;  %v3868_v54 = vld [vmem:[#allocation2 + $0x30] sm:$0xf]  ;;  %v3919_v34 = vshrl.u32 %v3866_v53, 16 }
 0x1c4   : > { %5504 = vmatpush3.bf16.msra.mxu1 %v5864_v31  ;;  %v3479_v31 = vld [vmem:[#allocation2 + $0x8] sm:$0xe]  ;;  %v3310_v15 = vsel %vm6034_vm3, %v3305_v45, %v3309_v20  ;;  %v3534_v6 = vsel %vm6464_vm12, %v4892_v60, %v3533_v61  ;;  %v3936_v56 = vshll.u32 %v3868_v54, 16  ;;  %v3908_v60 = vshll.u32 %v3864_v38, 16 }
 0x1c5   : > { %5505 = vmatprep.subr.bf16.mxu1 %v5865_v21  ;;  %v4885_v58 = vrot.slane %v3479_v31, 9  ;;  %v3860_v31 = vld [vmem:[#allocation2 + $0x10] sm:$0xf]  ;;  %v5892_v61 = vld [vmem:[%s6938_s4 + $0x1e8] sm:$0xff]  }
 0x1c6   : > { %v3877_v45 = vshrl.u32 %v3860_v31, 16 }
 0x1c7   : > { %v3506_v28 = vsel %vm6464_vm12, %v4885_v58, %v3505_v19  ;;  %v3891_v58 = vshrl.u32 %v3862_v46, 16  ;;  %v3894_v19 = vshll.u32 %v3862_v46, 16  ;;  %v6826_v46 = vld [vmem:[#allocation2 + $0x2c] sm:$0x1] }
 0x1c8   : > { %5506 = vmatpush3.bf16.msra.mxu1 %v5865_v21  ;;  %v3324_v21 = vsel %vm6034_vm3, %v3319_v9, %v3323_v10  ;;  %v4909_v29 = vcombine.low %v3506_v28, %v3510_v23  ;;  %v5881_v9 = vld [vmem:[%s6938_s4 + $0x1a8] sm:$0xff]   ;;  %v3880_v10 = vshll.u32 %v3860_v31, 16  ;;  %v3879_v20 = vrot.slane %v3877_v45, 4  ;;  %v5885_v23 = vld [vmem:[%s6938_s4 + $0x1c0] sm:$0xff]   ;;  %v6798_v28 = vld [vmem:[#allocation2 + $0x14] sm:$0x1] }
 0x1c9   : > { %5507 = vmatprep.subr.bf16.mxu1 %v5866_v2  ;;  %v4876_v24 = vcombine.low %v3310_v15, %v3324_v21  ;;  %v3893_v15 = vrot.slane %v3891_v58, 4 }
 0x1ca   : > { %v3882_v21 = vrot.slane %v3880_v10, 5 }
 0x1cc   : > { %5508 = vmatpush3.bf16.msra.mxu1 %v5866_v2  ;;  %v6744_v2 = vpop.f32.mrb[13].mxu0 }
 0x1cd   : > { %5517 = vmatprep.subr.bf16.mxu1 %v5867_v50  ;;  %v6746_v14 = vpop.f32.mrb[14].mxu0 }
 0x1ce   : > { %v6751_v40 = vpop.f32.mrb[15].mxu0 }
 0x1cf   : > { %5510 = vmatmul.mubr.bf16.vlgmr.msra.gmra.mrb[0].mxu1 %v4874_v1  ;;  %v5877_v1 = vld [vmem:[%s6938_s4 + $0x190] sm:$0xff]  }
 0x1d0   : > { %5513 = vmatprep.mubr.bf16.mxu1 %v4875_v26  ;;  %5518 = vmatpush3.bf16.msra.mxu1 %v5867_v50  ;;  %v5875_v50 = vld [vmem:[%s6938_s4 + $0x180] sm:$0xff]  }
 0x1d1   : > { %5519 = vmatprep.subr.bf16.mxu1 %v5868_v11 }
 0x1d4   : > { %5520 = vmatpush3.bf16.msra.mxu1 %v5868_v11  ;;  %v3530_v11 = vsel %vm6464_vm12, %v4891_v62, %v3529_v0  ;;  %v3947_v62 = vshrl.u32 %v3870_v55, 16  ;;  %v3950_v0 = vshll.u32 %v3870_v55, 16 }
 0x1d5   : > { %5521 = vmatprep.subr.bf16.mxu1 %v5869_v13  ;;  %v4912_v26 = vcombine.low %v3530_v11, %v3534_v6  ;;  %v3921_v6 = vrot.slane %v3919_v34, 4 }
 0x1d6   : > { %v3949_v45 = vrot.slane %v3947_v62, 4  ;;  %v3952_v10 = vrot.slane %v3950_v0, 5  ;;  %v4142_v62 = vld [vmem:[#allocation2 + $0x10] sm:$0xe] }
 0x1d7   : > { %5514 = vmatmul.mubr.bf16.gmra.mrb[4].mxu1 %v4876_v24  ;;  %v3896_v24 = vrot.slane %v3894_v19, 5  ;;  %v6828_v19 = vld [vmem:[#allocation2 + $0x34] sm:$0x1] }
 0x1d8   : > { %5522 = vmatpush3.bf16.msra.mxu1 %v5869_v13  ;;  %5533 = vmatprep.mubr.bf16.mxu1 %v4909_v29  ;;  %v5883_v13 = vld [vmem:[%s6938_s4 + $0x1b8] sm:$0xff]  }
 0x1d9   : > { %5523 = vmatprep.subr.bf16.mxu1 %v5870_v36  ;;  %v6800_v29 = vld [vmem:[#allocation2 + $0x1c] sm:$0x1]  ;;  %v3897_v17 = vor.u32 %v3896_v24, %v3893_v15 }
 0x1da   : > { %v3900_v39 = vshll.u32 %v6800_v29, 16 }
 0x1db   : > { %v3898_v43 = vrot.slane %v3897_v17, 4  ;;  %v3953_v17 = vor.u32 %v3952_v10, %v3949_v45  ;;  %v5897_v45 = vld [vmem:[%s6938_s4 + $0x210] sm:$0xff]  }
 0x1dc   : > { %5524 = vmatpush3.bf16.msra.mxu1 %v5870_v36  ;;  %v3883_v36 = vor.u32 %v3882_v21, %v3879_v20  ;;  %v3902_v8 = vrot.slane %v3900_v39, 5 }
 0x1dd   : > { %5525 = vmatprep.subr.bf16.mxu1 %v5871_v35 }
 0x1de   : > { %v3903_v63 = vsel %vm6034_vm3, %v3898_v43, %v3902_v8 }
 0x1e0   : > { %5526 = vmatpush3.bf16.msra.mxu1 %v5871_v35  ;;  %v5884_v35 = vld [vmem:[#allocation2 + $0x20] ss:$8 sps:$4 sm:$0xff]  }
 0x1e1   : > { %5527 = vmatprep.subr.bf16.mxu1 %v5872_v51 }
 0x1e4   : > { %5528 = vmatpush3.bf16.msra.mxu1 %v5872_v51  ;;  %v5887_v51 = vld [vmem:[%s6938_s4 + $0x1c8] sm:$0xff]  }
 0x1e5   : > { %5529 = vmatprep.subr.bf16.mxu1 %v5873_v27 }
 0x1e8   : > { %5530 = vmatpush3.bf16.msra.mxu1 %v5873_v27  ;;  %v3886_v27 = vshll.u32 %v6798_v28, 16 }
 0x1e9   : > { %5531 = vmatprep.subr.bf16.mxu1 %v5874_v5 }
 0x1ea   : > { %v3888_v42 = vrot.slane %v3886_v27, 5  ;;  %v3942_v27 = vshll.u32 %v6828_v19, 16 }
 0x1ec   : > { %5532 = vmatpush3.bf16.msra.mxu1 %v5874_v5  ;;  %v3884_v5 = vrot.slane %v3883_v36, 4  ;;  %v3928_v36 = vshll.u32 %v6826_v46, 16 }
 0x1ed   : > { %5541 = vmatprep.subr.bf16.mxu1 %v5875_v50 }
 0x1ee   : > { %v3889_v44 = vsel %vm6034_vm3, %v3884_v5, %v3888_v42 }
 0x1ef   : > { %5534 = vmatmul.mubr.bf16.vlgmr.msra.gmra.mrb[0].mxu1 %v4910_v18  ;;  %v4965_v47 = vcombine.low %v3889_v44, %v3903_v63  ;;  %v3922_v18 = vshll.u32 %v3866_v53, 16  ;;  %v3930_v63 = vrot.slane %v3928_v36, 5  ;;  %v3944_v53 = vrot.slane %v3942_v27, 5  ;;  %v5900_v36 = vld [vmem:[%s6938_s4 + $0x228] sm:$0xff]  }
 0x1f0   : > { %5537 = vmatprep.mubr.bf16.mxu1 %v4911_v57  ;;  %5542 = vmatpush3.bf16.msra.mxu1 %v5875_v50  ;;  %v5890_v50 = vld [vmem:[%s6938_s4 + $0x1d8] sm:$0xff]   ;;  %v3905_v57 = vshrl.u32 %v3864_v38, 16  ;;  %v4145_v27 = vld [vmem:[#allocation2 + $0x28] sm:$0xe] }
 0x1f1   : > { %5543 = vmatprep.subr.bf16.mxu1 %v5876_v49  ;;  %v3924_v11 = vrot.slane %v3922_v18, 5 }
 0x1f3   : > { %v3925_v58 = vor.u32 %v3924_v11, %v3921_v6  ;;  %v5896_v6 = vld [vmem:[%s6938_s4 + $0x208] sm:$0xff]  }
 0x1f4   : > { %5544 = vmatpush3.bf16.msra.mxu1 %v5876_v49  ;;  %v3933_v49 = vshrl.u32 %v3868_v54, 16  ;;  %v3954_v54 = vrot.slane %v3953_v17, 4  ;;  %v4146_v17 = vld [vmem:[#allocation2 + $0x30] sm:$0xe] }
 0x1f5   : > { %5545 = vmatprep.subr.bf16.mxu1 %v5877_v1 }
 0x1f7   : > { %5538 = vmatmul.mubr.bf16.gmra.mrb[4].mxu1 %v4912_v26  ;;  %v3935_v26 = vrot.slane %v3933_v49, 4 }
 0x1f8   : > { %5546 = vmatpush3.bf16.msra.mxu1 %v5877_v1  ;;  %5557 = vmatprep.mubr.bf16.mxu1 %v5878_v7  ;;  %v3874_v1 = vld [vmem:[#allocation2 + $0x48] sm:$0xf]  ;;  %v3872_v7 = vld [vmem:[#allocation2 + $0x40] sm:$0xf] }
 0x1f9   : > { %5547 = vmatprep.subr.bf16.mxu1 %v5879_v32  ;;  %v3975_v31 = vshrl.u32 %v3874_v1, 16  ;;  %v3961_v20 = vshrl.u32 %v3872_v7, 16  ;;  %v3964_v21 = vshll.u32 %v3872_v7, 16 }
 0x1fb   : > { %v3963_v42 = vrot.slane %v3961_v20, 4  ;;  %v3966_v43 = vrot.slane %v3964_v21, 5 }
 0x1fc   : > { %5548 = vmatpush3.bf16.msra.mxu1 %v5879_v32  ;;  %v3938_v32 = vrot.slane %v3936_v56, 5 }
 0x1fd   : > { %5549 = vmatprep.subr.bf16.mxu1 %v5880_v59  ;;  %v3967_v55 = vor.u32 %v3966_v43, %v3963_v42  ;;  %v4147_v42 = vld [vmem:[#allocation2 + $0x38] sm:$0xe]  ;;  %v4981_v43 = vrot.slane %v4146_v17, 9 }
 0x1fe   : > { %v3939_v15 = vor.u32 %v3938_v32, %v3935_v26 }
 0x1ff   : > { %v3968_v26 = vrot.slane %v3967_v55, 4 }
 0x200   : > { %5550 = vmatpush3.bf16.msra.mxu1 %v5880_v59  ;;  %v3907_v59 = vrot.slane %v3905_v57, 4  ;;  %v3940_v44 = vrot.slane %v3939_v15, 4 }
 0x201   : > { %5551 = vmatprep.subr.bf16.mxu1 %v5881_v9 }
 0x202   : > { %v3945_v56 = vsel %vm6034_vm3, %v3940_v44, %v3944_v53  ;;  %v4184_v44 = vrot.slane %v6828_v19, 5 }
 0x204   : > { %5552 = vmatpush3.bf16.msra.mxu1 %v5881_v9  ;;  %v3910_v9 = vrot.slane %v3908_v60, 5 }
 0x205   : > { %5553 = vmatprep.subr.bf16.mxu1 %v5882_v12 }
 0x206   : > { %v3911_v24 = vor.u32 %v3910_v9, %v3907_v59  ;;  %v4143_v59 = vld [vmem:[#allocation2 + $0x18] sm:$0xe]  ;;  %v4977_v9 = vrot.slane %v4142_v62, 9 }
 0x207   : > { %v4978_v10 = vrot.slane %v4143_v59, 9 }
 0x208   : > { %5554 = vmatpush3.bf16.msra.mxu1 %v5882_v12  ;;  %v5893_v12 = vld [vmem:[%s6938_s4 + $0x1f0] sm:$0xff]  }
 0x209   : > { %5555 = vmatprep.subr.bf16.mxu1 %v5883_v13 }
 0x20c   : > { %5556 = vmatpush3.bf16.msra.mxu1 %v5883_v13  ;;  %v3978_v13 = vshll.u32 %v3874_v1, 16 }
 0x20d   : > { %5565 = vmatprep.subr.bf16.mxu1 %v5885_v23 }
 0x20e   : > { %v3980_v5 = vrot.slane %v3978_v13, 5  ;;  %v4172_v13 = vrot.slane %v6800_v29, 5 }
 0x20f   : > { %5558 = vmatmul.mubr.bf16.vlgmr.msra.gmra.mrb[0].mxu1 %v5884_v35  ;;  %v6833_v35 = vld [vmem:[#allocation2 + $0x3c] sm:$0x1] }
 0x210   : > { %5561 = vmatprep.mubr.bf16.mxu1 %v5886_v4  ;;  %5566 = vmatpush3.bf16.msra.mxu1 %v5885_v23  ;;  %v6830_v23 = vld [vmem:[#allocation2 + $0x24] sm:$0x1]  ;;  %v3977_v4 = vrot.slane %v3975_v31, 4  ;;  %v3956_v8 = vshll.u32 %v6833_v35, 16  ;;  %v4168_v31 = vrot.slane %v6798_v28, 5  ;;  %v4173_v15 = vsel %vm6464_vm12, %v4978_v10, %v4172_v13 }
 0x211   : > { %5567 = vmatprep.subr.bf16.mxu1 %v5887_v51  ;;  %v3914_v39 = vshll.u32 %v6830_v23, 16  ;;  %v5014_v10 = vld [vmem:[%s6940_s6] ss:$0 sm:$0xff] }
 0x212   : > { %v3981_v38 = vor.u32 %v3980_v5, %v3977_v4  ;;  %v3958_v57 = vrot.slane %v3956_v8, 5  ;;  %v4169_v28 = vsel %vm6464_vm12, %v4977_v9, %v4168_v31  ;;  %v5902_v4 = vld [vmem:[%s6938_s4 + $0x238] sm:$0xff]   ;;  %v4144_v5 = vld [vmem:[#allocation2 + $0x20] sm:$0xe] }
 0x213   : > { %v3916_v34 = vrot.slane %v3914_v39, 5  ;;  %v5001_v29 = vcombine.low %v4169_v28, %v4173_v15  ;;  %v4980_v39 = vrot.slane %v4145_v27, 9  ;;  %v4979_v8 = vrot.slane %v4144_v5, 9 }
 0x214   : > { %5568 = vmatpush3.bf16.msra.mxu1 %v5887_v51  ;;  %v5894_v51 = vld [vmem:[%s6938_s4 + $0x1f8] sm:$0xff]   ;;  %v3959_v1 = vsel %vm6034_vm3, %v3954_v54, %v3958_v57  ;;  %v3982_v32 = vrot.slane %v3981_v38, 4  ;;  %v4149_v54 = vld [vmem:[#allocation2 + $0x48] sm:$0xe]  ;;  %v4185_v38 = vsel %vm6464_vm12, %v4981_v43, %v4184_v44 }
 0x215   : > { %5569 = vmatprep.subr.bf16.mxu1 %v5889_v41  ;;  %v4967_v11 = vcombine.low %v3945_v56, %v3959_v1 }
 0x217   : > { %5562 = vmatmul.mubr.bf16.gmra.mrb[4].mxu1 %v5888_v16  ;;  %v3912_v16 = vrot.slane %v3911_v24, 4  ;;  %v5898_v24 = vld [vmem:[%s6938_s4 + $0x218] sm:$0xff]  }
 0x218   : > { %5570 = vmatpush3.bf16.msra.mxu1 %v5889_v41  ;;  %5581 = vmatprep.mubr.bf16.mxu1 %v4965_v47  ;;  %v3926_v41 = vrot.slane %v3925_v58, 4  ;;  %v5895_v47 = vld [vmem:[%s6938_s4 + $0x200] sm:$0xff]  }
 0x219   : > { %5571 = vmatprep.subr.bf16.mxu1 %v5890_v50  ;;  %v3917_v60 = vsel %vm6034_vm3, %v3912_v16, %v3916_v34  ;;  %v4176_v16 = vrot.slane %v6830_v23, 5 }
 0x21a   : > { %v3931_v18 = vsel %vm6034_vm3, %v3926_v41, %v3930_v63  ;;  %v4180_v41 = vrot.slane %v6826_v46, 5  ;;  %v4982_v63 = vrot.slane %v4147_v42, 9  ;;  %v4148_v46 = vld [vmem:[#allocation2 + $0x40] sm:$0xe] }
 0x21b   : > { %v4966_v0 = vcombine.low %v3917_v60, %v3931_v18  ;;  %v4177_v19 = vsel %vm6464_vm12, %v4979_v8, %v4176_v16  ;;  %v4984_v18 = vrot.slane %v4149_v54, 9 }
 0x21c   : > { %5572 = vmatpush3.bf16.msra.mxu1 %v5890_v50  ;;  %v6841_v50 = vld [vmem:[#allocation2 + $0x4c] sm:$0x1]  ;;  %v4181_v53 = vsel %vm6464_vm12, %v4980_v39, %v4180_v41 }
 0x21d   : > { %5573 = vmatprep.subr.bf16.mxu1 %v5891_v25  ;;  %v3984_v49 = vshll.u32 %v6841_v50, 16  ;;  %v5002_v34 = vcombine.low %v4177_v19, %v4181_v53  ;;  %v4196_v56 = vrot.slane %v6841_v50, 5  ;;  %v4751_v50 = vld [vmem:[%s6942_s8] ss:$0 sm:$0xff] }
 0x21e   : > { %v2366_v59 = vmul.f32 %v6725_v30, %v4751_v50  ;;  %v2365_v30 = vmul.f32 %v4751_v50, %v6734_v37  ;;  %v2370_v44 = vmul.f32 %v6742_v48, %v4751_v50  ;;  %v2368_v37 = vmul.f32 %v4751_v50, %v6744_v2 }
 0x21f   : > { %v3986_v7 = vrot.slane %v3984_v49, 5  ;;  %v4983_v49 = vrot.slane %v4148_v46, 9  ;;  %v4197_v60 = vsel %vm6464_vm12, %v4984_v18, %v4196_v56  ;;  %v2369_v53 = vmul.f32 %v4751_v50, %v6751_v40 }
 0x220   : > { %5574 = vmatpush3.bf16.msra.mxu1 %v5891_v25  ;;  %v6846_v25 = vld [vmem:[#allocation2 + $0x44] sm:$0x1] }
 0x221   : > { %5575 = vmatprep.subr.bf16.mxu1 %v5892_v61  ;;  %v3987_v20 = vsel %vm6034_vm3, %v3982_v32, %v3986_v7 }
 0x224   : > { %5576 = vmatpush3.bf16.msra.mxu1 %v5892_v61  ;;  %v3970_v61 = vshll.u32 %v6846_v25, 16 }
 0x225   : > { %5577 = vmatprep.subr.bf16.mxu1 %v5893_v12 }
 0x228   : > { %5578 = vmatpush3.bf16.msra.mxu1 %v5893_v12  ;;  %v3972_v12 = vrot.slane %v3970_v61, 5 }
 0x229   : > { %5579 = vmatprep.subr.bf16.mxu1 %v5894_v51 }
 0x22a   : > { %v3973_v58 = vsel %vm6034_vm3, %v3968_v26, %v3972_v12  ;;  %v4752_v12 = vld [vmem:[%s6943_s9] ss:$0 sm:$0xff] }
 0x22b   : > { %v4968_v21 = vcombine.low %v3973_v58, %v3987_v20  ;;  %v2367_v20 = vmul.f32 %v6732_v3, %v4751_v50  ;;  %v2380_v41 = vadd.f32 %v4752_v12, %v2365_v30  ;;  %v2385_v56 = vadd.f32 %v4752_v12, %v2370_v44 }
 0x22c   : > { %5580 = vmatpush3.bf16.msra.mxu1 %v5894_v51  ;;  %v5901_v51 = vld [vmem:[%s6938_s4 + $0x230] sm:$0xff]  }
 0x22d   : > { %5589 = vmatprep.subr.bf16.mxu1 %v5895_v47 }
 0x22f   : > { %5582 = vmatmul.mubr.bf16.vlgmr.msra.gmra.mrb[0].mxu1 %v4966_v0 }
 0x230   : > { %5585 = vmatprep.mubr.bf16.mxu1 %v4967_v11  ;;  %5590 = vmatpush3.bf16.msra.mxu1 %v5895_v47  ;;  %v4188_v47 = vrot.slane %v6833_v35, 5  ;;  %v4192_v35 = vrot.slane %v6846_v25, 5 }
 0x231   : > { %5591 = vmatprep.subr.bf16.mxu1 %v5896_v6 }
 0x232   : > { %v4189_v23 = vsel %vm6464_vm12, %v4982_v63, %v4188_v47  ;;  %v4193_v57 = vsel %vm6464_vm12, %v4983_v49, %v4192_v35  ;;  %v2371_v47 = vmul.f32 %v6746_v14, %v4751_v50 }
 0x233   : > { %v5003_v55 = vcombine.low %v4185_v38, %v4189_v23  ;;  %v5004_v61 = vcombine.low %v4193_v57, %v4197_v60  ;;  %v2383_v60 = vadd.f32 %v4752_v12, %v2368_v37 }
 0x234   : > { %5592 = vmatpush3.bf16.msra.mxu1 %v5896_v6 }
 0x235   : > { %5593 = vmatprep.subr.bf16.mxu1 %v5897_v45 }
 0x237   : > { %5586 = vmatmul.mubr.bf16.gmra.mrb[4].mxu1 %v4968_v21 }
 0x238   : > { %5594 = vmatpush3.bf16.msra.mxu1 %v5897_v45  ;;  %5605 = vmatprep.mubr.bf16.mxu1 %v5001_v29  ;;  %v2364_v45 = vmul.f32 %v4751_v50, %v6727_v33 }
 0x239   : > { %5595 = vmatprep.subr.bf16.mxu1 %v5898_v24 }
 0x23a   : > { %v2379_v33 = vadd.f32 %v4752_v12, %v2364_v45 }
 0x23c   : > { %5596 = vmatpush3.bf16.msra.mxu1 %v5898_v24 }
 0x23d   : > { %5597 = vmatprep.subr.bf16.mxu1 %v5899_v52 }
 0x240   : > { %5598 = vmatpush3.bf16.msra.mxu1 %v5899_v52  ;;  %v2381_v52 = vadd.f32 %v4752_v12, %v2366_v59 }
 0x241   : > { %5599 = vmatprep.subr.bf16.mxu1 %v5900_v36 }
 0x244   : > { %5600 = vmatpush3.bf16.msra.mxu1 %v5900_v36 }
 0x245   : > { %5601 = vmatprep.subr.bf16.mxu1 %v5901_v51 }
 0x248   : > { %5602 = vmatpush3.bf16.msra.mxu1 %v5901_v51 }
 0x249   : > { %5603 = vmatprep.subr.bf16.mxu1 %v5902_v4 }
 0x24c   : > { %5604 = vmatpush3.bf16.msra.mxu1 %v5902_v4  ;;  %v2382_v4 = vadd.f32 %v4752_v12, %v2367_v20 }
 0x24f   : > { %5606 = vmatmul.mubr.bf16.vlgmr.msra.gmra.mrb[0].mxu1 %v5002_v34 }
 0x250   : > { %5609 = vmatprep.mubr.bf16.mxu1 %v5003_v55 }
 0x257   : > { %5610 = vmatmul.mubr.bf16.gmra.mrb[4].mxu1 %v5004_v61 }
 0x28c   : > { %v5439_v62 = vpop.f32.mrb[16].mxu0 }
 0x28d   : > { %v2783_v0 = vpop.f32.mrb[17].mxu0 }
 0x28e   : > { %v5440_v1 = vpop.f32.mrb[18].mxu0 }
 0x28f   : > { %v2786_v6 = vpop.f32.mrb[19].mxu0 }
 0x294   : > { %v5443_v11 = vpop.f32.mrb[20].mxu0 }
 0x295   : > { %v2799_v26 = vpop.f32.mrb[21].mxu0 }
 0x296   : > { %v5444_v32 = vpop.f32.mrb[22].mxu0 }
 0x297   : > { %v2802_v25 = vpop.f32.mrb[23].mxu0 }
 0x322   : > { %v5607_v7 = vpop.f32.mrb[0].mxu1 }
 0x323   : > { %v5613_v9 = vadd.f32 %v5607_v7, %v5439_v62  ;;  %v4313_v31 = vpop.f32.mrb[1].mxu1 }
 0x324   : > { %v5614_v13 = vadd.f32 %v4313_v31, %v2783_v0  ;;  %v5608_v58 = vpop.f32.mrb[2].mxu1 }
 0x325   : > { %v4361_v28 = vmul.f32 %v5613_v9, %v5013_v22  ;;  %v5615_v21 = vadd.f32 %v5608_v58, %v5440_v1  ;;  %v4316_v15 = vpop.f32.mrb[3].mxu1  ;;  %v2386_v1 = vadd.f32 %v4752_v12, %v2371_v47 }
 0x326   : > { %v4359_v24 = vmul.f32 %v5614_v13, %v5013_v22  ;;  %v5616_v29 = vadd.f32 %v4316_v15, %v2786_v6 }
 0x327   : > { %v4376_v36 = vadd.f32 %v5014_v10, %v4361_v28  ;;  %v4362_v51 = vmul.f32 %v5615_v21, %v5013_v22 }
 0x328   : > { %v4374_v27 = vadd.f32 %v5014_v10, %v4359_v24  ;;  %v4360_v17 = vmul.f32 %v5616_v29, %v5013_v22 }
 0x329   : > { %v4384_v5 = vadd.f32 %v4376_v36, %v2381_v52  ;;  %v4377_v39 = vadd.f32 %v5014_v10, %v4362_v51 }
 0x32a   : > { %v4382_v42 = vadd.f32 %v4374_v27, %v2379_v33  ;;  %v4375_v3 = vadd.f32 %v5014_v10, %v4360_v17  ;;  %v5611_v43 = vpop.f32.mrb[4].mxu1 }
 0x32b   : > { %v4385_v8 = vadd.f32 %v4377_v39, %v2382_v4  ;;  %v5617_v16 = vadd.f32 %v5611_v43, %v5443_v11  ;;  %v4329_v63 = vpop.f32.mrb[5].mxu1  ;;  %v4392_v19 = vmax.f32 %v4384_v5, 0.0 }
 0x32c   : > { %v4383_v54 = vadd.f32 %v4375_v3, %v2380_v41  ;;  %v5618_v38 = vadd.f32 %v4329_v63, %v2799_v26  ;;  %v5612_v46 = vpop.f32.mrb[6].mxu1  ;;  %v4390_v49 = vmax.f32 %v4382_v42, 0.0  ;;  %v2384_v26 = vadd.f32 %v4752_v12, %v2369_v53 }
 0x32d   : > { %v4393_v34 = vmax.f32 %v4385_v8, 0.0  ;;  %v4365_v23 = vmul.f32 %v5617_v16, %v5013_v22  ;;  %v5619_v18 = vadd.f32 %v5612_v46, %v5444_v32  ;;  %v4332_v55 = vpop.f32.mrb[7].mxu1 }
 0x32e   : > { %v4391_v48 = vmax.f32 %v4383_v54, 0.0  ;;  %v4363_v2 = vmul.f32 %v5618_v38, %v5013_v22  ;;  %v5620_v35 = vadd.f32 %v4332_v55, %v2802_v25 }
 0x32f   : > { %v5034_v14 = vpack.c.bf16 %v4393_v34, %v4392_v19  ;;  %v4380_v57 = vadd.f32 %v5014_v10, %v4365_v23  ;;  %v4366_v40 = vmul.f32 %v5619_v18, %v5013_v22 }
 0x330   : > { %v5029_v61 = vpack.c.bf16 %v4391_v48, %v4390_v49  ;;  %v4378_v62 = vadd.f32 %v5014_v10, %v4363_v2  ;;  %v4364_v0 = vmul.f32 %v5620_v35, %v5013_v22 }
 0x331   : > { %5046 = vst [vmem:[%s359_s14 + $0x8] sm:$0xff] %v5034_v14   ;;  %v4388_v6 = vadd.f32 %v4380_v57, %v2385_v56  ;;  %v4381_v11 = vadd.f32 %v5014_v10, %v4366_v40 }
 0x332   : > { %5030 = vst [vmem:[%s359_s14] sm:$0xff] %v5029_v61   ;;  %v4386_v32 = vadd.f32 %v4378_v62, %v2383_v60  ;;  %v4379_v50 = vadd.f32 %v5014_v10, %v4364_v0 }
 0x333   : > { %v4389_v7 = vadd.f32 %v4381_v11, %v2386_v1  ;;  %v4396_v9 = vmax.f32 %v4388_v6, 0.0 }
 0x334   : > { %v4387_v59 = vadd.f32 %v4379_v50, %v2384_v26  ;;  %v4394_v31 = vmax.f32 %v4386_v32, 0.0 }
 0x335   : > { %v4397_v25 = vmax.f32 %v4389_v7, 0.0 }
 0x336   : > { %v4395_v45 = vmax.f32 %v4387_v59, 0.0 }
 0x337   : > { %v5044_v13 = vpack.c.bf16 %v4397_v25, %v4396_v9 }
 0x338   : > { %v5039_v58 = vpack.c.bf16 %v4395_v45, %v4394_v31 }
 0x339   : > { %5048 = vst [vmem:[%s359_s14 + $0x18] sm:$0xff] %v5044_v13  }
 0x33a   : > { %5047 = vst [vmem:[%s359_s14 + $0x10] sm:$0xff] %v5039_v58  }
 0x33b PF: > { %s20_s13 = sadd.s32 1, %s5909_s13  }
 0x33c   : > { %p17_p4 = scmp.ge.s32.totalorder %s20_s13, 4  }
 0x33e   :  { %19 = sbr.rel (!%p17_p4) target bundleno = 1 (0x1), region = 113 }

// kernel: fwd.3
= control target key start
LH: loop header
LB: loop body
LE: loop exit
PB: predicated region body
PF: predicated region fallthrough
CT: control target
= control target key end

     0   :  { %s6314_s24 = smov 0   ;;  %s7417_s0 = inlined_call_operand.vmem [shape: bf16[2,8,8,128], index: 0, kind: input, shape index: {}]   ;;  %s7418_s1 = inlined_call_operand.vmem [shape: bf16[3,3,128,128], index: 1, kind: input, shape index: {}]   ;;  %s7419_s2 = inlined_call_operand.vmem [shape: f32[1,128], index: 2, kind: input, shape index: {}]   ;;  %s7420_s3 = inlined_call_operand.vmem [shape: f32[1,128], index: 3, kind: input, shape index: {}]   ;;  %s7421_s4 = inlined_call_operand.vmem [shape: bf16[3,3,128,128], index: 4, kind: input, shape index: {}]   ;;  %s7422_s5 = inlined_call_operand.vmem [shape: f32[1,128], index: 5, kind: input, shape index: {}]   ;;  %s7423_s6 = inlined_call_operand.vmem [shape: f32[1,128], index: 6, kind: input, shape index: {}]   ;;  %s7424_s7 = inlined_call_operand.vmem [shape: bf16[2,8,8,128], index: 7, kind: output, shape index: {}]  }
   0x1 LB: > { %s4717_s25 = sadd.s32 4294967295, %s6271_s24   ;;  %p4721_p0 = scmp.ge.s32.totalorder %s6271_s24, 1  ;;  %s6271_s24 = sphi %s6314_s24, %s17_s24  }
   0x2   : > { %p237_p1 = scmp.lt.s32.totalorder %s6271_s24, 3 }
   0x4   : > { %p238_p2 = pnand %p4721_p0, %p237_p1 }
   0x5   : > { %v6097_v0 = vld [vmem:[%s7418_s1 + $0x40] sm:$0xff] (!%p238_p2)   ;;  %p269_p3 = scmp.lt.s32.totalorder (!%p238_p2), %s4717_s25, 1  ;;  %v6098_v1 = vld [vmem:[%s7418_s1 + $0x48] sm:$0xff] (!%p238_p2)   ;;  %v6273_v2 = vmov (!%p238_p2), 0   ;;  %v6099_v3 = vld [vmem:[%s7418_s1 + $0x50] sm:$0xff] (!%p238_p2)   ;;  %vm389_vm0 = vcmask (!%p238_p2), 1043456  }
   0x6   : > { %241 = sbr.rel (%p238_p2) target bundleno = 1052 (0x41c), region = 48  ;;  %5528 = vmatprep.subr.bf16.mxu0 (!%p238_p2), %v6097_v0  ;;  %280 = vst [vmem:[#allocation3] sm:$0xf] (!%p238_p2), %v6273_v2  ;;  %281 = vst [vmem:[#allocation3 + $0x4] sm:$0x1] (!%p238_p2), %v6273_v2  ;;  %v6100_v4 = vld [vmem:[%s7418_s1 + $0x58] sm:$0xff] (!%p238_p2)  }
   0x7   : > { %282 = vst [vmem:[#allocation3 + $0x8] sm:$0xf] (!%p238_p2), %v6273_v2  ;;  %283 = vst [vmem:[#allocation3 + $0xc] sm:$0x1] (!%p238_p2), %v6273_v2  ;;  %5529 = vmatpush3.bf16.msra.mxu0 (!%p238_p2), %v6097_v0  ;;  %vm390_vm1 = vsmask.f32 (!%p238_p2), 7938 }
   0x8   : > { %284 = vst [vmem:[#allocation3 + $0x10] sm:$0xf] (!%p238_p2), %v6273_v2  ;;  %285 = vst [vmem:[#allocation3 + $0x14] sm:$0x1] (!%p238_p2), %v6273_v2  ;;  %5530 = vmatprep.subr.bf16.mxu0 (!%p238_p2), %v6098_v1  ;;  %vm395_vm2 = vcmask (!%p238_p2), 1040384   ;;  %v6101_v10 = vld [vmem:[%s7418_s1 + $0x60] sm:$0xff] (!%p238_p2)  }
   0x9   : > { %286 = vst [vmem:[#allocation3 + $0x18] sm:$0xf] (!%p238_p2), %v6273_v2  ;;  %287 = vst [vmem:[#allocation3 + $0x1c] sm:$0x1] (!%p238_p2), %v6273_v2  ;;  %vm396_vm3 = vsmask.f32 (!%p238_p2), 256 }
   0xa   : > { %288 = vst [vmem:[#allocation3 + $0x20] sm:$0xf] (!%p238_p2), %v6273_v2  ;;  %289 = vst [vmem:[#allocation3 + $0x24] sm:$0x1] (!%p238_p2), %v6273_v2  ;;  %vm475_vm6 = vsmask.f32 (!%p238_p2), 3328 }
   0xb   : > { %290 = vst [vmem:[#allocation3 + $0x28] sm:$0xf] (!%p238_p2), %v6273_v2  ;;  %291 = vst [vmem:[#allocation3 + $0x2c] sm:$0x1] (!%p238_p2), %v6273_v2  ;;  %5531 = vmatpush3.bf16.msra.mxu0 (!%p238_p2), %v6098_v1  ;;  %vm476_vm7 = vsmask.f32 (!%p238_p2), 7440 }
   0xc   : > { %292 = vst [vmem:[#allocation3 + $0x30] sm:$0xf] (!%p238_p2), %v6273_v2  ;;  %293 = vst [vmem:[#allocation3 + $0x34] sm:$0x1] (!%p238_p2), %v6273_v2  ;;  %5532 = vmatprep.subr.bf16.mxu0 (!%p238_p2), %v6099_v3  ;;  %v6102_v21 = vld [vmem:[%s7418_s1 + $0x68] sm:$0xff] (!%p238_p2)   ;;  %v6103_v40 = vld [vmem:[%s7418_s1 + $0x70] sm:$0xff] (!%p238_p2)  }
   0xd   : > { %s7434_s25 = smov (!%p269_p3, %s4717_s25), 1  ;;  %294 = vst [vmem:[#allocation3 + $0x38] sm:$0xf] %v6273_v2  ;;  %295 = vst [vmem:[#allocation3 + $0x3c] sm:$0x1] %v6273_v2  ;;  %v6104_v57 = vld [vmem:[%s7418_s1 + $0x78] sm:$0xff]  }
   0xe   : > { %296 = vst [vmem:[#allocation3 + $0x40] sm:$0xf] %v6273_v2  ;;  %297 = vst [vmem:[#allocation3 + $0x44] sm:$0x1] %v6273_v2  ;;  %s5260_s9 = sshll.u32 %s7434_s25, 5  ;;  %vm897_vm9 = vcmask 1042432  }
   0xf   : > { %298 = vst [vmem:[#allocation3 + $0x48] sm:$0xf] %v6273_v2  ;;  %299 = vst [vmem:[#allocation3 + $0x4c] sm:$0x1] %v6273_v2  ;;  %s6339_s12 = scalar_lea.vmem %s7417_s0, %s5260_s9  ;;  %v392_v8 = vld [vmem:[#allocation3 + $0x8] sm:$0xf]  ;;  %5533 = vmatpush3.bf16.msra.mxu0 %v6099_v3  ;;  %s278_s20 = scalar_lea.vmem %s7424_s7, %s5260_s9 }
  0x10   : > { %2453 = vst [vmem:[#allocation2] sm:$0xf] %v6273_v2  ;;  %2454 = vst [vmem:[#allocation2 + $0x4] sm:$0x1] %v6273_v2  ;;  %v300_v5 = vld [vmem:[%s6339_s12] sm:$0xf]  ;;  %5534 = vmatprep.subr.bf16.mxu0 %v6100_v4 }
  0x11   : > { %2455 = vst [vmem:[#allocation2 + $0x8] sm:$0xf] %v6273_v2  ;;  %2456 = vst [vmem:[#allocation2 + $0xc] sm:$0x1] %v6273_v2  ;;  %v309_v6 = vshrl.u32 %v300_v5, 16  ;;  %v312_v7 = vshll.u32 %v300_v5, 16 }
  0x12   : > { %2457 = vst [vmem:[#allocation2 + $0x10] sm:$0xf] %v6273_v2  ;;  %2458 = vst [vmem:[#allocation2 + $0x14] sm:$0x1] %v6273_v2  ;;  %v6345_v9 = vld [vmem:[#allocation3] sm:$0xf] }
  0x13   : > { %2459 = vst [vmem:[#allocation2 + $0x18] sm:$0xf] %v6273_v2  ;;  %2460 = vst [vmem:[#allocation2 + $0x1c] sm:$0x1] %v6273_v2  ;;  %v311_v11 = vrot.slane %v309_v6, 7  ;;  %v479_v14 = vshrl.u32 %v6345_v9, 16  ;;  %5535 = vmatpush3.bf16.msra.mxu0 %v6100_v4 }
  0x14   : > { %2461 = vst [vmem:[#allocation2 + $0x20] sm:$0xf] %v6273_v2  ;;  %2462 = vst [vmem:[#allocation2 + $0x24] sm:$0x1] %v6273_v2  ;;  %v398_v13 = vld [vmem:[#allocation3 + $0xc] sm:$0x1]  ;;  %5536 = vmatprep.subr.bf16.mxu0 %v6101_v10 }
  0x15   : > { %2463 = vst [vmem:[#allocation2 + $0x28] sm:$0xf] %v6273_v2  ;;  %2464 = vst [vmem:[#allocation2 + $0x2c] sm:$0x1] %v6273_v2  ;;  %v482_v15 = vshll.u32 %v6345_v9, 16  ;;  %v314_v17 = vor.u32 %v312_v7, %v311_v11  ;;  %v315_v18 = vrot.slane %v311_v11, 4 }
  0x16   : > { %2465 = vst [vmem:[#allocation2 + $0x30] sm:$0xf] %v6273_v2  ;;  %2466 = vst [vmem:[#allocation2 + $0x34] sm:$0x1] %v6273_v2  ;;  %v6360_v19 = vld [vmem:[#allocation3 + $0x4] sm:$0x1] }
  0x17   : > { %2467 = vst [vmem:[#allocation2 + $0x38] sm:$0xf] %v6273_v2  ;;  %2468 = vst [vmem:[#allocation2 + $0x3c] sm:$0x1] %v6273_v2  ;;  %v301_v20 = vld [vmem:[%s6339_s12 + $0x4] sm:$0xf]  ;;  %5537 = vmatpush3.bf16.msra.mxu0 %v6101_v10 }
  0x18   : > { %2469 = vst [vmem:[#allocation2 + $0x40] sm:$0xf] %v6273_v2  ;;  %2470 = vst [vmem:[#allocation2 + $0x44] sm:$0x1] %v6273_v2  ;;  %v481_v22 = vrot.slane %v479_v14, 4  ;;  %v317_v24 = vshrl.u32 %v301_v20, 16  ;;  %5538 = vmatprep.subr.bf16.mxu0 %v6102_v21 }
  0x19   : > { %2471 = vst [vmem:[#allocation2 + $0x48] sm:$0xf] %v6273_v2  ;;  %2472 = vst [vmem:[#allocation2 + $0x4c] sm:$0x1] %v6273_v2  ;;  %v302_v23 = vld [vmem:[%s6339_s12 + $0x8] sm:$0xf] }
  0x1a   : > { %vm6350_vm4 = vmand %vm389_vm0, %vm390_vm1  ;;  %v320_v25 = vshll.u32 %v301_v20, 16  ;;  %v484_v28 = vrot.slane %v482_v15, 5  ;;  %v325_v29 = vshrl.u32 %v302_v23, 16  ;;  %v401_v30 = vld [vmem:[#allocation3 + $0x10] sm:$0xf]  ;;  %v319_v32 = vrot.slane %v317_v24, 7 }
  0x1b   : > { %vm6356_vm5 = vmand %vm395_vm2, %vm396_vm3  ;;  %v393_v26 = vsel %vm6350_vm4, %v314_v17, %v392_v8  ;;  %v404_v31 = vld [vmem:[#allocation3 + $0x14] sm:$0x1]  ;;  %v328_v33 = vshll.u32 %v302_v23, 16  ;;  %v407_v34 = vld [vmem:[#allocation3 + $0x18] sm:$0xf]  ;;  %v488_v37 = vshll.u32 %v6360_v19, 16  ;;  %5539 = vmatpush3.bf16.msra.mxu0 %v6102_v21 }
  0x1c   : > { %v399_v27 = vsel %vm6356_vm5, %v315_v18, %v398_v13  ;;  %394 = vst [vmem:[#allocation3 + $0x8] sm:$0xf] %v393_v26  ;;  %v410_v35 = vld [vmem:[#allocation3 + $0x1c] sm:$0x1]  ;;  %v327_v36 = vrot.slane %v325_v29, 7  ;;  %v322_v38 = vor.u32 %v320_v25, %v319_v32  ;;  %v323_v39 = vrot.slane %v319_v32, 4  ;;  %5540 = vmatprep.subr.bf16.mxu0 %v6103_v40  ;;  %vm6394_vm8 = vmor %vm475_vm6, %vm476_vm7 }
  0x1d   : > { %400 = vst [vmem:[#allocation3 + $0xc] sm:$0x1] %v399_v27  ;;  %v485_v41 = vor.u32 %v484_v28, %v481_v22  ;;  %v303_v48 = vld [vmem:[%s6339_s12 + $0xc] sm:$0xf]  ;;  %v304_v49 = vld [vmem:[%s6339_s12 + $0x10] sm:$0xf] }
  0x1e   : > { %v330_v42 = vor.u32 %v328_v33, %v327_v36  ;;  %v331_v43 = vrot.slane %v327_v36, 4  ;;  %v402_v44 = vsel %vm6350_vm4, %v322_v38, %v401_v30  ;;  %v405_v45 = vsel %vm6356_vm5, %v323_v39, %v404_v31  ;;  %v413_v1 = vld [vmem:[#allocation3 + $0x20] sm:$0xf]  ;;  %v416_v4 = vld [vmem:[#allocation3 + $0x24] sm:$0x1]  ;;  %v6406_v7 = vld [vmem:[%s7418_s1] sm:$0xff]  }
  0x1f   : > { %403 = vst [vmem:[#allocation3 + $0x10] sm:$0xf] %v402_v44  ;;  %406 = vst [vmem:[#allocation3 + $0x14] sm:$0x1] %v405_v45  ;;  %v490_v50 = vrot.slane %v488_v37, 5  ;;  %v333_v51 = vshrl.u32 %v303_v48, 16  ;;  %5541 = vmatpush3.bf16.msra.mxu0 %v6103_v40 }
  0x20   : > { %v408_v46 = vsel %vm6350_vm4, %v330_v42, %v407_v34  ;;  %v411_v47 = vsel %vm6356_vm5, %v331_v43, %v410_v35  ;;  %v341_v52 = vshrl.u32 %v304_v49, 16  ;;  %v486_v55 = vrot.slane %v485_v41, 4  ;;  %v305_v11 = vld [vmem:[%s6339_s12 + $0x14] sm:$0xf]  ;;  %5542 = vmatprep.subr.bf16.mxu0 %v6104_v57  ;;  %v419_v31 = vld [vmem:[#allocation3 + $0x28] sm:$0xf] }
  0x21   : > { %409 = vst [vmem:[#allocation3 + $0x18] sm:$0xf] %v408_v46  ;;  %412 = vst [vmem:[#allocation3 + $0x1c] sm:$0x1] %v411_v47  ;;  %v336_v56 = vshll.u32 %v303_v48, 16  ;;  %v344_v62 = vshll.u32 %v304_v49, 16 }
  0x22   : > { %v335_v63 = vrot.slane %v333_v51, 7  ;;  %v343_v0 = vrot.slane %v341_v52, 7  ;;  %v491_v5 = vsel %vm6394_vm8, %v486_v55, %v490_v50  ;;  %v349_v20 = vshrl.u32 %v305_v11, 16  ;;  %v422_v35 = vld [vmem:[#allocation3 + $0x2c] sm:$0x1]  ;;  %v6261_v58 = vld [vmem:[%s7421_s4 + $0x220] sm:$0xff]  }
  0x23   : > { %v6385_v53 = vld [vmem:[#allocation3 + $0x8] sm:$0xf]  ;;  %5543 = vmatpush3.bf16.msra.mxu0 %v6104_v57  ;;  %v352_v40 = vshll.u32 %v305_v11, 16  ;;  %v425_v49 = vld [vmem:[#allocation3 + $0x30] sm:$0xf]  ;;  %vm898_vm10 = vcmask 1046532  }
  0x24   : > { %v6387_v54 = vld [vmem:[#allocation3 + $0xc] sm:$0x1]  ;;  %v493_v59 = vshrl.u32 %v6385_v53, 16  ;;  %v496_v60 = vshll.u32 %v6385_v53, 16  ;;  %v338_v8 = vor.u32 %v336_v56, %v335_v63  ;;  %v339_v10 = vrot.slane %v335_v63, 4  ;;  %5552 = vmatprep.subr.bf16.mxu0 %v6406_v7  ;;  %vm6496_vm11 = vmor %vm897_vm9, %vm898_vm10 }
  0x25   : > { %v502_v61 = vshll.u32 %v6387_v54, 16  ;;  %v346_v17 = vor.u32 %v344_v62, %v343_v0  ;;  %v347_v18 = vrot.slane %v343_v0, 4  ;;  %v306_v39 = vld [vmem:[%s6339_s12 + $0x18] sm:$0xf]  ;;  %v351_v48 = vrot.slane %v349_v20, 7 }
  0x26   : > { %v495_v2 = vrot.slane %v493_v59, 4  ;;  %v498_v3 = vrot.slane %v496_v60, 5  ;;  %v6409_v14 = vld [vmem:[#allocation3 + $0x10] sm:$0xf]  ;;  %v6411_v15 = vld [vmem:[#allocation3 + $0x14] sm:$0x1]  ;;  %v414_v25 = vsel %vm6350_vm4, %v338_v8, %v413_v1  ;;  %v417_v26 = vsel %vm6356_vm5, %v339_v10, %v416_v4 }
  0x27   : > { %v504_v6 = vrot.slane %v502_v61, 5  ;;  %v507_v23 = vshrl.u32 %v6409_v14, 16  ;;  %v510_v24 = vshll.u32 %v6409_v14, 16  ;;  %v516_v28 = vshll.u32 %v6411_v15, 16  ;;  %415 = vst [vmem:[#allocation3 + $0x20] sm:$0xf] %v414_v25 }
  0x28   : > { %v499_v13 = vor.u32 %v498_v3, %v495_v2  ;;  %v6413_v21 = vld [vmem:[#allocation3 + $0x18] sm:$0xf]  ;;  %v6415_v22 = vld [vmem:[#allocation3 + $0x1c] sm:$0x1]  ;;  %418 = vst [vmem:[#allocation3 + $0x24] sm:$0x1] %v417_v26  ;;  %v420_v46 = vsel %vm6350_vm4, %v346_v17, %v419_v31  ;;  %v423_v47 = vsel %vm6356_vm5, %v347_v18, %v422_v35  ;;  %v354_v57 = vor.u32 %v352_v40, %v351_v48 }
  0x29   : > { %v521_v29 = vshrl.u32 %v6413_v21, 16  ;;  %v524_v30 = vshll.u32 %v6413_v21, 16  ;;  %v509_v32 = vrot.slane %v507_v23, 4  ;;  %v512_v33 = vrot.slane %v510_v24, 5  ;;  %421 = vst [vmem:[#allocation3 + $0x28] sm:$0xf] %v420_v46 }
  0x2a   : > { %v500_v27 = vrot.slane %v499_v13, 4  ;;  %v530_v34 = vshll.u32 %v6415_v22, 16  ;;  %v518_v43 = vrot.slane %v516_v28, 5  ;;  %424 = vst [vmem:[#allocation3 + $0x2c] sm:$0x1] %v423_v47  ;;  %v357_v51 = vshrl.u32 %v306_v39, 16 }
  0x2b   : > { %v523_v37 = vrot.slane %v521_v29, 4  ;;  %v526_v38 = vrot.slane %v524_v30, 5  ;;  %v513_v42 = vor.u32 %v512_v33, %v509_v32  ;;  %v360_v52 = vshll.u32 %v306_v39, 16  ;;  %v428_v55 = vld [vmem:[#allocation3 + $0x34] sm:$0x1]  ;;  %v6107_v28 = vld [vmem:[%s7418_s1 + $0x10] sm:$0xff]  }
  0x2c   : > { %v505_v36 = vsel %vm6394_vm8, %v500_v27, %v504_v6  ;;  %v532_v44 = vrot.slane %v530_v34, 5  ;;  %v355_v59 = vrot.slane %v351_v48, 4  ;;  %v431_v60 = vld [vmem:[#allocation3 + $0x38] sm:$0xf]  ;;  %v359_v0 = vrot.slane %v357_v51, 7 }
  0x2d   : > { %v4742_v41 = vcombine.low %v491_v5, %v505_v36  ;;  %v527_v45 = vor.u32 %v526_v38, %v523_v37  ;;  %v514_v50 = vrot.slane %v513_v42, 4  ;;  %v434_v4 = vld [vmem:[#allocation3 + $0x3c] sm:$0x1]  ;;  %v426_v11 = vsel %vm6350_vm4, %v354_v57, %v425_v49  ;;  %v6108_v36 = vld [vmem:[%s7418_s1 + $0x18] sm:$0xff]  }
  0x2e   : > { %v6437_v62 = vld [vmem:[#allocation3 + $0x20] sm:$0xf]  ;;  %v6106_v6 = vld [vmem:[%s7418_s1 + $0x8] sm:$0xff]   ;;  %v362_v8 = vor.u32 %v360_v52, %v359_v0  ;;  %v363_v10 = vrot.slane %v359_v0, 4  ;;  %427 = vst [vmem:[#allocation3 + $0x30] sm:$0xf] %v426_v11  ;;  %v429_v20 = vsel %vm6356_vm5, %v355_v59, %v428_v55 }
  0x2f   : > { %5544 = vmatprep.mubr.bf16.mxu0 %v4742_v41  ;;  %v528_v56 = vrot.slane %v527_v45, 4  ;;  %v519_v61 = vsel %vm6394_vm8, %v514_v50, %v518_v43  ;;  %v6439_v63 = vld [vmem:[#allocation3 + $0x24] sm:$0x1]  ;;  %v535_v2 = vshrl.u32 %v6437_v62, 16  ;;  %v538_v3 = vshll.u32 %v6437_v62, 16 }
  0x30   : > { %v544_v18 = vshll.u32 %v6439_v63, 16  ;;  %430 = vst [vmem:[#allocation3 + $0x34] sm:$0x1] %v429_v20  ;;  %v432_v23 = vsel %vm6350_vm4, %v362_v8, %v431_v60  ;;  %v435_v24 = vsel %vm6356_vm5, %v363_v10, %v434_v4  ;;  %v6458_v25 = vld [vmem:[#allocation3 + $0x28] sm:$0xf]  ;;  %v910_v35 = vrot.slane %v6411_v15, 5 }
  0x31   : > { %v533_v1 = vsel %vm6394_vm8, %v528_v56, %v532_v44  ;;  %v537_v13 = vrot.slane %v535_v2, 4  ;;  %v540_v17 = vrot.slane %v538_v3, 5  ;;  %v6460_v26 = vld [vmem:[#allocation3 + $0x2c] sm:$0x1]  ;;  %433 = vst [vmem:[#allocation3 + $0x38] sm:$0xf] %v432_v23 }
  0x32   : > { %v4743_v5 = vcombine.low %v519_v61, %v533_v1  ;;  %436 = vst [vmem:[#allocation3 + $0x3c] sm:$0x1] %v435_v24  ;;  %v549_v29 = vshrl.u32 %v6458_v25, 16  ;;  %v552_v30 = vshll.u32 %v6458_v25, 16  ;;  %v558_v31 = vshll.u32 %v6460_v26, 16  ;;  %v6109_v44 = vld [vmem:[%s7418_s1 + $0x20] sm:$0xff]  }
  0x33   : > { %v541_v27 = vor.u32 %v540_v17, %v537_v13  ;;  %v914_v37 = vrot.slane %v6415_v22, 5  ;;  %v875_v43 = vld [vmem:[#allocation3 + $0x10] sm:$0xe]  ;;  %v876_v55 = vld [vmem:[#allocation3 + $0x18] sm:$0xe]  ;;  %v4754_v24 = vcombine.low %v6345_v9, %v6385_v53 }
  0x34   : > { %5545 = vmatmul.mubr.bf16.vlgmr.msra.gmra.mrb[0].mxu0 %v4743_v5  ;;  %v551_v33 = vrot.slane %v549_v29, 4  ;;  %v554_v34 = vrot.slane %v552_v30, 5  ;;  %v560_v39 = vrot.slane %v558_v31, 5  ;;  %v6110_v3 = vld [vmem:[%s7418_s1 + $0x28] sm:$0xff]   ;;  %v4768_v4 = vrot.slane %v875_v43, 9  ;;  %v6112_v29 = vld [vmem:[%s7418_s1 + $0x38] sm:$0xff]  }
  0x35   : > { %5553 = vmatpush3.bf16.msra.mxu0 %v6406_v7  ;;  %v542_v32 = vrot.slane %v541_v27, 4  ;;  %v546_v7 = vrot.slane %v544_v18, 5  ;;  %v6473_v40 = vld [vmem:[#allocation3 + $0x30] sm:$0xf]  ;;  %v4769_v5 = vrot.slane %v876_v55, 9  ;;  %v6111_v27 = vld [vmem:[%s7418_s1 + $0x30] sm:$0xff]  }
  0x36   : > { %5554 = vmatprep.subr.bf16.mxu0 %v6106_v6  ;;  %v555_v38 = vor.u32 %v554_v34, %v551_v33  ;;  %v563_v42 = vshrl.u32 %v6473_v40, 16  ;;  %v566_v15 = vshll.u32 %v6473_v40, 16  ;;  %v6505_v11 = vsel %vm6496_vm11, %v4768_v4, %v910_v35  ;;  %v6114_v9 = vld [vmem:[%s7418_s1 + $0x80] sm:$0xff]   ;;  %v873_v53 = vld [vmem:[#allocation3] sm:$0xe]  ;;  %v6116_v33 = vld [vmem:[%s7418_s1 + $0x88] sm:$0xff]  }
  0x37   : > { %v6475_v41 = vld [vmem:[#allocation3 + $0x34] sm:$0x1]  ;;  %v547_v45 = vsel %vm6394_vm8, %v542_v32, %v546_v7  ;;  %v6509_v13 = vsel %vm6496_vm11, %v4769_v5, %v914_v37  ;;  %v874_v30 = vld [vmem:[#allocation3 + $0x8] sm:$0xe]  ;;  %v902_v31 = vrot.slane %v6360_v19, 5  ;;  %v4755_v32 = vcombine.low %v6409_v14, %v6413_v21 }
  0x38   : > { %v556_v22 = vrot.slane %v555_v38, 4  ;;  %v6484_v46 = vld [vmem:[#allocation3 + $0x38] sm:$0xf]  ;;  %v572_v48 = vshll.u32 %v6475_v41, 16  ;;  %v565_v49 = vrot.slane %v563_v42, 4  ;;  %v568_v50 = vrot.slane %v566_v15, 5 }
  0x39   : > { %5555 = vmatpush3.bf16.msra.mxu0 %v6106_v6  ;;  %v6486_v47 = vld [vmem:[#allocation3 + $0x3c] sm:$0x1]  ;;  %v577_v51 = vshrl.u32 %v6484_v46, 16  ;;  %v580_v52 = vshll.u32 %v6484_v46, 16  ;;  %v4791_v20 = vcombine.low %v6505_v11, %v6509_v13  ;;  %v906_v7 = vrot.slane %v6387_v54, 5  ;;  %v6117_v54 = vld [vmem:[%s7418_s1 + $0x90] sm:$0xff]  }
  0x3a   : > { %5556 = vmatprep.subr.bf16.mxu0 %v6107_v28  ;;  %v561_v56 = vsel %vm6394_vm8, %v556_v22, %v560_v39  ;;  %v574_v57 = vrot.slane %v572_v48, 5  ;;  %v586_v59 = vshll.u32 %v6486_v47, 16  ;;  %v569_v61 = vor.u32 %v568_v50, %v565_v49  ;;  %v307_v37 = vld [vmem:[%s6339_s12 + $0x1c] sm:$0xf]  ;;  %v440_v48 = vld [vmem:[#allocation3 + $0x44] sm:$0x1] }
  0x3b   : > { %v4744_v60 = vcombine.low %v547_v45, %v561_v56  ;;  %v579_v0 = vrot.slane %v577_v51, 4  ;;  %v582_v1 = vrot.slane %v580_v52, 5  ;;  %v4756_v34 = vcombine.low %v6437_v62, %v6458_v25  ;;  %v437_v62 = vld [vmem:[#allocation3 + $0x40] sm:$0xf]  ;;  %v6119_v45 = vld [vmem:[%s7418_s1 + $0xa0] sm:$0xff]   ;;  %v6124_v52 = vld [vmem:[%s7418_s1 + $0xb8] sm:$0xff]  }
  0x3c   : > { %v570_v6 = vrot.slane %v569_v61, 4  ;;  %v588_v10 = vrot.slane %v586_v59, 5  ;;  %v4766_v35 = vrot.slane %v873_v53, 9  ;;  %v365_v38 = vshrl.u32 %v307_v37, 16  ;;  %v877_v49 = vld [vmem:[#allocation3 + $0x20] sm:$0xe] }
  0x3d   : > { %5557 = vmatpush3.bf16.msra.mxu0 %v6107_v28  ;;  %5548 = vmatprep.mubr.bf16.mxu0 %v4744_v60  ;;  %v583_v8 = vor.u32 %v582_v1, %v579_v0  ;;  %v368_v39 = vshll.u32 %v307_v37, 16  ;;  %v4757_v42 = vcombine.low %v6473_v40, %v6484_v46  ;;  %v6120_v40 = vld [vmem:[%s7418_s1 + $0xa8] sm:$0xff]   ;;  %v6122_v46 = vld [vmem:[%s7418_s1 + $0xb0] sm:$0xff]   ;;  %v878_v50 = vld [vmem:[#allocation3 + $0x28] sm:$0xe]  ;;  %v4770_v55 = vrot.slane %v877_v49, 9 }
  0x3e   : > { %5558 = vmatprep.subr.bf16.mxu0 %v6108_v36  ;;  %v575_v17 = vsel %vm6394_vm8, %v570_v6, %v574_v57  ;;  %v367_v19 = vrot.slane %v365_v38, 7  ;;  %v903_v14 = vsel %vm6496_vm11, %v4766_v35, %v902_v31  ;;  %v918_v56 = vrot.slane %v6439_v63, 5  ;;  %v879_v60 = vld [vmem:[#allocation3 + $0x30] sm:$0xe]  ;;  %v880_v61 = vld [vmem:[#allocation3 + $0x38] sm:$0xe] }
  0x3f   : > { %v584_v18 = vrot.slane %v583_v8, 4  ;;  %v4771_v57 = vrot.slane %v878_v50, 9  ;;  %v922_v59 = vrot.slane %v6460_v26, 5  ;;  %v6125_v0 = vld [vmem:[%s7418_s1 + $0xc0] sm:$0xff]   ;;  %v926_v4 = vrot.slane %v6475_v41, 5  ;;  %v6126_v8 = vld [vmem:[%s7418_s1 + $0xc8] sm:$0xff]  }
  0x40   : > { %v370_v25 = vor.u32 %v368_v39, %v367_v19  ;;  %v371_v22 = vrot.slane %v367_v19, 4  ;;  %v919_v1 = vsel %vm6496_vm11, %v4770_v55, %v918_v56  ;;  %v930_v63 = vrot.slane %v6486_v47, 5  ;;  %v6128_v11 = vld [vmem:[%s7418_s1 + $0xd8] sm:$0xff]   ;;  %v6129_v13 = vld [vmem:[%s7418_s1 + $0xe0] sm:$0xff]   ;;  %v1262_v37 = vld [vmem:[#allocation3 + $0x20] sm:$0xf] }
  0x41   : > { %5559 = vmatpush3.bf16.msra.mxu0 %v6108_v36  ;;  %v589_v23 = vsel %vm6394_vm8, %v584_v18, %v588_v10  ;;  %v4767_v36 = vrot.slane %v874_v30, 9  ;;  %v4772_v5 = vrot.slane %v879_v60, 9  ;;  %v4773_v26 = vrot.slane %v880_v61, 9  ;;  %v6127_v10 = vld [vmem:[%s7418_s1 + $0xd0] sm:$0xff]   ;;  %v6133_v18 = vld [vmem:[#allocation3 + $0x8] ss:$8 sps:$4 sm:$0xff]  }
  0x42   : > { %5560 = vmatprep.subr.bf16.mxu0 %v6109_v44  ;;  %v4745_v28 = vcombine.low %v575_v17, %v589_v23  ;;  %v438_v43 = vsel %vm6350_vm4, %v370_v25, %v437_v62  ;;  %v441_v51 = vsel %vm6356_vm5, %v371_v22, %v440_v48  ;;  %v6130_v23 = vld [vmem:[%s7418_s1 + $0xe8] sm:$0xff]   ;;  %v6132_v30 = vld [vmem:[%s7418_s1 + $0xf8] sm:$0xff]   ;;  %v1266_v61 = vld [vmem:[#allocation3 + $0x30] sm:$0xf] }
  0x43   : > { %v907_v21 = vsel %vm6496_vm11, %v4767_v36, %v906_v7  ;;  %439 = vst [vmem:[#allocation3 + $0x40] sm:$0xf] %v438_v43  ;;  %442 = vst [vmem:[#allocation3 + $0x44] sm:$0x1] %v441_v51  ;;  %v927_v41 = vsel %vm6496_vm11, %v4772_v5, %v926_v4  ;;  %v931_v47 = vsel %vm6496_vm11, %v4773_v26, %v930_v63  ;;  %v6605_v31 = vld [vmem:[#allocation3 + $0xc] sm:$0x1] }
  0x44   : > { %5549 = vmatmul.mubr.bf16.gmra.mrb[4].mxu0 %v4745_v28  ;;  %v4790_v15 = vcombine.low %v903_v14, %v907_v21  ;;  %v4793_v17 = vcombine.low %v927_v41, %v931_v47  ;;  %v1260_v36 = vld [vmem:[#allocation3 + $0x18] sm:$0xf]  ;;  %v1282_v39 = vshll.u32 %v6605_v31, 16  ;;  %v6134_v14 = vld [vmem:[%s7418_s1 + $0x100] sm:$0xff]   ;;  %v1264_v55 = vld [vmem:[#allocation3 + $0x28] sm:$0xf] }
  0x45   : > { %5561 = vmatpush3.bf16.msra.mxu0 %v6109_v44  ;;  %5568 = vmatprep.mubr.bf16.mxu0 %v4754_v24  ;;  %v6118_v44 = vld [vmem:[%s7418_s1 + $0x98] sm:$0xff]   ;;  %v1258_v24 = vld [vmem:[#allocation3 + $0x10] sm:$0xf]  ;;  %v1304_v62 = vshll.u32 %v1260_v36, 16  ;;  %v6135_v25 = vld [vmem:[#allocation3 + $0x18] ss:$8 sps:$4 sm:$0xff]  }
  0x46   : > { %5562 = vmatprep.subr.bf16.mxu0 %v6110_v3  ;;  %v1290_v53 = vshll.u32 %v1258_v24, 16  ;;  %v6136_v43 = vld [vmem:[%s7418_s1 + $0x108] sm:$0xff]   ;;  %v6138_v60 = vld [vmem:[%s7418_s1 + $0x118] sm:$0xff]   ;;  %v6629_v63 = vld [vmem:[#allocation3 + $0x24] sm:$0x1]  ;;  %v1343_v26 = vshrl.u32 %v1266_v61, 16 }
  0x47   : > { %v1306_v49 = vrot.slane %v1304_v62, 5  ;;  %v6627_v4 = vld [vmem:[#allocation3 + $0x1c] sm:$0x1]  ;;  %v6139_v5 = vld [vmem:[%s7418_s1 + $0x120] sm:$0xff]  }
  0x48   : > { %v1292_v35 = vrot.slane %v1290_v53, 5  ;;  %v6636_v41 = vld [vmem:[#allocation3 + $0x34] sm:$0x1] }
  0x49   : > { %5563 = vmatpush3.bf16.msra.mxu0 %v6110_v3  ;;  %v923_v3 = vsel %vm6496_vm11, %v4771_v57, %v922_v59 }
  0x4a   : > { %5564 = vmatprep.subr.bf16.mxu0 %v6111_v27  ;;  %v4792_v6 = vcombine.low %v919_v1, %v923_v3  ;;  %v6143_v56 = vld [vmem:[#allocation3 + $0x38] ss:$8 sps:$4 sm:$0xff]   ;;  %v1329_v1 = vshrl.u32 %v1264_v55, 16  ;;  %v1332_v3 = vshll.u32 %v1264_v55, 16 }
  0x4d   : > { %5565 = vmatpush3.bf16.msra.mxu0 %v6111_v27 }
  0x4e   : > { %5566 = vmatprep.subr.bf16.mxu0 %v6112_v29 }
  0x51   : > { %5567 = vmatpush3.bf16.msra.mxu0 %v6112_v29  ;;  %v6131_v29 = vld [vmem:[%s7418_s1 + $0xf0] sm:$0xff]  }
  0x52   : > { %5576 = vmatprep.subr.bf16.mxu0 %v6114_v9 }
  0x54   : > { %5569 = vmatmul.mubr.bf16.vlgmr.msra.gmra.mrb[0].mxu0 %v4755_v32 }
  0x55   : > { %5577 = vmatpush3.bf16.msra.mxu0 %v6114_v9  ;;  %5572 = vmatprep.mubr.bf16.mxu0 %v4756_v34  ;;  %v1287_v9 = vshrl.u32 %v1258_v24, 16  ;;  %v1345_v24 = vrot.slane %v1343_v26, 4 }
  0x56   : > { %5578 = vmatprep.subr.bf16.mxu0 %v6116_v33 }
  0x57   : > { %v1289_v34 = vrot.slane %v1287_v9, 4  ;;  %v1352_v9 = vshll.u32 %v6636_v41, 16 }
  0x59   : > { %5579 = vmatpush3.bf16.msra.mxu0 %v6116_v33  ;;  %v6607_v33 = vld [vmem:[#allocation3 + $0x14] sm:$0x1]  ;;  %v1293_v21 = vor.u32 %v1292_v35, %v1289_v34 }
  0x5a   : > { %5580 = vmatprep.subr.bf16.mxu0 %v6117_v54  ;;  %v1296_v19 = vshll.u32 %v6607_v33, 16 }
  0x5b   : > { %v1294_v48 = vrot.slane %v1293_v21, 4  ;;  %v6648_v21 = vld [vmem:[#allocation3 + $0x3c] sm:$0x1] }
  0x5c   : > { %5573 = vmatmul.mubr.bf16.gmra.mrb[4].mxu0 %v4757_v42  ;;  %v1315_v42 = vshrl.u32 %v1262_v37, 16  ;;  %v1298_v22 = vrot.slane %v1296_v19, 5 }
  0x5d   : > { %5581 = vmatpush3.bf16.msra.mxu0 %v6117_v54  ;;  %5592 = vmatprep.mubr.bf16.mxu0 %v4790_v15  ;;  %v1301_v54 = vshrl.u32 %v1260_v36, 16  ;;  %v1318_v15 = vshll.u32 %v1262_v37, 16  ;;  %v6142_v36 = vld [vmem:[%s7418_s1 + $0x130] sm:$0xff]  }
  0x5e   : > { %5582 = vmatprep.subr.bf16.mxu0 %v6118_v44  ;;  %v1317_v50 = vrot.slane %v1315_v42, 4  ;;  %v1299_v59 = vsel %vm6394_vm8, %v1294_v48, %v1298_v22  ;;  %v1538_v22 = vld [vmem:[#allocation3 + $0x8] sm:$0xe] }
  0x5f   : > { %v1320_v51 = vrot.slane %v1318_v15, 5 }
  0x61   : > { %5583 = vmatpush3.bf16.msra.mxu0 %v6118_v44  ;;  %v6141_v44 = vld [vmem:[#allocation3 + $0x28] ss:$8 sps:$4 sm:$0xff]  }
  0x62   : > { %5584 = vmatprep.subr.bf16.mxu0 %v6119_v45 }
  0x65   : > { %5585 = vmatpush3.bf16.msra.mxu0 %v6119_v45 }
  0x66   : > { %5586 = vmatprep.subr.bf16.mxu0 %v6120_v40 }
  0x69   : > { %5587 = vmatpush3.bf16.msra.mxu0 %v6120_v40  ;;  %v1284_v40 = vrot.slane %v1282_v39, 5 }
  0x6a   : > { %5588 = vmatprep.subr.bf16.mxu0 %v6122_v46 }
  0x6d   : > { %5589 = vmatpush3.bf16.msra.mxu0 %v6122_v46  ;;  %v1303_v46 = vrot.slane %v1301_v54, 4 }
  0x6e   : > { %5590 = vmatprep.subr.bf16.mxu0 %v6124_v52 }
  0x6f   : > { %v1307_v47 = vor.u32 %v1306_v49, %v1303_v46  ;;  %v1539_v46 = vld [vmem:[#allocation3 + $0x10] sm:$0xe]  ;;  %v1366_v49 = vshll.u32 %v6648_v21, 16 }
  0x71   : > { %5591 = vmatpush3.bf16.msra.mxu0 %v6124_v52  ;;  %v6137_v52 = vld [vmem:[%s7418_s1 + $0x110] sm:$0xff]   ;;  %v1308_v37 = vrot.slane %v1307_v47, 4 }
  0x72   : > { %5600 = vmatprep.subr.bf16.mxu0 %v6125_v0 }
  0x74   : > { %5593 = vmatmul.mubr.bf16.vlgmr.msra.gmra.mrb[0].mxu0 %v4791_v20  ;;  %v1256_v20 = vld [vmem:[#allocation3 + $0x8] sm:$0xf] }
  0x75   : > { %5601 = vmatpush3.bf16.msra.mxu0 %v6125_v0  ;;  %5596 = vmatprep.mubr.bf16.mxu0 %v4792_v6  ;;  %v1273_v27 = vshrl.u32 %v1256_v20, 16  ;;  %v1276_v28 = vshll.u32 %v1256_v20, 16  ;;  %v1346_v6 = vshll.u32 %v1266_v61, 16  ;;  %v1331_v20 = vrot.slane %v1329_v1, 4 }
  0x76   : > { %5602 = vmatprep.subr.bf16.mxu0 %v6126_v8  ;;  %v1568_v61 = vrot.slane %v6607_v33, 5  ;;  %v1368_v1 = vrot.slane %v1366_v49, 5  ;;  %v6155_v49 = vld [vmem:[%s7418_s1 + $0x190] sm:$0xff]  }
  0x77   : > { %v1275_v32 = vrot.slane %v1273_v27, 4  ;;  %v1278_v7 = vrot.slane %v1276_v28, 5  ;;  %v1348_v27 = vrot.slane %v1346_v6, 5  ;;  %v6140_v28 = vld [vmem:[%s7418_s1 + $0x128] sm:$0xff]  }
  0x78   : > { %v6146_v6 = vld [vmem:[%s7418_s1 + $0x148] sm:$0xff]  }
  0x79   : > { %5603 = vmatpush3.bf16.msra.mxu0 %v6126_v8  ;;  %v1279_v38 = vor.u32 %v1278_v7, %v1275_v32  ;;  %v6634_v8 = vld [vmem:[#allocation3 + $0x2c] sm:$0x1]  ;;  %v1349_v19 = vor.u32 %v1348_v27, %v1345_v24  ;;  %v1576_v24 = vrot.slane %v6629_v63, 5  ;;  %v6147_v27 = vld [vmem:[%s7418_s1 + $0x150] sm:$0xff]  }
  0x7a   : > { %5604 = vmatprep.subr.bf16.mxu0 %v6127_v10 }
  0x7b   : > { %v1280_v45 = vrot.slane %v1279_v38, 4 }
  0x7c   : > { %5597 = vmatmul.mubr.bf16.gmra.mrb[4].mxu0 %v4793_v17  ;;  %v1321_v17 = vor.u32 %v1320_v51, %v1317_v50 }
  0x7d   : > { %5605 = vmatpush3.bf16.msra.mxu0 %v6127_v10  ;;  %5616 = vmatprep.mubr.bf16.mxu0 %v6133_v18  ;;  %v1285_v57 = vsel %vm6394_vm8, %v1280_v45, %v1284_v40  ;;  %v1310_v10 = vshll.u32 %v6627_v4, 16  ;;  %v1324_v18 = vshll.u32 %v6629_v63, 16  ;;  %v1350_v40 = vrot.slane %v1349_v19, 4  ;;  %v1545_v19 = vld [vmem:[#allocation3 + $0x40] sm:$0xe] }
  0x7e   : > { %5606 = vmatprep.subr.bf16.mxu0 %v6128_v11  ;;  %v4846_v0 = vcombine.low %v1285_v57, %v1299_v59  ;;  %v1322_v38 = vrot.slane %v1321_v17, 4  ;;  %v1540_v17 = vld [vmem:[#allocation3 + $0x18] sm:$0xe]  ;;  %v1584_v63 = vrot.slane %v6636_v41, 5  ;;  %v6151_v41 = vld [vmem:[%s7418_s1 + $0x170] sm:$0xff]  }
  0x7f   : > { %v1312_v34 = vrot.slane %v1310_v10, 5  ;;  %v1326_v35 = vrot.slane %v1324_v18, 5  ;;  %v1541_v18 = vld [vmem:[#allocation3 + $0x20] sm:$0xe] }
  0x81   : > { %5607 = vmatpush3.bf16.msra.mxu0 %v6128_v11  ;;  %v1268_v11 = vld [vmem:[#allocation3 + $0x38] sm:$0xf]  ;;  %v1327_v55 = vsel %vm6394_vm8, %v1322_v38, %v1326_v35  ;;  %v6153_v38 = vld [vmem:[%s7418_s1 + $0x180] sm:$0xff]  }
  0x82   : > { %5608 = vmatprep.subr.bf16.mxu0 %v6129_v13  ;;  %v1357_v53 = vshrl.u32 %v1268_v11, 16 }
  0x84   : > { %v1359_v62 = vrot.slane %v1357_v53, 4  ;;  %v4861_v53 = vrot.slane %v1541_v18, 9  ;;  %v6162_v18 = vld [vmem:[%s7418_s1 + $0x1c0] sm:$0xff]  }
  0x85   : > { %5609 = vmatpush3.bf16.msra.mxu0 %v6129_v13  ;;  %v1270_v13 = vld [vmem:[#allocation3 + $0x40] sm:$0xf] }
  0x86   : > { %5610 = vmatprep.subr.bf16.mxu0 %v6130_v23  ;;  %v1371_v32 = vshrl.u32 %v1270_v13, 16  ;;  %v1374_v7 = vshll.u32 %v1270_v13, 16  ;;  %v1542_v13 = vld [vmem:[#allocation3 + $0x28] sm:$0xe] }
  0x88   : > { %v1373_v42 = vrot.slane %v1371_v32, 4  ;;  %v1376_v15 = vrot.slane %v1374_v7, 5  ;;  %v6148_v7 = vld [vmem:[%s7418_s1 + $0x158] sm:$0xff]  }
  0x89   : > { %5611 = vmatpush3.bf16.msra.mxu0 %v6130_v23  ;;  %v1334_v23 = vrot.slane %v1332_v3, 5  ;;  %v4858_v3 = vrot.slane %v1538_v22, 9 }
  0x8a   : > { %5612 = vmatprep.subr.bf16.mxu0 %v6131_v29  ;;  %v1377_v51 = vor.u32 %v1376_v15, %v1373_v42  ;;  %v1588_v15 = vrot.slane %v6648_v21, 5 }
  0x8b   : > { %v1335_v39 = vor.u32 %v1334_v23, %v1331_v20  ;;  %v1543_v20 = vld [vmem:[#allocation3 + $0x30] sm:$0xe]  ;;  %v1572_v23 = vrot.slane %v6627_v4, 5  ;;  %v1580_v4 = vrot.slane %v6634_v8, 5 }
  0x8c   : > { %v1378_v47 = vrot.slane %v1377_v51, 4  ;;  %v4863_v32 = vrot.slane %v1543_v20, 9  ;;  %v6156_v51 = vld [vmem:[%s7418_s1 + $0x198] sm:$0xff]  }
  0x8d   : > { %5613 = vmatpush3.bf16.msra.mxu0 %v6131_v29  ;;  %v1338_v29 = vshll.u32 %v6634_v8, 16  ;;  %v1336_v45 = vrot.slane %v1335_v39, 4  ;;  %v6150_v8 = vld [vmem:[%s7418_s1 + $0x168] sm:$0xff]  }
  0x8e   : > { %5614 = vmatprep.subr.bf16.mxu0 %v6132_v30  ;;  %v1544_v39 = vld [vmem:[#allocation3 + $0x38] sm:$0xe] }
  0x8f   : > { %v1340_v54 = vrot.slane %v1338_v29, 5 }
  0x91   : > { %5615 = vmatpush3.bf16.msra.mxu0 %v6132_v30  ;;  %v1360_v30 = vshll.u32 %v1268_v11, 16  ;;  %v1341_v57 = vsel %vm6394_vm8, %v1336_v45, %v1340_v54  ;;  %v4864_v45 = vrot.slane %v1544_v39, 9 }
  0x92   : > { %5624 = vmatprep.subr.bf16.mxu0 %v6134_v14 }
  0x94   : > { %5617 = vmatmul.mubr.bf16.vlgmr.msra.gmra.mrb[0].mxu0 %v6135_v25  ;;  %v1362_v25 = vrot.slane %v1360_v30, 5  ;;  %v4862_v30 = vrot.slane %v1542_v13, 9 }
  0x95   : > { %5625 = vmatpush3.bf16.msra.mxu0 %v6134_v14  ;;  %5620 = vmatprep.mubr.bf16.mxu0 %v6141_v44  ;;  %v1354_v14 = vrot.slane %v1352_v9, 5  ;;  %v6653_v44 = vld [vmem:[#allocation3 + $0x44] sm:$0x1]  ;;  %v4860_v9 = vrot.slane %v1540_v17, 9  ;;  %v6743_v17 = vld [vmem:[#allocation3 + $0x1c] sm:$0x1] }
  0x96   : > { %5626 = vmatprep.subr.bf16.mxu0 %v6136_v43  ;;  %v1363_v48 = vor.u32 %v1362_v25, %v1359_v62  ;;  %v1380_v50 = vshll.u32 %v6653_v44, 16  ;;  %v1581_v62 = vsel %vm6496_vm11, %v4862_v30, %v1580_v4  ;;  %v1585_v25 = vsel %vm6496_vm11, %v4863_v32, %v1584_v63  ;;  %v6171_v32 = vld [vmem:[#allocation3 + $0x40] ss:$8 sps:$4 sm:$0xff]  }
  0x97   : > { %v1355_v59 = vsel %vm6394_vm8, %v1350_v40, %v1354_v14  ;;  %v1573_v54 = vsel %vm6496_vm11, %v4860_v9, %v1572_v23  ;;  %v1577_v14 = vsel %vm6496_vm11, %v4861_v53, %v1576_v24  ;;  %v4865_v40 = vrot.slane %v1545_v19, 9  ;;  %v6169_v23 = vld [vmem:[#allocation3 + $0x30] ss:$8 sps:$4 sm:$0xff]   ;;  %v6165_v53 = vld [vmem:[%s7418_s1 + $0x1d0] sm:$0xff]  }
  0x98   : > { %v1382_v10 = vrot.slane %v1380_v50, 5  ;;  %v4848_v11 = vcombine.low %v1341_v57, %v1355_v59  ;;  %v4883_v42 = vcombine.low %v1573_v54, %v1577_v14  ;;  %v1592_v22 = vrot.slane %v6653_v44, 5  ;;  %v6161_v50 = vld [vmem:[#allocation3 + $0x10] ss:$8 sps:$4 sm:$0xff]   ;;  %v6159_v59 = vld [vmem:[%s7418_s1 + $0x1b0] sm:$0xff]  }
  0x99   : > { %5627 = vmatpush3.bf16.msra.mxu0 %v6136_v43  ;;  %v6144_v43 = vld [vmem:[%s7418_s1 + $0x138] sm:$0xff]   ;;  %v1921_v57 = vld [vmem:[#allocation3 + $0x18] sm:$0xf]  ;;  %v6167_v19 = vld [vmem:[%s7418_s1 + $0x1e0] sm:$0xff]  }
  0x9a   : > { %5628 = vmatprep.subr.bf16.mxu0 %v6137_v52  ;;  %v1383_v29 = vsel %vm6394_vm8, %v1378_v47, %v1382_v10  ;;  %v1593_v21 = vsel %vm6496_vm11, %v4865_v40, %v1592_v22  ;;  %v6741_v10 = vld [vmem:[#allocation3 + $0x14] sm:$0x1]  ;;  %v6164_v24 = vld [vmem:[%s7418_s1 + $0x1c8] sm:$0xff]   ;;  %v6771_v40 = vld [vmem:[#allocation3 + $0x2c] sm:$0x1] }
  0x9b   : > { %v1945_v13 = vshll.u32 %v6741_v10, 16 }
  0x9c   : > { %5621 = vmatmul.mubr.bf16.gmra.mrb[4].mxu0 %v6143_v56  ;;  %v6145_v56 = vld [vmem:[%s7418_s1 + $0x140] sm:$0xff]  }
  0x9d   : > { %5629 = vmatpush3.bf16.msra.mxu0 %v6137_v52  ;;  %5640 = vmatprep.mubr.bf16.mxu0 %v4846_v0  ;;  %v1313_v52 = vsel %vm6394_vm8, %v1308_v37, %v1312_v34  ;;  %v1364_v0 = vrot.slane %v1363_v48, 4  ;;  %v6152_v37 = vld [vmem:[%s7418_s1 + $0x178] sm:$0xff]   ;;  %v1589_v48 = vsel %vm6496_vm11, %v4864_v45, %v1588_v15  ;;  %v6769_v15 = vld [vmem:[#allocation3 + $0x24] sm:$0x1] }
  0x9e   : > { %5630 = vmatprep.subr.bf16.mxu0 %v6138_v60  ;;  %v4847_v26 = vcombine.low %v1313_v52, %v1327_v55  ;;  %v4885_v44 = vcombine.low %v1589_v48, %v1593_v21  ;;  %v6157_v52 = vld [vmem:[%s7418_s1 + $0x1a0] sm:$0xff]   ;;  %v6158_v55 = vld [vmem:[%s7418_s1 + $0x1a8] sm:$0xff]   ;;  %v1931_v48 = vld [vmem:[#allocation3 + $0x40] sm:$0xf] }
  0xa1   : > { %5631 = vmatpush3.bf16.msra.mxu0 %v6138_v60  ;;  %v1564_v60 = vrot.slane %v6605_v31, 5 }
  0xa2   : > { %5632 = vmatprep.subr.bf16.mxu0 %v6139_v5 }
  0xa3   : > { %v1565_v31 = vsel %vm6496_vm11, %v4858_v3, %v1564_v60  ;;  %v6160_v3 = vld [vmem:[%s7418_s1 + $0x1b8] sm:$0xff]  }
  0xa5   : > { %5633 = vmatpush3.bf16.msra.mxu0 %v6139_v5  ;;  %v4859_v5 = vrot.slane %v1539_v46, 9  ;;  %v6154_v46 = vld [vmem:[%s7418_s1 + $0x188] sm:$0xff]  }
  0xa6   : > { %5634 = vmatprep.subr.bf16.mxu0 %v6140_v28 }
  0xa7   : > { %v1569_v33 = vsel %vm6496_vm11, %v4859_v5, %v1568_v61 }
  0xa8   : > { %v4882_v35 = vcombine.low %v1565_v31, %v1569_v33  ;;  %v1959_v31 = vshll.u32 %v6743_v17, 16  ;;  %v6163_v33 = vld [vmem:[#allocation3 + $0x20] ss:$8 sps:$4 sm:$0xff]  }
  0xa9   : > { %5635 = vmatpush3.bf16.msra.mxu0 %v6140_v28  ;;  %v1369_v28 = vsel %vm6394_vm8, %v1364_v0, %v1368_v1  ;;  %v1950_v0 = vshrl.u32 %v1921_v57, 16  ;;  %v1953_v1 = vshll.u32 %v1921_v57, 16  ;;  %v1973_v57 = vshll.u32 %v6769_v15, 16 }
  0xaa   : > { %5636 = vmatprep.subr.bf16.mxu0 %v6142_v36  ;;  %v4849_v34 = vcombine.low %v1369_v28, %v1383_v29  ;;  %v1947_v28 = vrot.slane %v1945_v13, 5  ;;  %v1961_v9 = vrot.slane %v1959_v31, 5 }
  0xab   : > { %v1955_v47 = vrot.slane %v1953_v1, 5 }
  0xad   : > { %5637 = vmatpush3.bf16.msra.mxu0 %v6142_v36  ;;  %v6149_v36 = vld [vmem:[%s7418_s1 + $0x160] sm:$0xff]  }
  0xae   : > { %5638 = vmatprep.subr.bf16.mxu0 %v6144_v43 }
  0xb1   : > { %5639 = vmatpush3.bf16.msra.mxu0 %v6144_v43  ;;  %v4884_v43 = vcombine.low %v1581_v62, %v1585_v25 }
  0xb2   : > { %5648 = vmatprep.subr.bf16.mxu0 %v6145_v56 }
  0xb4   : > { %5641 = vmatmul.mubr.bf16.vlgmr.msra.gmra.mrb[0].mxu0 %v4847_v26 }
  0xb5   : > { %5649 = vmatpush3.bf16.msra.mxu0 %v6145_v56  ;;  %5644 = vmatprep.mubr.bf16.mxu0 %v4848_v11  ;;  %v1919_v56 = vld [vmem:[#allocation3 + $0x10] sm:$0xf] }
  0xb6   : > { %5650 = vmatprep.subr.bf16.mxu0 %v6146_v6  ;;  %v1936_v60 = vshrl.u32 %v1919_v56, 16  ;;  %v1939_v61 = vshll.u32 %v1919_v56, 16 }
  0xb8   : > { %v1938_v5 = vrot.slane %v1936_v60, 4  ;;  %v1941_v26 = vrot.slane %v1939_v61, 5  ;;  %v2023_v60 = vshll.u32 %v1931_v48, 16 }
  0xb9   : > { %5651 = vmatpush3.bf16.msra.mxu0 %v6146_v6  ;;  %v1952_v6 = vrot.slane %v1950_v0, 4  ;;  %v1987_v0 = vshll.u32 %v6771_v40, 16 }
  0xba   : > { %5652 = vmatprep.subr.bf16.mxu0 %v6147_v27  ;;  %v1942_v11 = vor.u32 %v1941_v26, %v1938_v5  ;;  %v6170_v5 = vld [vmem:[%s7418_s1 + $0x1f0] sm:$0xff]  }
  0xbb   : > { %v1956_v20 = vor.u32 %v1955_v47, %v1952_v6 }
  0xbc   : > { %5645 = vmatmul.mubr.bf16.gmra.mrb[4].mxu0 %v4849_v34  ;;  %v6166_v34 = vld [vmem:[%s7418_s1 + $0x1d8] sm:$0xff]  }
  0xbd   : > { %5653 = vmatpush3.bf16.msra.mxu0 %v6147_v27  ;;  %5664 = vmatprep.mubr.bf16.mxu0 %v4882_v35  ;;  %v1943_v27 = vrot.slane %v1942_v11, 4  ;;  %v1957_v29 = vrot.slane %v1956_v20, 4  ;;  %v1925_v35 = vld [vmem:[#allocation3 + $0x28] sm:$0xf]  ;;  %v1975_v20 = vrot.slane %v1973_v57, 5 }
  0xbe   : > { %5654 = vmatprep.subr.bf16.mxu0 %v6148_v7  ;;  %v1981_v39 = vshll.u32 %v1925_v35, 16  ;;  %v6172_v11 = vld [vmem:[%s7418_s1 + $0x1f8] sm:$0xff]  }
  0xbf   : > { %v1948_v30 = vsel %vm6394_vm8, %v1943_v27, %v1947_v28  ;;  %v1962_v4 = vsel %vm6394_vm8, %v1957_v29, %v1961_v9  ;;  %v6787_v27 = vld [vmem:[#allocation3 + $0x44] sm:$0x1]  ;;  %v6176_v57 = vld [vmem:[%s7418_s1 + $0x218] sm:$0xff]  }
  0xc0   : > { %v4938_v63 = vcombine.low %v1948_v30, %v1962_v4 }
  0xc1   : > { %5655 = vmatpush3.bf16.msra.mxu0 %v6148_v7  ;;  %v1923_v7 = vld [vmem:[#allocation3 + $0x20] sm:$0xf] }
  0xc2   : > { %5656 = vmatprep.subr.bf16.mxu0 %v6149_v36 }
  0xc5   : > { %5657 = vmatpush3.bf16.msra.mxu0 %v6149_v36  ;;  %v1927_v36 = vld [vmem:[#allocation3 + $0x30] sm:$0xf] }
  0xc6   : > { %5658 = vmatprep.subr.bf16.mxu0 %v6150_v8  ;;  %v1992_v54 = vshrl.u32 %v1927_v36, 16  ;;  %v1995_v14 = vshll.u32 %v1927_v36, 16 }
  0xc8   : > { %v1994_v21 = vrot.slane %v1992_v54, 4 }
  0xc9   : > { %5659 = vmatpush3.bf16.msra.mxu0 %v6150_v8  ;;  %v1929_v8 = vld [vmem:[#allocation3 + $0x38] sm:$0xf] }
  0xca   : > { %5660 = vmatprep.subr.bf16.mxu0 %v6151_v41  ;;  %v2006_v62 = vshrl.u32 %v1929_v8, 16  ;;  %v2009_v25 = vshll.u32 %v1929_v8, 16 }
  0xcd   : > { %5661 = vmatpush3.bf16.msra.mxu0 %v6151_v41  ;;  %v1964_v41 = vshrl.u32 %v1923_v7, 16 }
  0xce   : > { %5662 = vmatprep.subr.bf16.mxu0 %v6152_v37 }
  0xd1   : > { %5663 = vmatpush3.bf16.msra.mxu0 %v6152_v37  ;;  %v1967_v37 = vshll.u32 %v1923_v7, 16 }
  0xd2   : > { %5672 = vmatprep.subr.bf16.mxu0 %v6153_v38 }
  0xd3   : > { %v1969_v45 = vrot.slane %v1967_v37, 5 }
  0xd4   : > { %5665 = vmatmul.mubr.bf16.vlgmr.msra.gmra.mrb[0].mxu0 %v4883_v42  ;;  %v6168_v42 = vld [vmem:[%s7418_s1 + $0x1e8] sm:$0xff]  }
  0xd5   : > { %5673 = vmatpush3.bf16.msra.mxu0 %v6153_v38  ;;  %5668 = vmatprep.mubr.bf16.mxu0 %v4884_v43  ;;  %v1978_v38 = vshrl.u32 %v1925_v35, 16  ;;  %v1966_v43 = vrot.slane %v1964_v41, 4  ;;  %v2029_v35 = vshll.u32 %v6787_v27, 16  ;;  %v6173_v41 = vld [vmem:[%s7418_s1 + $0x200] sm:$0xff]  }
  0xd6   : > { %5674 = vmatprep.subr.bf16.mxu0 %v6154_v46 }
  0xd7   : > { %v1980_v22 = vrot.slane %v1978_v38, 4  ;;  %v1970_v56 = vor.u32 %v1969_v45, %v1966_v43  ;;  %v6174_v45 = vld [vmem:[%s7418_s1 + $0x208] sm:$0xff]  }
  0xd9   : > { %5675 = vmatpush3.bf16.msra.mxu0 %v6154_v46  ;;  %v1983_v46 = vrot.slane %v1981_v39, 5  ;;  %v1971_v13 = vrot.slane %v1970_v56, 4  ;;  %v2201_v39 = vld [vmem:[#allocation3 + $0x10] sm:$0xe] }
  0xda   : > { %5676 = vmatprep.subr.bf16.mxu0 %v6155_v49 }
  0xdb   : > { %v1984_v61 = vor.u32 %v1983_v46, %v1980_v22  ;;  %v4950_v22 = vrot.slane %v2201_v39, 9  ;;  %v2227_v46 = vrot.slane %v6741_v10, 5  ;;  %v6880_v39 = vld [vmem:[%s7421_s4] sm:$0xff]  }
  0xdc   : > { %5669 = vmatmul.mubr.bf16.gmra.mrb[4].mxu0 %v4885_v44  ;;  %v2008_v44 = vrot.slane %v2006_v62, 4 }
  0xdd   : > { %5677 = vmatpush3.bf16.msra.mxu0 %v6155_v49  ;;  %5688 = vmatprep.mubr.bf16.mxu0 %v6161_v50  ;;  %v1997_v49 = vrot.slane %v1995_v14, 5  ;;  %v2011_v50 = vrot.slane %v2009_v25, 5  ;;  %v2031_v25 = vrot.slane %v2029_v35, 5  ;;  %v2228_v10 = vsel %vm6496_vm11, %v4950_v22, %v2227_v46  ;;  %v6181_v35 = vld [vmem:[%s7421_s4 + $0x40] sm:$0xff]  }
  0xde   : > { %5678 = vmatprep.subr.bf16.mxu0 %v6156_v51  ;;  %5744 = vmatprep.subr.bf16.mxu1 %v6181_v35 }
  0xdf   : > { %v1998_v26 = vor.u32 %v1997_v49, %v1994_v21  ;;  %v2012_v47 = vor.u32 %v2011_v50, %v2008_v44  ;;  %v2231_v21 = vrot.slane %v6743_v17, 5  ;;  %v6175_v50 = vld [vmem:[%s7418_s1 + $0x210] sm:$0xff]   ;;  %5745 = vmatpush3.bf16.msra.mxu1 %v6181_v35 }
  0xe1   : > { %5679 = vmatpush3.bf16.msra.mxu0 %v6156_v51  ;;  %v1933_v51 = vld [vmem:[#allocation3 + $0x48] sm:$0xf]  ;;  %v1999_v9 = vrot.slane %v1998_v26, 4  ;;  %v2013_v30 = vrot.slane %v2012_v47, 4 }
  0xe2   : > { %5680 = vmatprep.subr.bf16.mxu0 %v6157_v52  ;;  %v2034_v1 = vshrl.u32 %v1933_v51, 16 }
  0xe4   : > { %v2036_v28 = vrot.slane %v2034_v1, 4  ;;  %v2204_v1 = vld [vmem:[#allocation3 + $0x28] sm:$0xe] }
  0xe5   : > { %5681 = vmatpush3.bf16.msra.mxu0 %v6157_v52  ;;  %v6773_v52 = vld [vmem:[#allocation3 + $0x34] sm:$0x1]  ;;  %v4953_v47 = vrot.slane %v2204_v1, 9 }
  0xe6   : > { %5682 = vmatprep.subr.bf16.mxu0 %v6158_v55  ;;  %v2001_v6 = vshll.u32 %v6773_v52, 16 }
  0xe9   : > { %5683 = vmatpush3.bf16.msra.mxu0 %v6158_v55  ;;  %v6775_v55 = vld [vmem:[#allocation3 + $0x3c] sm:$0x1] }
  0xea   : > { %5684 = vmatprep.subr.bf16.mxu0 %v6159_v59 }
  0xed   : > { %5685 = vmatpush3.bf16.msra.mxu0 %v6159_v59  ;;  %v2020_v59 = vshrl.u32 %v1931_v48, 16 }
  0xee   : > { %5686 = vmatprep.subr.bf16.mxu0 %v6160_v3 }
  0xef   : > { %v2022_v31 = vrot.slane %v2020_v59, 4  ;;  %v6177_v59 = vld [vmem:[%s7418_s1 + $0x220] sm:$0xff]  }
  0xf1   : > { %5687 = vmatpush3.bf16.msra.mxu0 %v6160_v3  ;;  %v2037_v3 = vshll.u32 %v1933_v51, 16 }
  0xf2   : > { %5696 = vmatprep.subr.bf16.mxu0 %v6162_v18 }
  0xf3   : > { %v2039_v29 = vrot.slane %v2037_v3, 5  ;;  %v2205_v3 = vld [vmem:[#allocation3 + $0x30] sm:$0xe] }
  0xf4   : > { %5689 = vmatmul.mubr.bf16.vlgmr.msra.gmra.mrb[0].mxu0 %v6163_v33  ;;  %v2025_v33 = vrot.slane %v2023_v60, 5  ;;  %v6178_v60 = vld [vmem:[%s7418_s1 + $0x228] sm:$0xff]  }
  0xf5   : > { %5697 = vmatpush3.bf16.msra.mxu0 %v6162_v18  ;;  %5692 = vmatprep.mubr.bf16.mxu0 %v6169_v23  ;;  %v2015_v18 = vshll.u32 %v6775_v55, 16  ;;  %v1985_v23 = vrot.slane %v1984_v61, 4  ;;  %v2040_v36 = vor.u32 %v2039_v29, %v2036_v28  ;;  %v6179_v61 = vld [vmem:[%s7418_s1 + $0x230] sm:$0xff]   ;;  %v2208_v29 = vld [vmem:[#allocation3 + $0x48] sm:$0xe] }
  0xf6   : > { %5698 = vmatprep.subr.bf16.mxu0 %v6164_v24  ;;  %v2026_v7 = vor.u32 %v2025_v33, %v2022_v31  ;;  %v2247_v33 = vrot.slane %v6775_v55, 5 }
  0xf7   : > { %v2017_v4 = vrot.slane %v2015_v18, 5  ;;  %v2239_v18 = vrot.slane %v6771_v40, 5 }
  0xf8   : > { %v2027_v14 = vrot.slane %v2026_v7, 4 }
  0xf9   : > { %5699 = vmatpush3.bf16.msra.mxu0 %v6164_v24  ;;  %v1989_v24 = vrot.slane %v1987_v0, 5  ;;  %v2018_v38 = vsel %vm6394_vm8, %v2013_v30, %v2017_v4  ;;  %v2203_v0 = vld [vmem:[#allocation3 + $0x20] sm:$0xe]  ;;  %v4957_v30 = vrot.slane %v2208_v29, 9 }
  0xfa   : > { %5700 = vmatprep.subr.bf16.mxu0 %v6165_v53  ;;  %v2032_v49 = vsel %vm6394_vm8, %v2027_v14, %v2031_v25  ;;  %v4952_v26 = vrot.slane %v2203_v0, 9  ;;  %v6909_v0 = vld [vmem:[#allocation2 + $0x4] sm:$0x1] }
  0xfc   : > { %5693 = vmatmul.mubr.bf16.gmra.mrb[4].mxu0 %v6171_v32  ;;  %v6789_v32 = vld [vmem:[#allocation3 + $0x4c] sm:$0x1] }
  0xfd   : > { %5701 = vmatpush3.bf16.msra.mxu0 %v6165_v53  ;;  %5712 = vmatprep.mubr.bf16.mxu0 %v4938_v63  ;;  %v2003_v53 = vrot.slane %v2001_v6, 5  ;;  %v1976_v63 = vsel %vm6394_vm8, %v1971_v13, %v1975_v20  ;;  %v2043_v8 = vshll.u32 %v6789_v32, 16  ;;  %v2235_v6 = vrot.slane %v6769_v15, 5 }
  0xfe   : > { %5702 = vmatprep.subr.bf16.mxu0 %v6166_v34  ;;  %v4954_v13 = vrot.slane %v2205_v3, 9  ;;  %v2243_v20 = vrot.slane %v6773_v52, 5  ;;  %v2240_v15 = vsel %vm6496_vm11, %v4953_v47, %v2239_v18  ;;  %v2255_v4 = vrot.slane %v6789_v32, 5  ;;  %v6183_v32 = vld [vmem:[%s7421_s4 + $0x50] sm:$0xff]  }
  0xff   : > { %v2004_v37 = vsel %vm6394_vm8, %v1999_v9, %v2003_v53  ;;  %v2045_v43 = vrot.slane %v2043_v8, 5  ;;  %v2251_v53 = vrot.slane %v6787_v27, 5  ;;  %v6182_v27 = vld [vmem:[%s7421_s4 + $0x48] sm:$0xff]   ;;  %v6185_v8 = vld [vmem:[%s7421_s4 + $0x60] sm:$0xff]  }
 0x100   : > { %v4940_v62 = vcombine.low %v2004_v37, %v2018_v38  ;;  %v2244_v40 = vsel %vm6496_vm11, %v4954_v13, %v2243_v20  ;;  %v2256_v7 = vsel %vm6496_vm11, %v4957_v30, %v2255_v4  ;;  %5746 = vmatprep.subr.bf16.mxu1 %v6182_v27  ;;  %v6187_v37 = vld [vmem:[%s7421_s4 + $0x70] sm:$0xff]   ;;  %v6188_v38 = vld [vmem:[%s7421_s4 + $0x78] sm:$0xff]  }
 0x101   : > { %5703 = vmatpush3.bf16.msra.mxu0 %v6166_v34  ;;  %v1990_v34 = vsel %vm6394_vm8, %v1985_v23, %v1989_v24  ;;  %v2236_v23 = vsel %vm6496_vm11, %v4952_v26, %v2235_v6  ;;  %v2207_v24 = vld [vmem:[#allocation3 + $0x40] sm:$0xe]  ;;  %5747 = vmatpush3.bf16.msra.mxu1 %v6182_v27  ;;  %v2680_v6 = vshll.u32 %v6909_v0, 16 }
 0x102   : > { %5704 = vmatprep.subr.bf16.mxu0 %v6167_v19  ;;  %v4939_v54 = vcombine.low %v1976_v63, %v1990_v34  ;;  %v4975_v52 = vcombine.low %v2236_v23, %v2240_v15  ;;  %v4956_v9 = vrot.slane %v2207_v24, 9  ;;  %5748 = vmatprep.subr.bf16.mxu1 %v6183_v32 }
 0x104   : > { %v2252_v63 = vsel %vm6496_vm11, %v4956_v9, %v2251_v53 }
 0x105   : > { %5705 = vmatpush3.bf16.msra.mxu0 %v6167_v19  ;;  %v2202_v19 = vld [vmem:[#allocation3 + $0x18] sm:$0xe]  ;;  %v4977_v34 = vcombine.low %v2252_v63, %v2256_v7  ;;  %5749 = vmatpush3.bf16.msra.mxu1 %v6183_v32  ;;  %v2577_v63 = vld [vmem:[#allocation2 + $0xc] sm:$0x1] }
 0x106   : > { %5706 = vmatprep.subr.bf16.mxu0 %v6168_v42  ;;  %v4951_v48 = vrot.slane %v2202_v19, 9  ;;  %v6883_v19 = vld [vmem:[#allocation2] sm:$0xf] }
 0x107   : > { %v2671_v25 = vshrl.u32 %v6883_v19, 16 }
 0x108   : > { %v2232_v17 = vsel %vm6496_vm11, %v4951_v48, %v2231_v21 }
 0x109   : > { %5707 = vmatpush3.bf16.msra.mxu0 %v6168_v42  ;;  %v2041_v42 = vrot.slane %v2040_v36, 4  ;;  %v4974_v56 = vcombine.low %v2228_v10, %v2232_v17  ;;  %v6184_v36 = vld [vmem:[%s7421_s4 + $0x58] sm:$0xff]   ;;  %v6903_v10 = vrot.slane %v2671_v25, 4 }
 0x10a   : > { %5708 = vmatprep.subr.bf16.mxu0 %v6170_v5  ;;  %5750 = vmatprep.subr.bf16.mxu1 %v6184_v36 }
 0x10b   : > { %v2046_v44 = vsel %vm6394_vm8, %v2041_v42, %v2045_v43  ;;  %5751 = vmatpush3.bf16.msra.mxu1 %v6184_v36  ;;  %v2674_v42 = vshll.u32 %v6883_v19, 16 }
 0x10c   : > { %v4941_v51 = vcombine.low %v2032_v49, %v2046_v44  ;;  %5752 = vmatprep.subr.bf16.mxu1 %v6185_v8 }
 0x10d   : > { %5709 = vmatpush3.bf16.msra.mxu0 %v6170_v5  ;;  %v2206_v5 = vld [vmem:[#allocation3 + $0x38] sm:$0xe]  ;;  %v6905_v17 = vrot.slane %v2674_v42, 5 }
 0x10e   : > { %5710 = vmatprep.subr.bf16.mxu0 %v6172_v11  ;;  %v4955_v31 = vrot.slane %v2206_v5, 9 }
 0x10f   : > { %5753 = vmatpush3.bf16.msra.mxu1 %v6185_v8  ;;  %v2677_v26 = vor.u32 %v6905_v17, %v6903_v10  ;;  %v2592_v8 = vld [vmem:[#allocation2 + $0x20] sm:$0xf] }
 0x110   : > { %v2248_v28 = vsel %vm6496_vm11, %v4955_v31, %v2247_v33  ;;  %v2586_v31 = vld [vmem:[#allocation2 + $0x18] sm:$0xf]  ;;  %v2589_v33 = vld [vmem:[#allocation2 + $0x1c] sm:$0x1] }
 0x111   : > { %5711 = vmatpush3.bf16.msra.mxu0 %v6172_v11  ;;  %v6180_v11 = vld [vmem:[%s7418_s1 + $0x238] sm:$0xff]   ;;  %v4976_v55 = vcombine.low %v2244_v40, %v2248_v28 }
 0x112   : > { %5720 = vmatprep.subr.bf16.mxu0 %v6173_v41 }
 0x114   : > { %5713 = vmatmul.mubr.bf16.vlgmr.msra.gmra.mrb[0].mxu0 %v4939_v54  ;;  %v6888_v54 = vld [vmem:[%s7419_s2] ss:$0 sm:$0xff] }
 0x115   : > { %5721 = vmatpush3.bf16.msra.mxu0 %v6173_v41  ;;  %5716 = vmatprep.mubr.bf16.mxu0 %v4940_v62  ;;  %v6186_v41 = vld [vmem:[%s7421_s4 + $0x68] sm:$0xff]   ;;  %v6893_v62 = vld [vmem:[%s7420_s3] ss:$0 sm:$0xff] }
 0x116   : > { %5722 = vmatprep.subr.bf16.mxu0 %v6174_v45  ;;  %5754 = vmatprep.subr.bf16.mxu1 %v6186_v41 }
 0x117   : > { %5755 = vmatpush3.bf16.msra.mxu1 %v6186_v41 }
 0x118   : > { %5756 = vmatprep.subr.bf16.mxu1 %v6187_v37 }
 0x119   : > { %5723 = vmatpush3.bf16.msra.mxu0 %v6174_v45 }
 0x11a   : > { %5724 = vmatprep.subr.bf16.mxu0 %v6175_v50 }
 0x11b   : > { %5757 = vmatpush3.bf16.msra.mxu1 %v6187_v37 }
 0x11c   : > { %5717 = vmatmul.mubr.bf16.gmra.mrb[4].mxu0 %v4941_v51  ;;  %5758 = vmatprep.subr.bf16.mxu1 %v6188_v38 }
 0x11d   : > { %5725 = vmatpush3.bf16.msra.mxu0 %v6175_v50  ;;  %5736 = vmatprep.mubr.bf16.mxu0 %v4974_v56 }
 0x11e   : > { %5726 = vmatprep.subr.bf16.mxu0 %v6176_v57 }
 0x11f   : > { %5759 = vmatpush3.bf16.msra.mxu1 %v6188_v38 }
 0x120   : > { %5768 = vmatprep.subr.bf16.mxu1 %v6880_v39 }
 0x121   : > { %5727 = vmatpush3.bf16.msra.mxu0 %v6176_v57 }
 0x122   : > { %5728 = vmatprep.subr.bf16.mxu0 %v6177_v59 }
 0x125   : > { %5729 = vmatpush3.bf16.msra.mxu0 %v6177_v59 }
 0x126   : > { %5730 = vmatprep.subr.bf16.mxu0 %v6178_v60 }
 0x129   : > { %5731 = vmatpush3.bf16.msra.mxu0 %v6178_v60 }
 0x12a   : > { %5732 = vmatprep.subr.bf16.mxu0 %v6179_v61 }
 0x12d   : > { %5733 = vmatpush3.bf16.msra.mxu0 %v6179_v61 }
 0x12e   : > { %5734 = vmatprep.subr.bf16.mxu0 %v6180_v11 }
 0x131   : > { %5735 = vmatpush3.bf16.msra.mxu0 %v6180_v11 }
 0x134   : > { %5737 = vmatmul.mubr.bf16.vlgmr.msra.gmra.mrb[0].mxu0 %v4975_v52  ;;  %v2574_v52 = vld [vmem:[#allocation2 + $0x8] sm:$0xf] }
 0x135   : > { %5740 = vmatprep.mubr.bf16.mxu0 %v4976_v55 }
 0x13c   : > { %5741 = vmatmul.mubr.bf16.gmra.mrb[4].mxu0 %v4977_v34 }
 0x207   : > { %v5738_v14 = vpop.f32.mrb[0].mxu0 }
 0x208   : > { %v2420_v43 = vmul.f32 %v5738_v14, %v6888_v54  ;;  %v2372_v45 = vpop.f32.mrb[1].mxu0  ;;  %v2595_v14 = vld [vmem:[#allocation2 + $0x24] sm:$0x1] }
 0x209   : > { %v2418_v22 = vmul.f32 %v6888_v54, %v2372_v45  ;;  %v5739_v46 = vpop.f32.mrb[2].mxu0 }
 0x20a   : > { %v2435_v48 = vadd.f32 %v6893_v62, %v2420_v43  ;;  %v2421_v21 = vmul.f32 %v5739_v46, %v6888_v54  ;;  %v2375_v49 = vpop.f32.mrb[3].mxu0 }
 0x20b   : > { %v2433_v44 = vadd.f32 %v6893_v62, %v2418_v22  ;;  %v2419_v50 = vmul.f32 %v6888_v54, %v2375_v49 }
 0x20c   : > { %v2443_v51 = vmax.f32 %v2435_v48, 0.0  ;;  %v2436_v56 = vadd.f32 %v6893_v62, %v2421_v21  ;;  %v2580_v48 = vld [vmem:[#allocation2 + $0x10] sm:$0xf]  ;;  %v2583_v21 = vld [vmem:[#allocation2 + $0x14] sm:$0x1] }
 0x20d   : > { %v2441_v57 = vmax.f32 %v2433_v44, 0.0  ;;  %v2434_v59 = vadd.f32 %v6893_v62, %v2419_v50 }
 0x20e   : > { %v5264_v60 = vpack.c.bf16 %v2443_v51, %v2443_v51  ;;  %v2444_v61 = vmax.f32 %v2436_v56, 0.0 }
 0x20f   : > { %v5262_v1 = vpack.c.bf16 %v2441_v57, %v2441_v57  ;;  %v2442_v3 = vmax.f32 %v2434_v59, 0.0  ;;  %v5742_v5 = vpop.f32.mrb[4].mxu0 }
 0x210   : > { %v2510_v47 = vshrl.u32 %v5264_v60, 16  ;;  %v2513_v18 = vshll.u32 %v5264_v60, 16  ;;  %v5265_v11 = vpack.c.bf16 %v2444_v61, %v2444_v61  ;;  %v2424_v13 = vmul.f32 %v5742_v5, %v6888_v54  ;;  %v2388_v20 = vpop.f32.mrb[5].mxu0 }
 0x211   : > { %v2494_v23 = vshrl.u32 %v5262_v1, 16  ;;  %v2497_v15 = vshll.u32 %v5262_v1, 16  ;;  %v5263_v24 = vpack.c.bf16 %v2442_v3, %v2442_v3  ;;  %v2422_v40 = vmul.f32 %v6888_v54, %v2388_v20  ;;  %v5743_v28 = vpop.f32.mrb[6].mxu0 }
 0x212   : > { %v2512_v29 = vrot.slane %v2510_v47, 7  ;;  %v2518_v9 = vshrl.u32 %v5265_v11, 16  ;;  %v2521_v55 = vshll.u32 %v5265_v11, 16  ;;  %v2439_v53 = vadd.f32 %v6893_v62, %v2424_v13  ;;  %v2391_v30 = vpop.f32.mrb[7].mxu0  ;;  %v2610_v11 = vld [vmem:[#allocation2 + $0x38] sm:$0xf] }
 0x213   : > { %v2496_v4 = vrot.slane %v2494_v23, 7  ;;  %v2502_v7 = vshrl.u32 %v5263_v24, 16  ;;  %v2505_v34 = vshll.u32 %v5263_v24, 16  ;;  %v2437_v35 = vadd.f32 %v6893_v62, %v2422_v40 }
 0x214   : > { %v2515_v27 = vor.u32 %v2513_v18, %v2512_v29  ;;  %v2516_v32 = vrot.slane %v2512_v29, 4  ;;  %v2520_v36 = vrot.slane %v2518_v9, 7  ;;  %v2447_v41 = vmax.f32 %v2439_v53, 0.0  ;;  %v2601_v29 = vld [vmem:[#allocation2 + $0x2c] sm:$0x1] }
 0x215   : > { %v2499_v37 = vor.u32 %v2497_v15, %v2496_v4  ;;  %v2500_v38 = vrot.slane %v2496_v4, 4  ;;  %v2504_v25 = vrot.slane %v2502_v7, 7  ;;  %v2445_v42 = vmax.f32 %v2437_v35, 0.0  ;;  %v2613_v15 = vld [vmem:[#allocation2 + $0x3c] sm:$0x1] }
 0x216   : > { %v2587_v43 = vsel %vm6350_vm4, %v2515_v27, %v2586_v31  ;;  %v2590_v45 = vsel %vm6356_vm5, %v2516_v32, %v2589_v33  ;;  %v2523_v22 = vor.u32 %v2521_v55, %v2520_v36  ;;  %v2524_v46 = vrot.slane %v2520_v36, 4 }
 0x217   : > { %2588 = vst [vmem:[#allocation2 + $0x18] sm:$0xf] %v2587_v43  ;;  %2591 = vst [vmem:[#allocation2 + $0x1c] sm:$0x1] %v2590_v45  ;;  %v2575_v49 = vsel %vm6350_vm4, %v2499_v37, %v2574_v52  ;;  %v2578_v44 = vsel %vm6356_vm5, %v2500_v38, %v2577_v63  ;;  %v2507_v50 = vor.u32 %v2505_v34, %v2504_v25  ;;  %v2508_v51 = vrot.slane %v2504_v25, 4 }
 0x218   : > { %2576 = vst [vmem:[#allocation2 + $0x8] sm:$0xf] %v2575_v49  ;;  %2579 = vst [vmem:[#allocation2 + $0xc] sm:$0x1] %v2578_v44  ;;  %v2593_v56 = vsel %vm6350_vm4, %v2523_v22, %v2592_v8  ;;  %v2596_v57 = vsel %vm6356_vm5, %v2524_v46, %v2595_v14  ;;  %v5268_v59 = vpack.c.bf16 %v2447_v41, %v2447_v41  ;;  %v6941_v31 = vrot.slane %v2677_v26, 4 }
 0x219   : > { %v5266_v60 = vpack.c.bf16 %v2445_v42, %v2445_v42  ;;  %2594 = vst [vmem:[#allocation2 + $0x20] sm:$0xf] %v2593_v56  ;;  %2597 = vst [vmem:[#allocation2 + $0x24] sm:$0x1] %v2596_v57  ;;  %v2581_v61 = vsel %vm6350_vm4, %v2507_v50, %v2580_v48  ;;  %v2584_v1 = vsel %vm6356_vm5, %v2508_v51, %v2583_v21  ;;  %v6945_v33 = vrot.slane %v2680_v6, 5 }
 0x21a   : > { %v2425_v3 = vmul.f32 %v5743_v28, %v6888_v54  ;;  %v2423_v5 = vmul.f32 %v6888_v54, %v2391_v30  ;;  %2582 = vst [vmem:[#allocation2 + $0x10] sm:$0xf] %v2581_v61  ;;  %2585 = vst [vmem:[#allocation2 + $0x14] sm:$0x1] %v2584_v1  ;;  %v2542_v47 = vshrl.u32 %v5268_v59, 16  ;;  %v2545_v54 = vshll.u32 %v5268_v59, 16 }
 0x21b   : > { %v2526_v18 = vshrl.u32 %v5266_v60, 16  ;;  %v2529_v40 = vshll.u32 %v5266_v60, 16  ;;  %v2598_v28 = vld [vmem:[#allocation2 + $0x28] sm:$0xf]  ;;  %v2683_v63 = vsel %vm6394_vm8, %v6941_v31, %v6945_v33  ;;  %v2616_v38 = vld [vmem:[#allocation2 + $0x40] sm:$0xf] }
 0x21c   : > { %v2440_v13 = vadd.f32 %v6893_v62, %v2425_v3  ;;  %v2438_v20 = vadd.f32 %v6893_v62, %v2423_v5  ;;  %v2544_v23 = vrot.slane %v2542_v47, 7  ;;  %v2619_v14 = vld [vmem:[#allocation2 + $0x44] sm:$0x1]  ;;  %v2604_v42 = vld [vmem:[#allocation2 + $0x30] sm:$0xf] }
 0x21d   : > { %v2528_v24 = vrot.slane %v2526_v18, 7  ;;  %v2607_v49 = vld [vmem:[#allocation2 + $0x34] sm:$0x1] }
 0x21e   : > { %v2448_v52 = vmax.f32 %v2440_v13, 0.0  ;;  %v2446_v9 = vmax.f32 %v2438_v20, 0.0  ;;  %v2547_v55 = vor.u32 %v2545_v54, %v2544_v23  ;;  %v2548_v62 = vrot.slane %v2544_v23, 4  ;;  %v6947_v10 = vld [vmem:[#allocation2 + $0x18] sm:$0xf] }
 0x21f   : > { %v2531_v53 = vor.u32 %v2529_v40, %v2528_v24  ;;  %v2532_v30 = vrot.slane %v2528_v24, 4  ;;  %v6949_v4 = vld [vmem:[#allocation2 + $0x8] sm:$0xf]  ;;  %v6951_v6 = vld [vmem:[#allocation2 + $0xc] sm:$0x1]  ;;  %v2713_v37 = vshrl.u32 %v6947_v10, 16 }
 0x220   : > { %v5269_v17 = vpack.c.bf16 %v2448_v52, %v2448_v52  ;;  %v5267_v26 = vpack.c.bf16 %v2446_v9, %v2446_v9  ;;  %v2611_v7 = vsel %vm6350_vm4, %v2547_v55, %v2610_v11  ;;  %v2614_v34 = vsel %vm6356_vm5, %v2548_v62, %v2613_v15  ;;  %v6975_v57 = vld [vmem:[#allocation2 + $0x1c] sm:$0x1]  ;;  %v6979_v47 = vld [vmem:[#allocation2 + $0x20] sm:$0xf] }
 0x221   : > { %v2599_v35 = vsel %vm6350_vm4, %v2531_v53, %v2598_v28  ;;  %v2602_v27 = vsel %vm6356_vm5, %v2532_v30, %v2601_v29  ;;  %2612 = vst [vmem:[#allocation2 + $0x38] sm:$0xf] %v2611_v7  ;;  %2615 = vst [vmem:[#allocation2 + $0x3c] sm:$0x1] %v2614_v34  ;;  %v6965_v41 = vld [vmem:[#allocation2 + $0x10] sm:$0xf] }
 0x222   : > { %2600 = vst [vmem:[#allocation2 + $0x28] sm:$0xf] %v2599_v35  ;;  %2603 = vst [vmem:[#allocation2 + $0x2c] sm:$0x1] %v2602_v27  ;;  %v2550_v32 = vshrl.u32 %v5269_v17, 16  ;;  %v2553_v36 = vshll.u32 %v5269_v17, 16 }
 0x223   : > { %v2534_v8 = vshrl.u32 %v5267_v26, 16  ;;  %v2537_v25 = vshll.u32 %v5267_v26, 16  ;;  %v2685_v43 = vshrl.u32 %v6949_v4, 16  ;;  %v2688_v45 = vshll.u32 %v6949_v4, 16  ;;  %v6971_v46 = vld [vmem:[#allocation2 + $0x14] sm:$0x1] }
 0x224   : > { %v2694_v22 = vshll.u32 %v6951_v6, 16  ;;  %v2552_v48 = vrot.slane %v2550_v32, 7  ;;  %v2699_v44 = vshrl.u32 %v6965_v41, 16  ;;  %v2702_v50 = vshll.u32 %v6965_v41, 16  ;;  %v6995_v17 = vld [vmem:[#allocation2 + $0x24] sm:$0x1] }
 0x225   : > { %v2536_v21 = vrot.slane %v2534_v8, 7  ;;  %v2687_v51 = vrot.slane %v2685_v43, 4  ;;  %v2690_v56 = vrot.slane %v2688_v45, 5  ;;  %v2708_v59 = vshll.u32 %v6971_v46, 16 }
 0x226   : > { %v2716_v60 = vshll.u32 %v6947_v10, 16  ;;  %v2555_v61 = vor.u32 %v2553_v36, %v2552_v48  ;;  %v2556_v1 = vrot.slane %v2552_v48, 4  ;;  %v2696_v11 = vrot.slane %v2694_v22, 5 }
 0x227   : > { %v2539_v3 = vor.u32 %v2537_v25, %v2536_v21  ;;  %v2540_v5 = vrot.slane %v2536_v21, 4  ;;  %v2691_v18 = vor.u32 %v2690_v56, %v2687_v51  ;;  %v2701_v13 = vrot.slane %v2699_v44, 4 }
 0x228   : > { %v2704_v20 = vrot.slane %v2702_v50, 5  ;;  %v2617_v23 = vsel %vm6350_vm4, %v2555_v61, %v2616_v38  ;;  %v2620_v54 = vsel %vm6356_vm5, %v2556_v1, %v2619_v14  ;;  %v2715_v29 = vrot.slane %v2713_v37, 4  ;;  %v6998_v7 = vld [vmem:[#allocation2 + $0x38] sm:$0xf]  ;;  %v6190_v14 = vld [vmem:[%s7421_s4 + $0x8] sm:$0xff]  }
 0x229   : > { %v2605_v15 = vsel %vm6350_vm4, %v2539_v3, %v2604_v42  ;;  %v2608_v24 = vsel %vm6356_vm5, %v2540_v5, %v2607_v49  ;;  %2618 = vst [vmem:[#allocation2 + $0x40] sm:$0xf] %v2617_v23  ;;  %2621 = vst [vmem:[#allocation2 + $0x44] sm:$0x1] %v2620_v54  ;;  %v2692_v40 = vrot.slane %v2691_v18, 4  ;;  %v2718_v52 = vrot.slane %v2716_v60, 5 }
 0x22a   : > { %2606 = vst [vmem:[#allocation2 + $0x30] sm:$0xf] %v2605_v15  ;;  %2609 = vst [vmem:[#allocation2 + $0x34] sm:$0x1] %v2608_v24  ;;  %v2705_v28 = vor.u32 %v2704_v20, %v2701_v13  ;;  %v2710_v9 = vrot.slane %v2708_v59, 5  ;;  %v2722_v55 = vshll.u32 %v6975_v57, 16 }
 0x22b   : > { %v6990_v62 = vld [vmem:[#allocation2 + $0x28] sm:$0xf]  ;;  %v2727_v53 = vshrl.u32 %v6979_v47, 16  ;;  %v2697_v12 = vsel %vm6394_vm8, %v2692_v40, %v2696_v11  ;;  %v2719_v30 = vor.u32 %v2718_v52, %v2715_v29  ;;  %v2730_v26 = vshll.u32 %v6979_v47, 16  ;;  %v7007_v8 = vld [vmem:[#allocation2 + $0x2c] sm:$0x1] }
 0x22c   : > { %v2706_v16 = vrot.slane %v2705_v28, 4  ;;  %v5012_v34 = vcombine.low %v2683_v63, %v2697_v12  ;;  %v2724_v35 = vrot.slane %v2722_v55, 5  ;;  %v2741_v38 = vshrl.u32 %v6990_v62, 16  ;;  %v7015_v33 = vld [vmem:[#allocation2 + $0x3c] sm:$0x1]  ;;  %v6191_v40 = vld [vmem:[%s7421_s4 + $0x10] sm:$0xff]  }
 0x22d   : > { %v2729_v27 = vrot.slane %v2727_v53, 4  ;;  %v2720_v36 = vrot.slane %v2719_v30, 4  ;;  %v2732_v37 = vrot.slane %v2730_v26, 5  ;;  %v2736_v25 = vshll.u32 %v6995_v17, 16  ;;  %v3067_v61 = vld [vmem:[#allocation2 + $0x10] sm:$0xe] }
 0x22e   : > { %v2711_v32 = vsel %vm6394_vm8, %v2706_v16, %v2710_v9  ;;  %5760 = vmatprep.mubr.bf16.mxu1 %v5012_v34  ;;  %v2744_v31 = vshll.u32 %v6990_v62, 16  ;;  %v2769_v63 = vshrl.u32 %v6998_v7, 16  ;;  %v2743_v45 = vrot.slane %v2741_v38, 4  ;;  %v3068_v54 = vld [vmem:[#allocation2 + $0x18] sm:$0xe] }
 0x22f   : > { %v2725_v42 = vsel %vm6394_vm8, %v2720_v36, %v2724_v35  ;;  %v2733_v43 = vor.u32 %v2732_v37, %v2729_v27  ;;  %v2772_v22 = vshll.u32 %v6998_v7, 16  ;;  %v2750_v49 = vshll.u32 %v7007_v8, 16  ;;  %v6193_v34 = vld [vmem:[%s7421_s4 + $0x18] sm:$0xff]  }
 0x230   : > { %v5013_v48 = vcombine.low %v2711_v32, %v2725_v42  ;;  %v2746_v21 = vrot.slane %v2744_v31, 5  ;;  %v3099_v51 = vrot.slane %v6971_v46, 5  ;;  %v2738_v1 = vrot.slane %v2736_v25, 5  ;;  %v3072_v32 = vld [vmem:[#allocation2 + $0x38] sm:$0xe] }
 0x231   : > { %v7022_v44 = vld [vmem:[#allocation2 + $0x30] sm:$0xf]  ;;  %v2668_v50 = vld [vmem:[#allocation2 + $0x34] sm:$0x1]  ;;  %v2734_v56 = vrot.slane %v2733_v43, 4  ;;  %v2771_v5 = vrot.slane %v2769_v63, 4  ;;  %v5024_v63 = vcombine.low %v6883_v19, %v6949_v4 }
 0x232   : > { %v2755_v59 = vshrl.u32 %v7022_v44, 16  ;;  %v2758_v60 = vshll.u32 %v7022_v44, 16  ;;  %5761 = vmatmul.mubr.bf16.vlgmr.msra.gmra.mrb[0].mxu1 %v5013_v48  ;;  %v2747_v3 = vor.u32 %v2746_v21, %v2743_v45  ;;  %v2774_v18 = vrot.slane %v2772_v22, 5  ;;  %v3071_v26 = vld [vmem:[#allocation2 + $0x30] sm:$0xe]  ;;  %v6194_v45 = vld [vmem:[%s7421_s4 + $0x20] sm:$0xff]  }
 0x233   : > { %5769 = vmatpush3.bf16.msra.mxu1 %v6880_v39  ;;  %v2764_v20 = vshll.u32 %v2668_v50, 16  ;;  %v2778_v23 = vshll.u32 %v7015_v33, 16  ;;  %v3103_v46 = vrot.slane %v6975_v57, 5  ;;  %v2752_v24 = vrot.slane %v2750_v49, 5  ;;  %v6195_v4 = vld [vmem:[%s7421_s4 + $0x28] sm:$0xff]   ;;  %v6197_v21 = vld [vmem:[%s7421_s4 + $0x38] sm:$0xff]  }
 0x234   : > { %v2757_v11 = vrot.slane %v2755_v59, 4  ;;  %v2760_v13 = vrot.slane %v2758_v60, 5  ;;  %5770 = vmatprep.subr.bf16.mxu1 %v6190_v14  ;;  %v2748_v15 = vrot.slane %v2747_v3, 4  ;;  %v2775_v28 = vor.u32 %v2774_v18, %v2771_v5  ;;  %v6199_v49 = vld [vmem:[%s7421_s4 + $0x80] sm:$0xff]   ;;  %v6201_v59 = vld [vmem:[%s7421_s4 + $0x88] sm:$0xff]  }
 0x235   : > { %v2739_v29 = vsel %vm6394_vm8, %v2734_v56, %v2738_v1  ;;  %v5038_v55 = vrot.slane %v3067_v61, 9  ;;  %v5039_v53 = vrot.slane %v3068_v54, 9  ;;  %v2766_v16 = vrot.slane %v2764_v20, 5  ;;  %v6205_v18 = vld [vmem:[%s7421_s4 + $0xa0] sm:$0xff]  }
 0x236   : > { %v2761_v39 = vor.u32 %v2760_v13, %v2757_v11  ;;  %v2753_v52 = vsel %vm6394_vm8, %v2748_v15, %v2752_v24  ;;  %v2776_v9 = vrot.slane %v2775_v28, 4  ;;  %v2780_v30 = vrot.slane %v2778_v23, 5  ;;  %v3070_v11 = vld [vmem:[#allocation2 + $0x28] sm:$0xe]  ;;  %v6208_v13 = vld [vmem:[%s7421_s4 + $0xb8] sm:$0xff]  }
 0x237   : > { %5771 = vmatpush3.bf16.msra.mxu1 %v6190_v14  ;;  %v5014_v57 = vcombine.low %v2739_v29, %v2753_v52  ;;  %v7042_v35 = vsel %vm6496_vm11, %v5038_v55, %v3099_v51  ;;  %v7046_v27 = vsel %vm6496_vm11, %v5039_v53, %v3103_v46  ;;  %v5042_v25 = vrot.slane %v3071_v26, 9  ;;  %v3066_v51 = vld [vmem:[#allocation2 + $0x8] sm:$0xe]  ;;  %v3069_v20 = vld [vmem:[#allocation2 + $0x20] sm:$0xe]  ;;  %v6217_v26 = vld [vmem:[%s7421_s4 + $0xf8] sm:$0xff]  }
 0x238   : > { %v2762_v12 = vrot.slane %v2761_v39, 4  ;;  %5772 = vmatprep.subr.bf16.mxu1 %v6191_v40  ;;  %v2781_v37 = vsel %vm6394_vm8, %v2776_v9, %v2780_v30  ;;  %v5061_v38 = vcombine.low %v7042_v35, %v7046_v27  ;;  %v3115_v31 = vrot.slane %v2668_v50, 5  ;;  %v3065_v50 = vld [vmem:[#allocation2] sm:$0xe]  ;;  %v6213_v39 = vld [vmem:[%s7421_s4 + $0xd8] sm:$0xff]   ;;  %v6215_v55 = vld [vmem:[%s7421_s4 + $0xe8] sm:$0xff]  }
 0x239   : > { %5764 = vmatprep.mubr.bf16.mxu1 %v5014_v57  ;;  %v5043_v42 = vrot.slane %v3072_v32, 9  ;;  %v3119_v43 = vrot.slane %v7015_v33, 5  ;;  %v6196_v33 = vld [vmem:[%s7421_s4 + $0x30] sm:$0xff]   ;;  %v5025_v56 = vcombine.low %v6965_v41, %v6947_v10  ;;  %v5026_v60 = vcombine.low %v6979_v47, %v6990_v62  ;;  %v6209_v46 = vld [vmem:[%s7421_s4 + $0xc0] sm:$0xff]  }
 0x23a   : > { %v2767_v36 = vsel %vm6394_vm8, %v2762_v12, %v2766_v16  ;;  %v7062_v22 = vsel %vm6496_vm11, %v5042_v25, %v3115_v31  ;;  %v3091_v61 = vrot.slane %v6909_v0, 5  ;;  %v3095_v1 = vrot.slane %v6951_v6, 5  ;;  %v6203_v10 = vld [vmem:[%s7421_s4 + $0x90] sm:$0xff]   ;;  %v6204_v6 = vld [vmem:[%s7421_s4 + $0x98] sm:$0xff]   ;;  %v6214_v9 = vld [vmem:[%s7421_s4 + $0xe0] sm:$0xff]  }
 0x23b   : > { %v5015_v14 = vcombine.low %v2767_v36, %v2781_v37  ;;  %5773 = vmatpush3.bf16.msra.mxu1 %v6191_v40  ;;  %v7066_v48 = vsel %vm6496_vm11, %v5043_v42, %v3119_v43  ;;  %v5036_v3 = vrot.slane %v3065_v50, 9  ;;  %v5037_v5 = vrot.slane %v3066_v51, 9  ;;  %v6212_v52 = vld [vmem:[#allocation2 + $0x8] ss:$8 sps:$4 sm:$0xff]   ;;  %v6219_v36 = vld [vmem:[%s7421_s4 + $0x100] sm:$0xff]  }
 0x23c   : > { %5774 = vmatprep.subr.bf16.mxu1 %v6193_v34  ;;  %v5063_v19 = vcombine.low %v7062_v22, %v7066_v48  ;;  %v5027_v0 = vcombine.low %v7022_v44, %v6998_v7  ;;  %v6206_v7 = vld [vmem:[%s7421_s4 + $0xa8] sm:$0xff]   ;;  %v6207_v44 = vld [vmem:[%s7421_s4 + $0xb0] sm:$0xff]   ;;  %v5041_v23 = vrot.slane %v3070_v11, 9  ;;  %v3111_v54 = vrot.slane %v7007_v8, 5  ;;  %v6222_v51 = vld [vmem:[#allocation2 + $0x38] ss:$8 sps:$4 sm:$0xff]  }
 0x23d   : > { %5765 = vmatmul.mubr.bf16.gmra.mrb[4].mxu1 %v5015_v14  ;;  %v3092_v41 = vsel %vm6496_vm11, %v5036_v3, %v3091_v61  ;;  %v3096_v47 = vsel %vm6496_vm11, %v5037_v5, %v3095_v1  ;;  %v5040_v15 = vrot.slane %v3069_v20, 9  ;;  %v3107_v24 = vrot.slane %v6995_v17, 5  ;;  %v6210_v8 = vld [vmem:[%s7421_s4 + $0xc8] sm:$0xff]   ;;  %v6211_v17 = vld [vmem:[%s7421_s4 + $0xd0] sm:$0xff]   ;;  %v3451_v61 = vld [vmem:[#allocation2 + $0x20] sm:$0xf] }
 0x23e   : > { %5784 = vmatprep.mubr.bf16.mxu1 %v5024_v63  ;;  %v5060_v62 = vcombine.low %v3092_v41, %v3096_v47  ;;  %v3112_v40 = vsel %vm6496_vm11, %v5041_v23, %v3111_v54  ;;  %v3447_v53 = vld [vmem:[#allocation2 + $0x10] sm:$0xf]  ;;  %v3445_v12 = vld [vmem:[#allocation2 + $0x8] sm:$0xf]  ;;  %v7154_v14 = vld [vmem:[#allocation2 + $0x14] sm:$0x1] }
 0x23f   : > { %5775 = vmatpush3.bf16.msra.mxu1 %v6193_v34  ;;  %v3108_v28 = vsel %vm6496_vm11, %v5040_v15, %v3107_v24  ;;  %v6216_v57 = vld [vmem:[%s7421_s4 + $0xf0] sm:$0xff]   ;;  %v3476_v16 = vshrl.u32 %v3447_v53, 16  ;;  %v3479_v30 = vshll.u32 %v3447_v53, 16  ;;  %v3462_v34 = vshrl.u32 %v3445_v12, 16  ;;  %v7156_v31 = vld [vmem:[#allocation2 + $0xc] sm:$0x1] }
 0x240   : > { %5776 = vmatprep.subr.bf16.mxu1 %v6194_v45  ;;  %v5062_v29 = vcombine.low %v3108_v28, %v3112_v40  ;;  %v3465_v35 = vshll.u32 %v3445_v12, 16  ;;  %v6218_v63 = vld [vmem:[#allocation2 + $0x18] ss:$8 sps:$4 sm:$0xff]   ;;  %v6221_v42 = vld [vmem:[%s7421_s4 + $0x108] sm:$0xff]   ;;  %v3471_v48 = vshll.u32 %v7156_v31, 16  ;;  %v3507_v41 = vshll.u32 %v3451_v61, 16 }
 0x241   : > { %v3478_v27 = vrot.slane %v3476_v16, 4  ;;  %v3481_v32 = vrot.slane %v3479_v30, 5  ;;  %v3464_v37 = vrot.slane %v3462_v34, 4  ;;  %v6220_v22 = vld [vmem:[#allocation2 + $0x28] ss:$8 sps:$4 sm:$0xff]   ;;  %v6225_v3 = vld [vmem:[%s7421_s4 + $0x120] sm:$0xff]  }
 0x242   : > { %v3455_v1 = vld [vmem:[#allocation2 + $0x30] sm:$0xf]  ;;  %v3449_v5 = vld [vmem:[#allocation2 + $0x18] sm:$0xf]  ;;  %v3453_v47 = vld [vmem:[#allocation2 + $0x28] sm:$0xf] }
 0x243   : > { %5777 = vmatpush3.bf16.msra.mxu1 %v6194_v45  ;;  %v3482_v25 = vor.u32 %v3481_v32, %v3478_v27  ;;  %v3485_v45 = vshll.u32 %v7154_v14, 16  ;;  %v3521_v11 = vshll.u32 %v3453_v47, 16  ;;  %v3509_v20 = vrot.slane %v3507_v41, 5  ;;  %v6227_v15 = vld [vmem:[%s7421_s4 + $0x130] sm:$0xff]   ;;  %v7182_v28 = vld [vmem:[#allocation2 + $0x24] sm:$0x1] }
 0x244   : > { %5778 = vmatprep.subr.bf16.mxu1 %v6195_v4  ;;  %v7186_v53 = vld [vmem:[#allocation2 + $0x1c] sm:$0x1]  ;;  %v3513_v16 = vshll.u32 %v7182_v28, 16  ;;  %v7189_v30 = vld [vmem:[#allocation2 + $0x2c] sm:$0x1] }
 0x247   : > { %5779 = vmatpush3.bf16.msra.mxu1 %v6195_v4  ;;  %v6223_v4 = vld [vmem:[%s7421_s4 + $0x110] sm:$0xff]  }
 0x248   : > { %5780 = vmatprep.subr.bf16.mxu1 %v6196_v33 }
 0x24b   : > { %5781 = vmatpush3.bf16.msra.mxu1 %v6196_v33 }
 0x24c   : > { %5782 = vmatprep.subr.bf16.mxu1 %v6197_v21 }
 0x24f   : > { %5783 = vmatpush3.bf16.msra.mxu1 %v6197_v21  ;;  %v3487_v21 = vrot.slane %v3485_v45, 5  ;;  %v3515_v45 = vrot.slane %v3513_v16, 5  ;;  %v3729_v16 = vld [vmem:[#allocation2 + $0x18] sm:$0xe] }
 0x250   : > { %5792 = vmatprep.subr.bf16.mxu1 %v6199_v49 }
 0x252   : > { %5785 = vmatmul.mubr.bf16.vlgmr.msra.gmra.mrb[0].mxu1 %v5025_v56 }
 0x253   : > { %5788 = vmatprep.mubr.bf16.mxu1 %v5026_v60  ;;  %5793 = vmatpush3.bf16.msra.mxu1 %v6199_v49  ;;  %v3473_v49 = vrot.slane %v3471_v48, 5 }
 0x254   : > { %5794 = vmatprep.subr.bf16.mxu1 %v6201_v59 }
 0x257   : > { %5795 = vmatpush3.bf16.msra.mxu1 %v6201_v59  ;;  %v6224_v59 = vld [vmem:[%s7421_s4 + $0x118] sm:$0xff]  }
 0x258   : > { %5796 = vmatprep.subr.bf16.mxu1 %v6203_v10 }
 0x25a   : > { %5789 = vmatmul.mubr.bf16.gmra.mrb[4].mxu1 %v5027_v0  ;;  %v3532_v0 = vshrl.u32 %v3455_v1, 16 }
 0x25b   : > { %5797 = vmatpush3.bf16.msra.mxu1 %v6203_v10  ;;  %5808 = vmatprep.mubr.bf16.mxu1 %v5060_v62  ;;  %v3504_v10 = vshrl.u32 %v3451_v61, 16  ;;  %v3490_v62 = vshrl.u32 %v3449_v5, 16 }
 0x25c   : > { %5798 = vmatprep.subr.bf16.mxu1 %v6204_v6  ;;  %v3534_v23 = vrot.slane %v3532_v0, 4 }
 0x25d   : > { %v3492_v24 = vrot.slane %v3490_v62, 4 }
 0x25f   : > { %5799 = vmatpush3.bf16.msra.mxu1 %v6204_v6  ;;  %v3535_v6 = vshll.u32 %v3455_v1, 16 }
 0x260   : > { %5800 = vmatprep.subr.bf16.mxu1 %v6205_v18 }
 0x261   : > { %v3537_v54 = vrot.slane %v3535_v6, 5 }
 0x263   : > { %5801 = vmatpush3.bf16.msra.mxu1 %v6205_v18  ;;  %v3493_v18 = vshll.u32 %v3449_v5, 16  ;;  %v3728_v5 = vld [vmem:[#allocation2 + $0x10] sm:$0xe] }
 0x264   : > { %5802 = vmatprep.subr.bf16.mxu1 %v6206_v7 }
 0x265   : > { %v3495_v40 = vrot.slane %v3493_v18, 5  ;;  %v3727_v18 = vld [vmem:[#allocation2 + $0x8] sm:$0xe] }
 0x267   : > { %5803 = vmatpush3.bf16.msra.mxu1 %v6206_v7  ;;  %v6226_v7 = vld [vmem:[%s7421_s4 + $0x128] sm:$0xff]   ;;  %v3496_v12 = vor.u32 %v3495_v40, %v3492_v24 }
 0x268   : > { %5804 = vmatprep.subr.bf16.mxu1 %v6207_v44 }
 0x26b   : > { %5805 = vmatpush3.bf16.msra.mxu1 %v6207_v44  ;;  %v3518_v44 = vshrl.u32 %v3453_v47, 16  ;;  %v6230_v47 = vld [vmem:[%s7421_s4 + $0x148] sm:$0xff]  }
 0x26c   : > { %5806 = vmatprep.subr.bf16.mxu1 %v6208_v13 }
 0x26f   : > { %5807 = vmatpush3.bf16.msra.mxu1 %v6208_v13  ;;  %v3506_v13 = vrot.slane %v3504_v10, 4 }
 0x270   : > { %5816 = vmatprep.subr.bf16.mxu1 %v6209_v46 }
 0x272   : > { %5809 = vmatmul.mubr.bf16.vlgmr.msra.gmra.mrb[0].mxu1 %v5061_v38  ;;  %v3467_v38 = vrot.slane %v3465_v35, 5  ;;  %v6228_v35 = vld [vmem:[%s7421_s4 + $0x138] sm:$0xff]  }
 0x273   : > { %5812 = vmatprep.mubr.bf16.mxu1 %v5062_v29  ;;  %5817 = vmatpush3.bf16.msra.mxu1 %v6209_v46  ;;  %v3459_v46 = vld [vmem:[#allocation2 + $0x40] sm:$0xf]  ;;  %v3523_v29 = vrot.slane %v3521_v11, 5 }
 0x274   : > { %5818 = vmatprep.subr.bf16.mxu1 %v6210_v8  ;;  %v3468_v43 = vor.u32 %v3467_v38, %v3464_v37 }
 0x276   : > { %v3469_v33 = vrot.slane %v3468_v43, 4  ;;  %v3497_v43 = vrot.slane %v3496_v12, 4  ;;  %v6236_v12 = vld [vmem:[%s7421_s4 + $0x178] sm:$0xff]  }
 0x277   : > { %5819 = vmatpush3.bf16.msra.mxu1 %v6210_v8  ;;  %v3520_v8 = vrot.slane %v3518_v44, 4  ;;  %v3757_v44 = vrot.slane %v7154_v14, 5 }
 0x278   : > { %5820 = vmatprep.subr.bf16.mxu1 %v6211_v17  ;;  %v3474_v56 = vsel %vm6394_vm8, %v3469_v33, %v3473_v49 }
 0x279   : > { %v3524_v27 = vor.u32 %v3523_v29, %v3520_v8 }
 0x27a   : > { %5813 = vmatmul.mubr.bf16.gmra.mrb[4].mxu1 %v5063_v19  ;;  %v3483_v19 = vrot.slane %v3482_v25, 4 }
 0x27b   : > { %5821 = vmatpush3.bf16.msra.mxu1 %v6211_v17  ;;  %5832 = vmatprep.mubr.bf16.mxu1 %v6212_v52  ;;  %v3457_v17 = vld [vmem:[#allocation2 + $0x38] sm:$0xf]  ;;  %v7184_v52 = vld [vmem:[#allocation2 + $0x34] sm:$0x1] }
 0x27c   : > { %5822 = vmatprep.subr.bf16.mxu1 %v6213_v39  ;;  %v3488_v50 = vsel %vm6394_vm8, %v3483_v19, %v3487_v21  ;;  %v3549_v34 = vshll.u32 %v3457_v17, 16  ;;  %v3541_v32 = vshll.u32 %v7184_v52, 16  ;;  %v6229_v19 = vld [vmem:[%s7421_s4 + $0x140] sm:$0xff]  }
 0x27d   : > { %v5116_v60 = vcombine.low %v3474_v56, %v3488_v50  ;;  %v7200_v21 = vld [vmem:[#allocation2 + $0x44] sm:$0x1] }
 0x27e   : > { %v3551_v48 = vrot.slane %v3549_v34, 5  ;;  %v3543_v33 = vrot.slane %v3541_v32, 5  ;;  %v3765_v34 = vrot.slane %v7182_v28, 5  ;;  %v3773_v32 = vrot.slane %v7184_v52, 5 }
 0x27f   : > { %5823 = vmatpush3.bf16.msra.mxu1 %v6213_v39  ;;  %v3510_v39 = vor.u32 %v3509_v20, %v3506_v13  ;;  %v6231_v20 = vld [vmem:[%s7421_s4 + $0x150] sm:$0xff]  }
 0x280   : > { %5824 = vmatprep.subr.bf16.mxu1 %v6214_v9 }
 0x281   : > { %v3511_v37 = vrot.slane %v3510_v39, 4  ;;  %v6234_v39 = vld [vmem:[%s7421_s4 + $0x168] sm:$0xff]  }
 0x283   : > { %5825 = vmatpush3.bf16.msra.mxu1 %v6214_v9  ;;  %v3560_v9 = vshrl.u32 %v3459_v46, 16  ;;  %v3516_v50 = vsel %vm6394_vm8, %v3511_v37, %v3515_v45  ;;  %v3761_v37 = vrot.slane %v7186_v53, 5 }
 0x284   : > { %5826 = vmatprep.subr.bf16.mxu1 %v6215_v55 }
 0x285   : > { %v3562_v38 = vrot.slane %v3560_v9, 4  ;;  %v6235_v9 = vld [vmem:[%s7421_s4 + $0x170] sm:$0xff]  }
 0x287   : > { %5827 = vmatpush3.bf16.msra.mxu1 %v6215_v55  ;;  %v3563_v55 = vshll.u32 %v3459_v46, 16 }
 0x288   : > { %5828 = vmatprep.subr.bf16.mxu1 %v6216_v57 }
 0x289   : > { %v3565_v25 = vrot.slane %v3563_v55, 5  ;;  %v3730_v55 = vld [vmem:[#allocation2 + $0x20] sm:$0xe] }
 0x28b   : > { %5829 = vmatpush3.bf16.msra.mxu1 %v6216_v57  ;;  %v3538_v57 = vor.u32 %v3537_v54, %v3534_v23  ;;  %v5128_v23 = vrot.slane %v3727_v18, 9  ;;  %v3753_v54 = vrot.slane %v7156_v31, 5  ;;  %v6232_v31 = vld [vmem:[%s7421_s4 + $0x158] sm:$0xff]  }
 0x28c   : > { %5830 = vmatprep.subr.bf16.mxu1 %v6217_v26 }
 0x28d   : > { %v3754_v8 = vsel %vm6496_vm11, %v5128_v23, %v3753_v54  ;;  %v7292_v54 = vld [vmem:[#allocation2 + $0x1c] sm:$0x1] }
 0x28f   : > { %5831 = vmatpush3.bf16.msra.mxu1 %v6217_v26  ;;  %v3546_v26 = vshrl.u32 %v3457_v17, 16  ;;  %v6233_v17 = vld [vmem:[%s7421_s4 + $0x160] sm:$0xff]  }
 0x290   : > { %5840 = vmatprep.subr.bf16.mxu1 %v6219_v36 }
 0x292   : > { %5833 = vmatmul.mubr.bf16.vlgmr.msra.gmra.mrb[0].mxu1 %v6218_v63  ;;  %v3527_v63 = vshll.u32 %v7189_v30, 16 }
 0x293   : > { %5836 = vmatprep.mubr.bf16.mxu1 %v6220_v22  ;;  %5841 = vmatpush3.bf16.msra.mxu1 %v6219_v36  ;;  %v3499_v36 = vshll.u32 %v7186_v53, 16  ;;  %v3548_v22 = vrot.slane %v3546_v26, 4  ;;  %v5131_v26 = vrot.slane %v3730_v55, 9 }
 0x294   : > { %5842 = vmatprep.subr.bf16.mxu1 %v6221_v42  ;;  %v3529_v56 = vrot.slane %v3527_v63, 5  ;;  %v3769_v63 = vrot.slane %v7189_v30, 5  ;;  %v6238_v30 = vld [vmem:[%s7421_s4 + $0x188] sm:$0xff]  }
 0x295   : > { %v3501_v49 = vrot.slane %v3499_v36, 5  ;;  %v3552_v1 = vor.u32 %v3551_v48, %v3548_v22  ;;  %v5130_v36 = vrot.slane %v3729_v16, 9  ;;  %v3733_v22 = vld [vmem:[#allocation2 + $0x38] sm:$0xe] }
 0x296   : > { %v6252_v16 = vld [vmem:[%s7421_s4 + $0x1d8] sm:$0xff]  }
 0x297   : > { %5843 = vmatpush3.bf16.msra.mxu1 %v6221_v42  ;;  %v3539_v42 = vrot.slane %v3538_v57, 4  ;;  %v3502_v61 = vsel %vm6394_vm8, %v3497_v43, %v3501_v49  ;;  %v3553_v11 = vrot.slane %v3552_v1, 4  ;;  %v3732_v57 = vld [vmem:[#allocation2 + $0x30] sm:$0xe]  ;;  %v3734_v43 = vld [vmem:[#allocation2 + $0x40] sm:$0xe]  ;;  %v3762_v52 = vsel %vm6496_vm11, %v5130_v36, %v3761_v37 }
 0x298   : > { %5844 = vmatprep.subr.bf16.mxu1 %v6223_v4  ;;  %v5117_v10 = vcombine.low %v3502_v61, %v3516_v50  ;;  %v6239_v50 = vld [vmem:[%s7421_s4 + $0x190] sm:$0xff]   ;;  %v6243_v1 = vld [vmem:[%s7421_s4 + $0x1a8] sm:$0xff]  }
 0x299   : > { %v6240_v61 = vld [vmem:[#allocation2 + $0x10] ss:$8 sps:$4 sm:$0xff]  }
 0x29a   : > { %5837 = vmatmul.mubr.bf16.gmra.mrb[4].mxu1 %v6222_v51  ;;  %v3566_v51 = vor.u32 %v3565_v25, %v3562_v38  ;;  %v6237_v38 = vld [vmem:[%s7421_s4 + $0x180] sm:$0xff]  }
 0x29b   : > { %5845 = vmatpush3.bf16.msra.mxu1 %v6223_v4  ;;  %5856 = vmatprep.mubr.bf16.mxu1 %v5116_v60  ;;  %v3525_v4 = vrot.slane %v3524_v27, 4  ;;  %v7206_v60 = vld [vmem:[#allocation2 + $0x3c] sm:$0x1]  ;;  %v5133_v27 = vrot.slane %v3732_v57, 9  ;;  %v6250_v57 = vld [vmem:[#allocation2 + $0x40] ss:$8 sps:$4 sm:$0xff]  }
 0x29c   : > { %5846 = vmatprep.subr.bf16.mxu1 %v6224_v59  ;;  %v3555_v6 = vshll.u32 %v7206_v60, 16  ;;  %v3567_v62 = vrot.slane %v3566_v51, 4  ;;  %v3777_v49 = vrot.slane %v7206_v60, 5  ;;  %v6242_v60 = vld [vmem:[%s7421_s4 + $0x1a0] sm:$0xff]  }
 0x29d   : > { %v3530_v41 = vsel %vm6394_vm8, %v3525_v4, %v3529_v56  ;;  %v3774_v28 = vsel %vm6496_vm11, %v5133_v27, %v3773_v32  ;;  %v3781_v4 = vrot.slane %v7200_v21, 5  ;;  %v6253_v27 = vld [vmem:[%s7421_s4 + $0x1e0] sm:$0xff]  }
 0x29e   : > { %v3557_v46 = vrot.slane %v3555_v6, 5  ;;  %v4112_v32 = vld [vmem:[#allocation2 + $0x20] sm:$0xf] }
 0x29f   : > { %5847 = vmatpush3.bf16.msra.mxu1 %v6224_v59  ;;  %v3544_v59 = vsel %vm6394_vm8, %v3539_v42, %v3543_v33  ;;  %v3766_v42 = vsel %vm6496_vm11, %v5131_v26, %v3765_v34  ;;  %v5134_v33 = vrot.slane %v3733_v22, 9  ;;  %v4114_v34 = vld [vmem:[#allocation2 + $0x28] sm:$0xf] }
 0x2a0   : > { %5848 = vmatprep.subr.bf16.mxu1 %v6225_v3  ;;  %v5118_v0 = vcombine.low %v3530_v41, %v3544_v59  ;;  %v3558_v14 = vsel %vm6394_vm8, %v3553_v11, %v3557_v46  ;;  %v5153_v53 = vcombine.low %v3762_v52, %v3766_v42  ;;  %v6246_v46 = vld [vmem:[#allocation2 + $0x20] ss:$8 sps:$4 sm:$0xff]   ;;  %v4167_v36 = vshrl.u32 %v4114_v34, 16 }
 0x2a1   : > { %v3778_v56 = vsel %vm6496_vm11, %v5134_v33, %v3777_v49  ;;  %v4170_v37 = vshll.u32 %v4114_v34, 16  ;;  %v4153_v42 = vshrl.u32 %v4112_v32, 16 }
 0x2a3   : > { %5849 = vmatpush3.bf16.msra.mxu1 %v6225_v3  ;;  %v3569_v3 = vshll.u32 %v7200_v21, 16  ;;  %v6241_v21 = vld [vmem:[%s7421_s4 + $0x198] sm:$0xff]   ;;  %v4172_v22 = vrot.slane %v4170_v37, 5  ;;  %v4155_v33 = vrot.slane %v4153_v42, 4 }
 0x2a4   : > { %5850 = vmatprep.subr.bf16.mxu1 %v6226_v7 }
 0x2a5   : > { %v3571_v13 = vrot.slane %v3569_v3, 5  ;;  %v4108_v3 = vld [vmem:[#allocation2 + $0x10] sm:$0xf] }
 0x2a6   : > { %v4125_v41 = vshrl.u32 %v4108_v3, 16 }
 0x2a7   : > { %5851 = vmatpush3.bf16.msra.mxu1 %v6226_v7  ;;  %v5129_v7 = vrot.slane %v3728_v5, 9  ;;  %v6244_v5 = vld [vmem:[%s7421_s4 + $0x1b0] sm:$0xff]  }
 0x2a8   : > { %5852 = vmatprep.subr.bf16.mxu1 %v6227_v15  ;;  %v4127_v18 = vrot.slane %v4125_v41, 4 }
 0x2a9   : > { %v3758_v24 = vsel %vm6496_vm11, %v5129_v7, %v3757_v44  ;;  %v6247_v44 = vld [vmem:[%s7421_s4 + $0x1c0] sm:$0xff]  }
 0x2aa   : > { %v5152_v29 = vcombine.low %v3754_v8, %v3758_v24 }
 0x2ab   : > { %5853 = vmatpush3.bf16.msra.mxu1 %v6227_v15  ;;  %v3572_v15 = vsel %vm6394_vm8, %v3567_v62, %v3571_v13 }
 0x2ac   : > { %5854 = vmatprep.subr.bf16.mxu1 %v6228_v35  ;;  %v5119_v40 = vcombine.low %v3558_v14, %v3572_v15  ;;  %v6249_v15 = vld [vmem:[%s7421_s4 + $0x1c8] sm:$0xff]  }
 0x2af   : > { %5855 = vmatpush3.bf16.msra.mxu1 %v6228_v35  ;;  %v3731_v35 = vld [vmem:[#allocation2 + $0x28] sm:$0xe] }
 0x2b0   : > { %5864 = vmatprep.subr.bf16.mxu1 %v6229_v19  ;;  %v5132_v25 = vrot.slane %v3731_v35, 9  ;;  %v4116_v35 = vld [vmem:[#allocation2 + $0x30] sm:$0xf] }
 0x2b2   : > { %5857 = vmatmul.mubr.bf16.vlgmr.msra.gmra.mrb[0].mxu1 %v5117_v10  ;;  %v3770_v45 = vsel %vm6496_vm11, %v5132_v25, %v3769_v63  ;;  %v4110_v10 = vld [vmem:[#allocation2 + $0x18] sm:$0xf]  ;;  %v4181_v25 = vshrl.u32 %v4116_v35, 16  ;;  %v4184_v63 = vshll.u32 %v4116_v35, 16 }
 0x2b3   : > { %5860 = vmatprep.mubr.bf16.mxu1 %v5118_v0  ;;  %5865 = vmatpush3.bf16.msra.mxu1 %v6229_v19  ;;  %v5154_v48 = vcombine.low %v3770_v45, %v3774_v28  ;;  %v5135_v19 = vrot.slane %v3734_v43, 9  ;;  %v6245_v0 = vld [vmem:[%s7421_s4 + $0x1b8] sm:$0xff]   ;;  %v4139_v6 = vshrl.u32 %v4110_v10, 16  ;;  %v4142_v62 = vshll.u32 %v4110_v10, 16  ;;  %v6254_v43 = vld [vmem:[%s7421_s4 + $0x1e8] sm:$0xff]  }
 0x2b4   : > { %5866 = vmatprep.subr.bf16.mxu1 %v6230_v47  ;;  %v4156_v28 = vshll.u32 %v4112_v32, 16  ;;  %v4122_v45 = vld [vmem:[#allocation2 + $0x48] sm:$0xf]  ;;  %v7322_v10 = vld [vmem:[#allocation2 + $0x24] sm:$0x1] }
 0x2b5   : > { %v3782_v51 = vsel %vm6496_vm11, %v5135_v19, %v3781_v4  ;;  %v4141_v11 = vrot.slane %v4139_v6, 4  ;;  %v4144_v13 = vrot.slane %v4142_v62, 5  ;;  %v4186_v19 = vrot.slane %v4184_v63, 5  ;;  %v4120_v4 = vld [vmem:[#allocation2 + $0x40] sm:$0xf]  ;;  %v6256_v62 = vld [vmem:[%s7421_s4 + $0x1f8] sm:$0xff]  }
 0x2b6   : > { %v5155_v59 = vcombine.low %v3778_v56, %v3782_v51  ;;  %v4158_v49 = vrot.slane %v4156_v28, 5  ;;  %v6255_v51 = vld [vmem:[%s7421_s4 + $0x1f0] sm:$0xff]   ;;  %v7318_v56 = vld [vmem:[#allocation2 + $0x2c] sm:$0x1]  ;;  %v7325_v6 = vld [vmem:[#allocation2 + $0x3c] sm:$0x1] }
 0x2b7   : > { %5867 = vmatpush3.bf16.msra.mxu1 %v6230_v47  ;;  %v4128_v47 = vshll.u32 %v4108_v3, 16  ;;  %v4145_v14 = vor.u32 %v4144_v13, %v4141_v11  ;;  %v4209_v3 = vshrl.u32 %v4120_v4, 16  ;;  %v4162_v13 = vshll.u32 %v7322_v10, 16 }
 0x2b8   : > { %5868 = vmatprep.subr.bf16.mxu1 %v6231_v20 }
 0x2b9   : > { %v4130_v7 = vrot.slane %v4128_v47, 5  ;;  %v4159_v47 = vor.u32 %v4158_v49, %v4155_v33 }
 0x2ba   : > { %5861 = vmatmul.mubr.bf16.gmra.mrb[4].mxu1 %v5119_v40  ;;  %v6248_v40 = vld [vmem:[#allocation2 + $0x30] ss:$8 sps:$4 sm:$0xff]  }
 0x2bb   : > { %5869 = vmatpush3.bf16.msra.mxu1 %v6231_v20  ;;  %5880 = vmatprep.mubr.bf16.mxu1 %v5152_v29  ;;  %v7290_v20 = vld [vmem:[#allocation2 + $0x14] sm:$0x1]  ;;  %v4131_v23 = vor.u32 %v4130_v7, %v4127_v18 }
 0x2bc   : > { %5870 = vmatprep.subr.bf16.mxu1 %v6232_v31  ;;  %v4134_v24 = vshll.u32 %v7290_v20, 16  ;;  %v6251_v29 = vld [vmem:[%s7421_s4 + $0x1d0] sm:$0xff]  }
 0x2bd   : > { %v4132_v8 = vrot.slane %v4131_v23, 4 }
 0x2bf   : > { %5871 = vmatpush3.bf16.msra.mxu1 %v6232_v31  ;;  %v4148_v31 = vshll.u32 %v7292_v54, 16 }
 0x2c0   : > { %5872 = vmatprep.subr.bf16.mxu1 %v6233_v17 }
 0x2c1   : > { %v4150_v55 = vrot.slane %v4148_v31, 5  ;;  %v7333_v31 = vld [vmem:[#allocation2 + $0x4c] sm:$0x1] }
 0x2c3   : > { %5873 = vmatpush3.bf16.msra.mxu1 %v6233_v17  ;;  %v4136_v17 = vrot.slane %v4134_v24, 5 }
 0x2c4   : > { %5874 = vmatprep.subr.bf16.mxu1 %v6234_v39 }
 0x2c7   : > { %5875 = vmatpush3.bf16.msra.mxu1 %v6234_v39  ;;  %v4146_v39 = vrot.slane %v4145_v14, 4  ;;  %v4204_v14 = vshll.u32 %v7325_v6, 16 }
 0x2c8   : > { %5876 = vmatprep.subr.bf16.mxu1 %v6235_v9 }
 0x2c9   : > { %v4206_v35 = vrot.slane %v4204_v14, 5 }
 0x2cb   : > { %5877 = vmatpush3.bf16.msra.mxu1 %v6235_v9  ;;  %v4137_v9 = vsel %vm6394_vm8, %v4132_v8, %v4136_v17 }
 0x2cc   : > { %5878 = vmatprep.subr.bf16.mxu1 %v6236_v12 }
 0x2cf   : > { %5879 = vmatpush3.bf16.msra.mxu1 %v6236_v12  ;;  %v4151_v12 = vsel %vm6394_vm8, %v4146_v39, %v4150_v55 }
 0x2d0   : > { %5888 = vmatprep.subr.bf16.mxu1 %v6237_v38  ;;  %v5208_v26 = vcombine.low %v4137_v9, %v4151_v12  ;;  %v7338_v9 = vld [vmem:[#allocation2 + $0x44] sm:$0x1] }
 0x2d1   : > { %v4218_v32 = vshll.u32 %v7338_v9, 16 }
 0x2d2   : > { %5881 = vmatmul.mubr.bf16.vlgmr.msra.gmra.mrb[0].mxu1 %v5153_v53 }
 0x2d3   : > { %5884 = vmatprep.mubr.bf16.mxu1 %v5154_v48  ;;  %5889 = vmatpush3.bf16.msra.mxu1 %v6237_v38  ;;  %v4118_v38 = vld [vmem:[#allocation2 + $0x38] sm:$0xf]  ;;  %v4183_v48 = vrot.slane %v4181_v25, 4  ;;  %v6258_v25 = vld [vmem:[%s7421_s4 + $0x208] sm:$0xff]  }
 0x2d4   : > { %5890 = vmatprep.subr.bf16.mxu1 %v6238_v30  ;;  %v4195_v52 = vshrl.u32 %v4118_v38, 16  ;;  %v4198_v53 = vshll.u32 %v4118_v38, 16 }
 0x2d5   : > { %v4187_v41 = vor.u32 %v4186_v19, %v4183_v48  ;;  %v4420_v19 = vrot.slane %v7292_v54, 5 }
 0x2d7   : > { %5891 = vmatpush3.bf16.msra.mxu1 %v6238_v30  ;;  %v4169_v30 = vrot.slane %v4167_v36, 4  ;;  %v4188_v24 = vrot.slane %v4187_v41, 4  ;;  %v4390_v36 = vld [vmem:[#allocation2 + $0x10] sm:$0xe] }
 0x2d8   : > { %5892 = vmatprep.subr.bf16.mxu1 %v6239_v50 }
 0x2da   : > { %5885 = vmatmul.mubr.bf16.gmra.mrb[4].mxu1 %v5155_v59  ;;  %v4197_v59 = vrot.slane %v4195_v52, 4  ;;  %v4391_v52 = vld [vmem:[#allocation2 + $0x18] sm:$0xe] }
 0x2db   : > { %5893 = vmatpush3.bf16.msra.mxu1 %v6239_v50  ;;  %5904 = vmatprep.mubr.bf16.mxu1 %v6240_v61  ;;  %v4223_v50 = vshrl.u32 %v4122_v45, 16  ;;  %v4226_v61 = vshll.u32 %v4122_v45, 16  ;;  %v4416_v45 = vrot.slane %v7290_v20, 5  ;;  %v5221_v48 = vrot.slane %v4391_v52, 9 }
 0x2dc   : > { %5894 = vmatprep.subr.bf16.mxu1 %v6241_v21 }
 0x2dd   : > { %v4228_v11 = vrot.slane %v4226_v61, 5  ;;  %v4393_v61 = vld [vmem:[#allocation2 + $0x28] sm:$0xe] }
 0x2de   : > { %v5223_v41 = vrot.slane %v4393_v61, 9 }
 0x2df   : > { %5895 = vmatpush3.bf16.msra.mxu1 %v6241_v21  ;;  %v4200_v21 = vrot.slane %v4198_v53, 5  ;;  %v5220_v53 = vrot.slane %v4390_v36, 9 }
 0x2e0   : > { %5896 = vmatprep.subr.bf16.mxu1 %v6242_v60 }
 0x2e1   : > { %v4201_v7 = vor.u32 %v4200_v21, %v4197_v59  ;;  %v4417_v20 = vsel %vm6496_vm11, %v5220_v53, %v4416_v45  ;;  %v6262_v59 = vld [vmem:[%s7421_s4 + $0x228] sm:$0xff]   ;;  %v6263_v21 = vld [vmem:[%s7421_s4 + $0x230] sm:$0xff]  }
 0x2e3   : > { %5897 = vmatpush3.bf16.msra.mxu1 %v6242_v60  ;;  %v4173_v60 = vor.u32 %v4172_v22, %v4169_v30  ;;  %v4202_v39 = vrot.slane %v4201_v7, 4  ;;  %v4220_v30 = vrot.slane %v4218_v32, 5  ;;  %v6259_v22 = vld [vmem:[%s7421_s4 + $0x210] sm:$0xff]  }
 0x2e4   : > { %5898 = vmatprep.subr.bf16.mxu1 %v6243_v1 }
 0x2e5   : > { %v4174_v23 = vrot.slane %v4173_v60, 4  ;;  %v4207_v38 = vsel %vm6394_vm8, %v4202_v39, %v4206_v35  ;;  %v4394_v60 = vld [vmem:[#allocation2 + $0x30] sm:$0xe] }
 0x2e7   : > { %5899 = vmatpush3.bf16.msra.mxu1 %v6243_v1  ;;  %v7320_v1 = vld [vmem:[#allocation2 + $0x34] sm:$0x1] }
 0x2e8   : > { %5900 = vmatprep.subr.bf16.mxu1 %v6244_v5  ;;  %v4190_v18 = vshll.u32 %v7320_v1, 16 }
 0x2ea   : > { %v4192_v17 = vrot.slane %v4190_v18, 5  ;;  %v4432_v18 = vrot.slane %v7320_v1, 5 }
 0x2eb   : > { %5901 = vmatpush3.bf16.msra.mxu1 %v6244_v5  ;;  %v4212_v5 = vshll.u32 %v4120_v4, 16 }
 0x2ec   : > { %5902 = vmatprep.subr.bf16.mxu1 %v6245_v0  ;;  %v4193_v34 = vsel %vm6394_vm8, %v4188_v24, %v4192_v17 }
 0x2ed   : > { %v5210_v63 = vcombine.low %v4193_v34, %v4207_v38 }
 0x2ef   : > { %5903 = vmatpush3.bf16.msra.mxu1 %v6245_v0  ;;  %v4176_v0 = vshll.u32 %v7318_v56, 16 }
 0x2f0   : > { %5912 = vmatprep.subr.bf16.mxu1 %v6247_v44 }
 0x2f1   : > { %v4178_v8 = vrot.slane %v4176_v0, 5  ;;  %v4395_v0 = vld [vmem:[#allocation2 + $0x38] sm:$0xe] }
 0x2f2   : > { %5905 = vmatmul.mubr.bf16.vlgmr.msra.gmra.mrb[0].mxu1 %v6246_v46  ;;  %v4211_v46 = vrot.slane %v4209_v3, 4  ;;  %v6264_v3 = vld [vmem:[%s7421_s4 + $0x238] sm:$0xff]  }
 0x2f3   : > { %5908 = vmatprep.mubr.bf16.mxu1 %v6248_v40  ;;  %5913 = vmatpush3.bf16.msra.mxu1 %v6247_v44  ;;  %v4225_v44 = vrot.slane %v4223_v50, 4  ;;  %v4160_v40 = vrot.slane %v4159_v47, 4  ;;  %v4179_v12 = vsel %vm6394_vm8, %v4174_v23, %v4178_v8  ;;  %v4421_v50 = vsel %vm6496_vm11, %v5221_v48, %v4420_v19  ;;  %v5307_v48 = vld [vmem:[%s6339_s12 + $0x10] sm:$0xff]  }
 0x2f4   : > { %5914 = vmatprep.subr.bf16.mxu1 %v6249_v15  ;;  %v5244_v54 = vcombine.low %v4417_v20, %v4421_v50  ;;  %v4428_v47 = vrot.slane %v7318_v56, 5  ;;  %v4396_v56 = vld [vmem:[#allocation2 + $0x40] sm:$0xe]  ;;  %v4440_v8 = vrot.slane %v7338_v9, 5 }
 0x2f5   : > { %v4229_v55 = vor.u32 %v4228_v11, %v4225_v44  ;;  %v4424_v44 = vrot.slane %v7322_v10, 5  ;;  %v5225_v11 = vrot.slane %v4395_v0, 9 }
 0x2f6   : > { %v4429_v23 = vsel %vm6496_vm11, %v5223_v41, %v4428_v47 }
 0x2f7   : > { %5915 = vmatpush3.bf16.msra.mxu1 %v6249_v15  ;;  %v4214_v15 = vrot.slane %v4212_v5, 5  ;;  %v4230_v28 = vrot.slane %v4229_v55, 4  ;;  %v4392_v5 = vld [vmem:[#allocation2 + $0x20] sm:$0xe] }
 0x2f8   : > { %5916 = vmatprep.subr.bf16.mxu1 %v6251_v29  ;;  %v5222_v7 = vrot.slane %v4392_v5, 9 }
 0x2fa   : > { %5909 = vmatmul.mubr.bf16.gmra.mrb[4].mxu1 %v6250_v57  ;;  %v4164_v57 = vrot.slane %v4162_v13, 5  ;;  %v4436_v13 = vrot.slane %v7325_v6, 5  ;;  %v4425_v1 = vsel %vm6496_vm11, %v5222_v7, %v4424_v44 }
 0x2fb   : > { %5917 = vmatpush3.bf16.msra.mxu1 %v6251_v29  ;;  %5928 = vmatprep.mubr.bf16.mxu1 %v5208_v26  ;;  %v6257_v29 = vld [vmem:[%s7421_s4 + $0x200] sm:$0xff]   ;;  %v4232_v26 = vshll.u32 %v7333_v31, 16  ;;  %v5245_v24 = vcombine.low %v4425_v1, %v4429_v23 }
 0x2fc   : > { %5918 = vmatprep.subr.bf16.mxu1 %v6252_v16  ;;  %v4437_v10 = vsel %vm6496_vm11, %v5225_v11, %v4436_v13 }
 0x2ff   : > { %5919 = vmatpush3.bf16.msra.mxu1 %v6252_v16  ;;  %v4215_v16 = vor.u32 %v4214_v15, %v4211_v46  ;;  %v4397_v46 = vld [vmem:[#allocation2 + $0x48] sm:$0xe] }
 0x300   : > { %5920 = vmatprep.subr.bf16.mxu1 %v6253_v27  ;;  %v5227_v14 = vrot.slane %v4397_v46, 9 }
 0x301   : > { %v4216_v42 = vrot.slane %v4215_v16, 4  ;;  %v5271_v16 = vld [vmem:[%s6339_s12] sm:$0xff]  }
 0x303   : > { %5921 = vmatpush3.bf16.msra.mxu1 %v6253_v27  ;;  %v4165_v27 = vsel %vm6394_vm8, %v4160_v40, %v4164_v57  ;;  %v4221_v4 = vsel %vm6394_vm8, %v4216_v42, %v4220_v30  ;;  %v5226_v40 = vrot.slane %v4396_v56, 9  ;;  %v5306_v57 = vld [vmem:[%s6339_s12 + $0x8] sm:$0xff]   ;;  %v5273_v42 = vunpack.c.h.bf16 %v5271_v16  ;;  %v5308_v30 = vld [vmem:[%s6339_s12 + $0x18] sm:$0xff]  }
 0x304   : > { %5922 = vmatprep.subr.bf16.mxu1 %v6254_v43  ;;  %v5209_v37 = vcombine.low %v4165_v27, %v4179_v12  ;;  %v5256_v12 = vld [vmem:[%s7422_s5] ss:$0 sm:$0xff]  ;;  %v5276_v9 = vunpack.c.l.bf16 %v5306_v57  ;;  %v5272_v27 = vunpack.c.l.bf16 %v5271_v16  ;;  %v5285_v5 = vunpack.c.h.bf16 %v5308_v30 }
 0x305   : > { %v4441_v17 = vsel %vm6496_vm11, %v5226_v40, %v4440_v8 }
 0x307   : > { %5923 = vmatpush3.bf16.msra.mxu1 %v6254_v43  ;;  %v4234_v43 = vrot.slane %v4232_v26, 5 }
 0x308   : > { %5924 = vmatprep.subr.bf16.mxu1 %v6255_v51 }
 0x309   : > { %v4235_v33 = vsel %vm6394_vm8, %v4230_v28, %v4234_v43 }
 0x30a   : > { %v5211_v49 = vcombine.low %v4221_v4, %v4235_v33 }
 0x30b   : > { %5925 = vmatpush3.bf16.msra.mxu1 %v6255_v51  ;;  %v6260_v51 = vld [vmem:[%s7421_s4 + $0x218] sm:$0xff]  }
 0x30c   : > { %5926 = vmatprep.subr.bf16.mxu1 %v6256_v62 }
 0x30f   : > { %5927 = vmatpush3.bf16.msra.mxu1 %v6256_v62  ;;  %v5224_v62 = vrot.slane %v4394_v60, 9 }
 0x310   : > { %5936 = vmatprep.subr.bf16.mxu1 %v6257_v29 }
 0x311   : > { %v4433_v15 = vsel %vm6496_vm11, %v5224_v62, %v4432_v18  ;;  %v5281_v18 = vunpack.c.h.bf16 %v5307_v48 }
 0x312   : > { %5929 = vmatmul.mubr.bf16.vlgmr.msra.gmra.mrb[0].mxu1 %v5209_v37  ;;  %v5246_v6 = vcombine.low %v4433_v15, %v4437_v10  ;;  %v5277_v37 = vunpack.c.h.bf16 %v5306_v57 }
 0x313   : > { %5932 = vmatprep.mubr.bf16.mxu1 %v5210_v63  ;;  %5937 = vmatpush3.bf16.msra.mxu1 %v6257_v29  ;;  %v4444_v29 = vrot.slane %v7333_v31, 5  ;;  %v5257_v31 = vld [vmem:[%s7423_s6] ss:$0 sm:$0xff] }
 0x314   : > { %5938 = vmatprep.subr.bf16.mxu1 %v6258_v25 }
 0x315   : > { %v4445_v39 = vsel %vm6496_vm11, %v5227_v14, %v4444_v29 }
 0x316   : > { %v5247_v55 = vcombine.low %v4441_v17, %v4445_v39 }
 0x317   : > { %5939 = vmatpush3.bf16.msra.mxu1 %v6258_v25 }
 0x318   : > { %5940 = vmatprep.subr.bf16.mxu1 %v6259_v22 }
 0x31a   : > { %5933 = vmatmul.mubr.bf16.gmra.mrb[4].mxu1 %v5211_v49  ;;  %v5284_v49 = vunpack.c.l.bf16 %v5308_v30 }
 0x31b   : > { %5941 = vmatpush3.bf16.msra.mxu1 %v6259_v22  ;;  %5952 = vmatprep.mubr.bf16.mxu1 %v5244_v54 }
 0x31c   : > { %5942 = vmatprep.subr.bf16.mxu1 %v6260_v51 }
 0x31f   : > { %5943 = vmatpush3.bf16.msra.mxu1 %v6260_v51 }
 0x320   : > { %5944 = vmatprep.subr.bf16.mxu1 %v6261_v58 }
 0x323   : > { %5945 = vmatpush3.bf16.msra.mxu1 %v6261_v58 }
 0x324   : > { %5946 = vmatprep.subr.bf16.mxu1 %v6262_v59 }
 0x327   : > { %5947 = vmatpush3.bf16.msra.mxu1 %v6262_v59  ;;  %v5280_v59 = vunpack.c.l.bf16 %v5307_v48 }
 0x328   : > { %5948 = vmatprep.subr.bf16.mxu1 %v6263_v21 }
 0x32b   : > { %5949 = vmatpush3.bf16.msra.mxu1 %v6263_v21 }
 0x32c   : > { %5950 = vmatprep.subr.bf16.mxu1 %v6264_v3 }
 0x32f   : > { %5951 = vmatpush3.bf16.msra.mxu1 %v6264_v3 }
 0x332   : > { %5953 = vmatmul.mubr.bf16.vlgmr.msra.gmra.mrb[0].mxu1 %v5245_v24 }
 0x333   : > { %5956 = vmatprep.mubr.bf16.mxu1 %v5246_v6 }
 0x33a   : > { %5957 = vmatmul.mubr.bf16.gmra.mrb[4].mxu1 %v5247_v55 }
 0x405   : > { %v5954_v26 = vpop.f32.mrb[0].mxu1 }
 0x406   : > { %v4609_v34 = vmul.f32 %v5954_v26, %v5256_v12  ;;  %v4561_v35 = vpop.f32.mrb[1].mxu1 }
 0x407   : > { %v4607_v2 = vmul.f32 %v5256_v12, %v4561_v35  ;;  %v5955_v32 = vpop.f32.mrb[2].mxu1 }
 0x408   : > { %v4624_v36 = vadd.f32 %v5257_v31, %v4609_v34  ;;  %v4610_v38 = vmul.f32 %v5955_v32, %v5256_v12  ;;  %v4564_v25 = vpop.f32.mrb[3].mxu1 }
 0x409   : > { %v4622_v63 = vadd.f32 %v5257_v31, %v4607_v2  ;;  %v4608_v28 = vmul.f32 %v5256_v12, %v4564_v25 }
 0x40a   : > { %v4632_v43 = vadd.f32 %v5276_v9, %v4624_v36  ;;  %v4625_v52 = vadd.f32 %v5257_v31, %v4610_v38 }
 0x40b   : > { %v4630_v53 = vadd.f32 %v5272_v27, %v4622_v63  ;;  %v4623_v45 = vadd.f32 %v5257_v31, %v4608_v28 }
 0x40c   : > { %v4633_v22 = vadd.f32 %v5277_v37, %v4625_v52  ;;  %v4640_v33 = vmax.f32 %v4632_v43, 0.0 }
 0x40d   : > { %v4631_v19 = vadd.f32 %v5273_v42, %v4623_v45  ;;  %v5958_v4 = vpop.f32.mrb[4].mxu1  ;;  %v4638_v54 = vmax.f32 %v4630_v53, 0.0 }
 0x40e   : > { %v4641_v20 = vmax.f32 %v4633_v22, 0.0  ;;  %v4613_v50 = vmul.f32 %v5958_v4, %v5256_v12  ;;  %v4577_v51 = vpop.f32.mrb[5].mxu1 }
 0x40f   : > { %v4639_v58 = vmax.f32 %v4631_v19, 0.0  ;;  %v4611_v21 = vmul.f32 %v5256_v12, %v4577_v51  ;;  %v5959_v61 = vpop.f32.mrb[6].mxu1 }
 0x410   : > { %v5294_v60 = vpack.c.bf16 %v4641_v20, %v4640_v33  ;;  %v4628_v3 = vadd.f32 %v5257_v31, %v4613_v50  ;;  %v4614_v41 = vmul.f32 %v5959_v61, %v5256_v12  ;;  %v4580_v47 = vpop.f32.mrb[7].mxu1 }
 0x411   : > { %v5289_v0 = vpack.c.bf16 %v4639_v58, %v4638_v54  ;;  %v4626_v62 = vadd.f32 %v5257_v31, %v4611_v21  ;;  %v4612_v7 = vmul.f32 %v5256_v12, %v4580_v47 }
 0x412   : > { %5309 = vst [vmem:[%s278_s20 + $0x8] sm:$0xff] %v5294_v60   ;;  %v4636_v44 = vadd.f32 %v5284_v49, %v4628_v3  ;;  %v4629_v11 = vadd.f32 %v5257_v31, %v4614_v41 }
 0x413   : > { %5290 = vst [vmem:[%s278_s20] sm:$0xff] %v5289_v0   ;;  %v4634_v13 = vadd.f32 %v5280_v59, %v4626_v62  ;;  %v4627_v23 = vadd.f32 %v5257_v31, %v4612_v7 }
 0x414   : > { %v4637_v46 = vadd.f32 %v5285_v5, %v4629_v11  ;;  %v4644_v56 = vmax.f32 %v4636_v44, 0.0 }
 0x415   : > { %v4635_v15 = vadd.f32 %v5281_v18, %v4627_v23  ;;  %v4642_v24 = vmax.f32 %v4634_v13, 0.0 }
 0x416   : > { %v4645_v1 = vmax.f32 %v4637_v46, 0.0 }
 0x417   : > { %v4643_v10 = vmax.f32 %v4635_v15, 0.0 }
 0x418   : > { %v5304_v14 = vpack.c.bf16 %v4645_v1, %v4644_v56 }
 0x419   : > { %v5299_v6 = vpack.c.bf16 %v4643_v10, %v4642_v24 }
 0x41a   : > { %5311 = vst [vmem:[%s278_s20 + $0x18] sm:$0xff] %v5304_v14  }
 0x41b   : > { %5310 = vst [vmem:[%s278_s20 + $0x10] sm:$0xff] %v5299_v6  }
 0x41c PF: > { %s17_s24 = sadd.s32 1, %s6271_s24  }
 0x41d   : > { %p14_p4 = scmp.ge.s32.totalorder %s17_s24, 4  }
 0x41f   :  { %16 = sbr.rel (!%p14_p4) target bundleno = 1 (0x1), region = 98 }

</bundles_post_ra>
